<compile_context>
chip_gen: v7x
topology: tpu7x:2x2x1
jax: 0.10.0
libtpu: 0.0.40
codegen_flags: <defaults>
</compile_context>

<pallas_src>
import jax
import jax.numpy as jnp
from jax.experimental import pallas as pl
from jax.experimental.pallas import tpu as pltpu

# ----- block configuration (stride=1, Cin==Cout -> id-skip taken) -----
N, CIN, H, W = 2, 16, 16, 16
HW = H * W
EXPAND_RATIO = 4
CMID = CIN * EXPAND_RATIO
COUT = CIN
KSIZE = 3                        # depthwise kernel, stride 1, SAME padding
SE_RATIO = 0.25
CSQ = max(1, int(CIN * SE_RATIO))
BN_EPS = 1e-3


# ----------------------------- Pallas kernel -----------------------------
def mbconv_kernel(x_ref,
                  w_exp_ref, w_dw_ref, mask_ref, bias_ref,
                  w_sr_ref, b_sr_ref, w_se_ref,
                  w_proj_ref, bn2b_ref,
                  out_ref):
    bhw = x_ref.shape[1]                      # B*HW lanes (static)
    imgs = bhw // HW                          # images in this block (static)
    bias = bias_ref[...]                      # (Cmid, 3): [bn0_b | bn1_b | b_se]

    # ---- expand 1x1 conv (BN0 scale pre-folded; bf16 MXU, f32 acc) + swish ----
    e = jnp.dot(w_exp_ref[...], x_ref[...].astype(jnp.bfloat16),
                preferred_element_type=jnp.float32)            # (Cmid, B*HW)
    e = e + bias[:, 0:1]
    e = e * jax.nn.sigmoid(e)                                  # swish, in place

    # ---- depthwise 3x3, stride 1, SAME (BN1 scale pre-folded) ----
    # XLU lane-rolls of the flattened activation; border masks are precomputed
    # float rows of mask_ref (hoisted out of the tap loop — no VALU compares).
    wdw = w_dw_ref[...]                                        # (Cmid, 9)
    acc = e * wdw[:, 4:5]                                      # center tap
    for kh in range(KSIZE):
        for kw in range(KSIZE):
            if kh == 1 and kw == 1:
                continue
            d = (kh - 1) * W + (kw - 1)
            tap = pltpu.roll(e, shift=(-d) % bhw, axis=1)      # wrapped lanes are masked
            k = kh * KSIZE + kw
            m = mask_ref[k:k + 1, :]                           # (1, B*HW) float mask
            acc = acc + (tap * m) * wdw[:, k:k + 1]
    acc = acc + bias[:, 1:2]
    dwv = acc * jax.nn.sigmoid(acc)                            # (Cmid, B*HW)

    # ---- squeeze & excite — per-image (static, 128-aligned lane segments) ----
    inv_hw = 1.0 / HW
    segs = []
    for b in range(imgs):
        seg = dwv[:, b * HW:(b + 1) * HW]                      # (Cmid, HW) view
        pooled = jnp.sum(seg, axis=1, keepdims=True) * inv_hw                       # (Cmid,1)
        s = jnp.sum(w_sr_ref[...] * pooled, axis=0, keepdims=True) + b_sr_ref[...]  # (1,Csq)
        s = s * jax.nn.sigmoid(s)
        z = jnp.sum(w_se_ref[...] * s, axis=1, keepdims=True) + bias[:, 2:3]        # (Cmid,1)
        segs.append(seg * jax.nn.sigmoid(z))
    xse = segs[0] if imgs == 1 else jnp.concatenate(segs, axis=1)  # (Cmid, B*HW)

    # ---- project 1x1 conv (BN2 pre-folded) + bias + identity skip ----
    # x is re-read here (cheap vlds) instead of being held live through the tap loop.
    p = jnp.dot(w_proj_ref[...], xse.astype(jnp.bfloat16),
                preferred_element_type=jnp.float32)            # (Cout, B*HW)
    out_ref[...] = (p + bn2b_ref[...] + x_ref[...]).astype(out_ref.dtype)


# ----------------------------- wrapper -----------------------------------
def make_border_masks(h, w, imgs):
    """(9, imgs*h*w) float masks: tap (kh,kw) valid at each flattened lane."""
    pos = jnp.arange(imgs * h * w, dtype=jnp.int32) % (h * w)
    row, col = pos // w, pos % w
    rows = []
    for kh in range(KSIZE):
        for kw in range(KSIZE):
            dh, dw = kh - 1, kw - 1
            valid = ((row + dh >= 0) & (row + dh < h) &
                     (col + dw >= 0) & (col + dw < w))
            rows.append(valid.astype(jnp.float32))
    return jnp.stack(rows, axis=0)


def mbconv_block(x_nchw, kp, imgs_per_block=None):
    n, cin, h, w = x_nchw.shape
    hw = h * w
    cout = kp['w_proj_t'].shape[0]
    if imgs_per_block is None:
        # All images in one grid step (amortizes per-step overhead on v5e/v6e).
        # On v7x pass imgs_per_block = n // 2 so both TensorCores get a block.
        imgs_per_block = n
    assert n % imgs_per_block == 0
    n_blocks = n // imgs_per_block
    bhw = imgs_per_block * hw

    # Channel-major with batch folded into lanes: x2[c, b*HW + p] = x[b, c, p].
    # (Tiny layout op at these sizes; for production, carry activations
    #  channel-major across blocks instead of round-tripping NCHW.)
    x2 = jnp.transpose(x_nchw.reshape(n, cin, hw), (1, 0, 2)).reshape(cin, n * hw)
    masks = make_border_masks(h, w, imgs_per_block)

    def full_spec(arr):
        nd = arr.ndim
        return pl.BlockSpec(arr.shape, lambda i, _nd=nd: (0,) * _nd)

    args = (x2, kp['w_exp_t'], kp['w_dw'], masks, kp['bias_pack'],
            kp['w_sr'], kp['b_sr'], kp['w_se'], kp['w_proj_t'], kp['bn2_b'])

    in_specs = [pl.BlockSpec((cin, bhw), lambda i: (0, i))]
    in_specs += [full_spec(a) for a in args[1:]]

    out = pl.pallas_call(
        mbconv_kernel,
        out_shape=jax.ShapeDtypeStruct((cout, n * hw), x_nchw.dtype),
        grid_spec=pltpu.PrefetchScalarGridSpec(
            num_scalar_prefetch=0,
            grid=(n_blocks,),
            in_specs=in_specs,
            out_specs=pl.BlockSpec((cout, bhw), lambda i: (0, i)),
        ),
        compiler_params=pltpu.CompilerParams(
            dimension_semantics=("parallel",)),
    )(*args)
    return jnp.transpose(out.reshape(cout, n, hw), (1, 0, 2)).reshape(n, cout, h, w)


# ----------------------------- parameters --------------------------------
def fold_bn(gamma, beta, mean, var, eps=BN_EPS):
    scale = gamma / jnp.sqrt(var + eps)
    bias = beta - mean * scale
    return scale, bias


def init_params(key):
    """Raw (un-folded) parameters in PyTorch-equivalent layouts."""
    ks = jax.random.split(key, 10)
    rp = {}
    rp['w_exp'] = 0.1 * jax.random.normal(ks[0], (CMID, CIN), jnp.float32)      # [Cmid,Cin,1,1]
    rp['w_dw'] = 0.1 * jax.random.normal(ks[1], (CMID, KSIZE, KSIZE), jnp.float32)
    rp['w_sr'] = 0.1 * jax.random.normal(ks[2], (CSQ, CMID), jnp.float32)       # se_reduce
    rp['b_sr'] = 0.1 * jax.random.normal(ks[3], (CSQ,), jnp.float32)
    rp['w_se'] = 0.1 * jax.random.normal(ks[4], (CMID, CSQ), jnp.float32)       # se_expand
    rp['b_se'] = 0.1 * jax.random.normal(ks[5], (CMID,), jnp.float32)
    rp['w_proj'] = 0.1 * jax.random.normal(ks[6], (COUT, CMID), jnp.float32)

    def bn(k, c):
        k1, k2, k3, k4 = jax.random.split(k, 4)
        gamma = jax.random.uniform(k1, (c,), jnp.float32, 0.5, 1.5)
        beta = 0.1 * jax.random.normal(k2, (c,), jnp.float32)
        mean = 0.1 * jax.random.normal(k3, (c,), jnp.float32)
        var = jax.random.uniform(k4, (c,), jnp.float32, 0.5, 1.5)
        return (gamma, beta, mean, var)

    rp['bn0'] = bn(ks[7], CMID)
    rp['bn1'] = bn(ks[8], CMID)
    rp['bn2'] = bn(ks[9], COUT)
    return rp


def prepare_kernel_params(rp):
    """Fold BN scales into conv weights; bf16 MXU weights; pack small biases."""
    s0, b0 = fold_bn(*rp['bn0'])
    s1, b1 = fold_bn(*rp['bn1'])
    s2, b2 = fold_bn(*rp['bn2'])
    kp = {}
    kp['w_exp_t'] = (rp['w_exp'] * s0[:, None]).astype(jnp.bfloat16)            # (Cmid, Cin)
    kp['w_dw'] = (rp['w_dw'] * s1[:, None, None]).reshape(CMID, KSIZE * KSIZE)  # (Cmid, 9) f32
    kp['bias_pack'] = jnp.stack([b0, b1, rp['b_se']], axis=1)                   # (Cmid, 3)
    kp['w_sr'] = rp['w_sr'].T                                                   # (Cmid, Csq)
    kp['b_sr'] = rp['b_sr'][None, :]                                            # (1, Csq)
    kp['w_se'] = rp['w_se']                                                     # (Cmid, Csq)
    kp['w_proj_t'] = (rp['w_proj'] * s2[:, None]).astype(jnp.bfloat16)          # (Cout, Cmid)
    kp['bn2_b'] = b2[:, None]                                                   # (Cout, 1)
    return kp


# ----------------------------- pure-JAX reference -------------------------
def reference_forward(x, rp):
    hi = jax.lax.Precision.HIGHEST

    def bn(v, stats):
        g, b, m, var = stats
        inv = g / jnp.sqrt(var + BN_EPS)
        return v * inv[None, :, None, None] + (b - m * inv)[None, :, None, None]

    e = jnp.einsum('nchw,dc->ndhw', x, rp['w_exp'], precision=hi)
    e = bn(e, rp['bn0'])
    e = e * jax.nn.sigmoid(e)
    ep = jnp.pad(e, ((0, 0), (0, 0), (1, 1), (1, 1)))
    dw = jnp.zeros_like(e)
    for kh in range(KSIZE):
        for kw in range(KSIZE):
            wk = rp['w_dw'][:, kh, kw][None, :, None, None]
            dw = dw + ep[:, :, kh:kh + H, kw:kw + W] * wk
    dw = bn(dw, rp['bn1'])
    dw = dw * jax.nn.sigmoid(dw)
    pooled = jnp.mean(dw, axis=(2, 3))                       # (N, Cmid)
    s = pooled @ rp['w_sr'].T + rp['b_sr']
    s = s * jax.nn.sigmoid(s)
    s = s @ rp['w_se'].T + rp['b_se']
    scale = jax.nn.sigmoid(s)[:, :, None, None]
    xse = dw * scale
    out = jnp.einsum('nchw,dc->ndhw', xse, rp['w_proj'], precision=hi)
    out = bn(out, rp['bn2'])
    return out + x


# ----------------------------- main ---------------------------------------
if __name__ == "__main__":
    key = jax.random.PRNGKey(0)
    kx, kparam = jax.random.split(key)

    # PyTorch-style NCHW input; kernel layout is channel-major (C, B*HW).
    x_nchw = jax.random.normal(kx, (N, CIN, H, W), jnp.float32)

    raw_params = init_params(kparam)
    kernel_params = prepare_kernel_params(raw_params)

    out = mbconv_block(x_nchw, kernel_params)
    out = jax.block_until_ready(out)

    ref = reference_forward(x_nchw, raw_params)
    assert out.shape == (N, COUT, H, W)
    if not jnp.allclose(out, ref, rtol=2e-2, atol=2e-2):
        max_err = jnp.max(jnp.abs(out - ref))
        raise AssertionError(f"mismatch vs reference, max abs err = {max_err}")

    print("KERNEL_OK")
</pallas_src>

<mosaic_0001>
module attributes {stable_mosaic.version = 11 : i64} {
  func.func @mbconv_kernel(%arg0: i32, %arg1: memref<16x512xf32, #tpu.memory_space<vmem>>, %arg2: memref<64x16xbf16, #tpu.memory_space<vmem>>, %arg3: memref<64x9xf32, #tpu.memory_space<vmem>>, %arg4: memref<9x512xf32, #tpu.memory_space<vmem>>, %arg5: memref<64x3xf32, #tpu.memory_space<vmem>>, %arg6: memref<64x4xf32, #tpu.memory_space<vmem>>, %arg7: memref<1x4xf32, #tpu.memory_space<vmem>>, %arg8: memref<64x4xf32, #tpu.memory_space<vmem>>, %arg9: memref<16x64xbf16, #tpu.memory_space<vmem>>, %arg10: memref<16x1xf32, #tpu.memory_space<vmem>>, %arg11: memref<16x512xf32, #tpu.memory_space<vmem>>) attributes {dimension_semantics = [#tpu.dimension_semantics<parallel>], iteration_bounds = array<i64: 1>, scalar_prefetch = 0 : i64, scratch_operands = 0 : i64, tpu.core_type = #tpu.core_type<tc>, window_params = [{transform_indices = @transform_0, window_bounds = array<i64: 16, 512>}, {pipeline_mode = #tpu.pipeline_mode<synchronous>, transform_indices = @transform_1, window_bounds = array<i64: 64, 16>}, {pipeline_mode = #tpu.pipeline_mode<synchronous>, transform_indices = @transform_2, window_bounds = array<i64: 64, 9>}, {pipeline_mode = #tpu.pipeline_mode<synchronous>, transform_indices = @transform_3, window_bounds = array<i64: 9, 512>}, {pipeline_mode = #tpu.pipeline_mode<synchronous>, transform_indices = @transform_4, window_bounds = array<i64: 64, 3>}, {pipeline_mode = #tpu.pipeline_mode<synchronous>, transform_indices = @transform_5, window_bounds = array<i64: 64, 4>}, {pipeline_mode = #tpu.pipeline_mode<synchronous>, transform_indices = @transform_6, window_bounds = array<i64: 1, 4>}, {pipeline_mode = #tpu.pipeline_mode<synchronous>, transform_indices = @transform_7, window_bounds = array<i64: 64, 4>}, {pipeline_mode = #tpu.pipeline_mode<synchronous>, transform_indices = @transform_8, window_bounds = array<i64: 16, 64>}, {pipeline_mode = #tpu.pipeline_mode<synchronous>, transform_indices = @transform_9, window_bounds = array<i64: 16, 1>}, {transform_indices = @transform_10, window_bounds = array<i64: 16, 512>}]} {
    %c0 = arith.constant 0 : index
    %c0_0 = arith.constant 0 : index
    %0 = vector.load %arg5[%c0, %c0_0] : memref<64x3xf32, #tpu.memory_space<vmem>>, vector<64x3xf32>
    %c0_1 = arith.constant 0 : index
    %c0_2 = arith.constant 0 : index
    %1 = vector.load %arg2[%c0_1, %c0_2] : memref<64x16xbf16, #tpu.memory_space<vmem>>, vector<64x16xbf16>
    %c0_3 = arith.constant 0 : index
    %c0_4 = arith.constant 0 : index
    %2 = vector.load %arg1[%c0_3, %c0_4] : memref<16x512xf32, #tpu.memory_space<vmem>>, vector<16x512xf32>
    %3 = arith.truncf %2 : vector<16x512xf32> to vector<16x512xbf16>
    %cst = arith.constant dense<0.000000e+00> : vector<64x512xf32>
    %4 = tpu.matmul %1, %3, %cst {dimension_numbers = #tpu.dot_dimension_numbers<[1], [0], [0], [1], [0, 0, 1, 1], [], []>} : vector<64x16xbf16>, vector<16x512xbf16>, vector<64x512xf32> -> vector<64x512xf32>
    %5 = vector.extract_strided_slice %0 {offsets = [0, 0], sizes = [64, 1], strides = [1, 1]} : vector<64x3xf32> to vector<64x1xf32>
    %6 = vector.broadcast %5 : vector<64x1xf32> to vector<64x512xf32>
    %7 = arith.addf %4, %6 : vector<64x512xf32>
    %8 = arith.negf %7 : vector<64x512xf32>
    %9 = math.exp %8 : vector<64x512xf32>
    %cst_5 = arith.constant 1.000000e+00 : f32
    %10 = vector.broadcast %cst_5 : f32 to vector<64x512xf32>
    %11 = arith.addf %10, %9 : vector<64x512xf32>
    %12 = arith.divf %10, %11 : vector<64x512xf32>
    %13 = arith.mulf %7, %12 : vector<64x512xf32>
    %c0_6 = arith.constant 0 : index
    %c0_7 = arith.constant 0 : index
    %14 = vector.load %arg3[%c0_6, %c0_7] : memref<64x9xf32, #tpu.memory_space<vmem>>, vector<64x9xf32>
    %15 = vector.extract_strided_slice %14 {offsets = [0, 4], sizes = [64, 1], strides = [1, 1]} : vector<64x9xf32> to vector<64x1xf32>
    %16 = vector.broadcast %15 : vector<64x1xf32> to vector<64x512xf32>
    %17 = arith.mulf %13, %16 : vector<64x512xf32>
    %c17_i32 = arith.constant 17 : i32
    %18 = tpu.dynamic_rotate %13 by %c17_i32 dim 1 : vector<64x512xf32>, i32 -> vector<64x512xf32>
    %c0_8 = arith.constant 0 : index
    %c0_9 = arith.constant 0 : index
    %19 = vector.load %arg4[%c0_8, %c0_9] : memref<9x512xf32, #tpu.memory_space<vmem>>, vector<1x512xf32>
    %20 = vector.broadcast %19 : vector<1x512xf32> to vector<64x512xf32>
    %21 = arith.mulf %18, %20 : vector<64x512xf32>
    %22 = vector.extract_strided_slice %14 {offsets = [0, 0], sizes = [64, 1], strides = [1, 1]} : vector<64x9xf32> to vector<64x1xf32>
    %23 = vector.broadcast %22 : vector<64x1xf32> to vector<64x512xf32>
    %24 = arith.mulf %21, %23 : vector<64x512xf32>
    %25 = arith.addf %17, %24 : vector<64x512xf32>
    %c16_i32 = arith.constant 16 : i32
    %26 = tpu.dynamic_rotate %13 by %c16_i32 dim 1 : vector<64x512xf32>, i32 -> vector<64x512xf32>
    %c1 = arith.constant 1 : index
    %c0_10 = arith.constant 0 : index
    %27 = vector.load %arg4[%c1, %c0_10] : memref<9x512xf32, #tpu.memory_space<vmem>>, vector<1x512xf32>
    %28 = vector.broadcast %27 : vector<1x512xf32> to vector<64x512xf32>
    %29 = arith.mulf %26, %28 : vector<64x512xf32>
    %30 = vector.extract_strided_slice %14 {offsets = [0, 1], sizes = [64, 1], strides = [1, 1]} : vector<64x9xf32> to vector<64x1xf32>
    %31 = vector.broadcast %30 : vector<64x1xf32> to vector<64x512xf32>
    %32 = arith.mulf %29, %31 : vector<64x512xf32>
    %33 = arith.addf %25, %32 : vector<64x512xf32>
    %c15_i32 = arith.constant 15 : i32
    %34 = tpu.dynamic_rotate %13 by %c15_i32 dim 1 : vector<64x512xf32>, i32 -> vector<64x512xf32>
    %c2 = arith.constant 2 : index
    %c0_11 = arith.constant 0 : index
    %35 = vector.load %arg4[%c2, %c0_11] : memref<9x512xf32, #tpu.memory_space<vmem>>, vector<1x512xf32>
    %36 = vector.broadcast %35 : vector<1x512xf32> to vector<64x512xf32>
    %37 = arith.mulf %34, %36 : vector<64x512xf32>
    %38 = vector.extract_strided_slice %14 {offsets = [0, 2], sizes = [64, 1], strides = [1, 1]} : vector<64x9xf32> to vector<64x1xf32>
    %39 = vector.broadcast %38 : vector<64x1xf32> to vector<64x512xf32>
    %40 = arith.mulf %37, %39 : vector<64x512xf32>
    %41 = arith.addf %33, %40 : vector<64x512xf32>
    %c1_i32 = arith.constant 1 : i32
    %42 = tpu.dynamic_rotate %13 by %c1_i32 dim 1 : vector<64x512xf32>, i32 -> vector<64x512xf32>
    %c3 = arith.constant 3 : index
    %c0_12 = arith.constant 0 : index
    %43 = vector.load %arg4[%c3, %c0_12] : memref<9x512xf32, #tpu.memory_space<vmem>>, vector<1x512xf32>
    %44 = vector.broadcast %43 : vector<1x512xf32> to vector<64x512xf32>
    %45 = arith.mulf %42, %44 : vector<64x512xf32>
    %46 = vector.extract_strided_slice %14 {offsets = [0, 3], sizes = [64, 1], strides = [1, 1]} : vector<64x9xf32> to vector<64x1xf32>
    %47 = vector.broadcast %46 : vector<64x1xf32> to vector<64x512xf32>
    %48 = arith.mulf %45, %47 : vector<64x512xf32>
    %49 = arith.addf %41, %48 : vector<64x512xf32>
    %c511_i32 = arith.constant 511 : i32
    %50 = tpu.dynamic_rotate %13 by %c511_i32 dim 1 : vector<64x512xf32>, i32 -> vector<64x512xf32>
    %c5 = arith.constant 5 : index
    %c0_13 = arith.constant 0 : index
    %51 = vector.load %arg4[%c5, %c0_13] : memref<9x512xf32, #tpu.memory_space<vmem>>, vector<1x512xf32>
    %52 = vector.broadcast %51 : vector<1x512xf32> to vector<64x512xf32>
    %53 = arith.mulf %50, %52 : vector<64x512xf32>
    %54 = vector.extract_strided_slice %14 {offsets = [0, 5], sizes = [64, 1], strides = [1, 1]} : vector<64x9xf32> to vector<64x1xf32>
    %55 = vector.broadcast %54 : vector<64x1xf32> to vector<64x512xf32>
    %56 = arith.mulf %53, %55 : vector<64x512xf32>
    %57 = arith.addf %49, %56 : vector<64x512xf32>
    %c497_i32 = arith.constant 497 : i32
    %58 = tpu.dynamic_rotate %13 by %c497_i32 dim 1 : vector<64x512xf32>, i32 -> vector<64x512xf32>
    %c6 = arith.constant 6 : index
    %c0_14 = arith.constant 0 : index
    %59 = vector.load %arg4[%c6, %c0_14] : memref<9x512xf32, #tpu.memory_space<vmem>>, vector<1x512xf32>
    %60 = vector.broadcast %59 : vector<1x512xf32> to vector<64x512xf32>
    %61 = arith.mulf %58, %60 : vector<64x512xf32>
    %62 = vector.extract_strided_slice %14 {offsets = [0, 6], sizes = [64, 1], strides = [1, 1]} : vector<64x9xf32> to vector<64x1xf32>
    %63 = vector.broadcast %62 : vector<64x1xf32> to vector<64x512xf32>
    %64 = arith.mulf %61, %63 : vector<64x512xf32>
    %65 = arith.addf %57, %64 : vector<64x512xf32>
    %c496_i32 = arith.constant 496 : i32
    %66 = tpu.dynamic_rotate %13 by %c496_i32 dim 1 : vector<64x512xf32>, i32 -> vector<64x512xf32>
    %c7 = arith.constant 7 : index
    %c0_15 = arith.constant 0 : index
    %67 = vector.load %arg4[%c7, %c0_15] : memref<9x512xf32, #tpu.memory_space<vmem>>, vector<1x512xf32>
    %68 = vector.broadcast %67 : vector<1x512xf32> to vector<64x512xf32>
    %69 = arith.mulf %66, %68 : vector<64x512xf32>
    %70 = vector.extract_strided_slice %14 {offsets = [0, 7], sizes = [64, 1], strides = [1, 1]} : vector<64x9xf32> to vector<64x1xf32>
    %71 = vector.broadcast %70 : vector<64x1xf32> to vector<64x512xf32>
    %72 = arith.mulf %69, %71 : vector<64x512xf32>
    %73 = arith.addf %65, %72 : vector<64x512xf32>
    %c495_i32 = arith.constant 495 : i32
    %74 = tpu.dynamic_rotate %13 by %c495_i32 dim 1 : vector<64x512xf32>, i32 -> vector<64x512xf32>
    %c8 = arith.constant 8 : index
    %c0_16 = arith.constant 0 : index
    %75 = vector.load %arg4[%c8, %c0_16] : memref<9x512xf32, #tpu.memory_space<vmem>>, vector<1x512xf32>
    %76 = vector.broadcast %75 : vector<1x512xf32> to vector<64x512xf32>
    %77 = arith.mulf %74, %76 : vector<64x512xf32>
    %78 = vector.extract_strided_slice %14 {offsets = [0, 8], sizes = [64, 1], strides = [1, 1]} : vector<64x9xf32> to vector<64x1xf32>
    %79 = vector.broadcast %78 : vector<64x1xf32> to vector<64x512xf32>
    %80 = arith.mulf %77, %79 : vector<64x512xf32>
    %81 = arith.addf %73, %80 : vector<64x512xf32>
    %82 = vector.extract_strided_slice %0 {offsets = [0, 1], sizes = [64, 1], strides = [1, 1]} : vector<64x3xf32> to vector<64x1xf32>
    %83 = vector.broadcast %82 : vector<64x1xf32> to vector<64x512xf32>
    %84 = arith.addf %81, %83 : vector<64x512xf32>
    %85 = arith.negf %84 : vector<64x512xf32>
    %86 = math.exp %85 : vector<64x512xf32>
    %cst_17 = arith.constant 1.000000e+00 : f32
    %87 = vector.broadcast %cst_17 : f32 to vector<64x512xf32>
    %88 = arith.addf %87, %86 : vector<64x512xf32>
    %89 = arith.divf %87, %88 : vector<64x512xf32>
    %90 = arith.mulf %84, %89 : vector<64x512xf32>
    %91 = vector.extract_strided_slice %90 {offsets = [0, 0], sizes = [64, 256], strides = [1, 1]} : vector<64x512xf32> to vector<64x256xf32>
    %cst_18 = arith.constant dense<0.000000e+00> : vector<64xf32>
    %92 = vector.multi_reduction <add>, %91, %cst_18 [1] : vector<64x256xf32> to vector<64xf32>
    %93 = vector.shape_cast %92 : vector<64xf32> to vector<64x1xf32>
    %cst_19 = arith.constant 3.906250e-03 : f32
    %94 = vector.broadcast %cst_19 : f32 to vector<64x1xf32>
    %95 = arith.mulf %93, %94 : vector<64x1xf32>
    %c0_20 = arith.constant 0 : index
    %c0_21 = arith.constant 0 : index
    %96 = vector.load %arg6[%c0_20, %c0_21] : memref<64x4xf32, #tpu.memory_space<vmem>>, vector<64x4xf32>
    %97 = vector.broadcast %95 : vector<64x1xf32> to vector<64x4xf32>
    %98 = arith.mulf %96, %97 : vector<64x4xf32>
    %cst_22 = arith.constant dense<0.000000e+00> : vector<4xf32>
    %99 = vector.multi_reduction <add>, %98, %cst_22 [0] : vector<64x4xf32> to vector<4xf32>
    %100 = vector.shape_cast %99 : vector<4xf32> to vector<1x4xf32>
    %c0_23 = arith.constant 0 : index
    %c0_24 = arith.constant 0 : index
    %101 = vector.load %arg7[%c0_23, %c0_24] : memref<1x4xf32, #tpu.memory_space<vmem>>, vector<1x4xf32>
    %102 = arith.addf %100, %101 : vector<1x4xf32>
    %103 = arith.negf %102 : vector<1x4xf32>
    %104 = math.exp %103 : vector<1x4xf32>
    %cst_25 = arith.constant 1.000000e+00 : f32
    %105 = vector.broadcast %cst_25 : f32 to vector<1x4xf32>
    %106 = arith.addf %105, %104 : vector<1x4xf32>
    %107 = arith.divf %105, %106 : vector<1x4xf32>
    %108 = arith.mulf %102, %107 : vector<1x4xf32>
    %c0_26 = arith.constant 0 : index
    %c0_27 = arith.constant 0 : index
    %109 = vector.load %arg8[%c0_26, %c0_27] : memref<64x4xf32, #tpu.memory_space<vmem>>, vector<64x4xf32>
    %110 = vector.broadcast %108 : vector<1x4xf32> to vector<64x4xf32>
    %111 = arith.mulf %109, %110 : vector<64x4xf32>
    %cst_28 = arith.constant dense<0.000000e+00> : vector<64xf32>
    %112 = vector.multi_reduction <add>, %111, %cst_28 [1] : vector<64x4xf32> to vector<64xf32>
    %113 = vector.shape_cast %112 : vector<64xf32> to vector<64x1xf32>
    %114 = vector.extract_strided_slice %0 {offsets = [0, 2], sizes = [64, 1], strides = [1, 1]} : vector<64x3xf32> to vector<64x1xf32>
    %115 = arith.addf %113, %114 : vector<64x1xf32>
    %116 = arith.negf %115 : vector<64x1xf32>
    %117 = math.exp %116 : vector<64x1xf32>
    %cst_29 = arith.constant 1.000000e+00 : f32
    %118 = vector.broadcast %cst_29 : f32 to vector<64x1xf32>
    %119 = arith.addf %118, %117 : vector<64x1xf32>
    %120 = arith.divf %118, %119 : vector<64x1xf32>
    %121 = vector.broadcast %120 : vector<64x1xf32> to vector<64x256xf32>
    %122 = arith.mulf %91, %121 : vector<64x256xf32>
    %123 = vector.extract_strided_slice %90 {offsets = [0, 256], sizes = [64, 256], strides = [1, 1]} : vector<64x512xf32> to vector<64x256xf32>
    %cst_30 = arith.constant dense<0.000000e+00> : vector<64xf32>
    %124 = vector.multi_reduction <add>, %123, %cst_30 [1] : vector<64x256xf32> to vector<64xf32>
    %125 = vector.shape_cast %124 : vector<64xf32> to vector<64x1xf32>
    %cst_31 = arith.constant 3.906250e-03 : f32
    %126 = vector.broadcast %cst_31 : f32 to vector<64x1xf32>
    %127 = arith.mulf %125, %126 : vector<64x1xf32>
    %c0_32 = arith.constant 0 : index
    %c0_33 = arith.constant 0 : index
    %128 = vector.load %arg6[%c0_32, %c0_33] : memref<64x4xf32, #tpu.memory_space<vmem>>, vector<64x4xf32>
    %129 = vector.broadcast %127 : vector<64x1xf32> to vector<64x4xf32>
    %130 = arith.mulf %128, %129 : vector<64x4xf32>
    %cst_34 = arith.constant dense<0.000000e+00> : vector<4xf32>
    %131 = vector.multi_reduction <add>, %130, %cst_34 [0] : vector<64x4xf32> to vector<4xf32>
    %132 = vector.shape_cast %131 : vector<4xf32> to vector<1x4xf32>
    %c0_35 = arith.constant 0 : index
    %c0_36 = arith.constant 0 : index
    %133 = vector.load %arg7[%c0_35, %c0_36] : memref<1x4xf32, #tpu.memory_space<vmem>>, vector<1x4xf32>
    %134 = arith.addf %132, %133 : vector<1x4xf32>
    %135 = arith.negf %134 : vector<1x4xf32>
    %136 = math.exp %135 : vector<1x4xf32>
    %cst_37 = arith.constant 1.000000e+00 : f32
    %137 = vector.broadcast %cst_37 : f32 to vector<1x4xf32>
    %138 = arith.addf %137, %136 : vector<1x4xf32>
    %139 = arith.divf %137, %138 : vector<1x4xf32>
    %140 = arith.mulf %134, %139 : vector<1x4xf32>
    %c0_38 = arith.constant 0 : index
    %c0_39 = arith.constant 0 : index
    %141 = vector.load %arg8[%c0_38, %c0_39] : memref<64x4xf32, #tpu.memory_space<vmem>>, vector<64x4xf32>
    %142 = vector.broadcast %140 : vector<1x4xf32> to vector<64x4xf32>
    %143 = arith.mulf %141, %142 : vector<64x4xf32>
    %cst_40 = arith.constant dense<0.000000e+00> : vector<64xf32>
    %144 = vector.multi_reduction <add>, %143, %cst_40 [1] : vector<64x4xf32> to vector<64xf32>
    %145 = vector.shape_cast %144 : vector<64xf32> to vector<64x1xf32>
    %146 = vector.extract_strided_slice %0 {offsets = [0, 2], sizes = [64, 1], strides = [1, 1]} : vector<64x3xf32> to vector<64x1xf32>
    %147 = arith.addf %145, %146 : vector<64x1xf32>
    %148 = arith.negf %147 : vector<64x1xf32>
    %149 = math.exp %148 : vector<64x1xf32>
    %cst_41 = arith.constant 1.000000e+00 : f32
    %150 = vector.broadcast %cst_41 : f32 to vector<64x1xf32>
    %151 = arith.addf %150, %149 : vector<64x1xf32>
    %152 = arith.divf %150, %151 : vector<64x1xf32>
    %153 = vector.broadcast %152 : vector<64x1xf32> to vector<64x256xf32>
    %154 = arith.mulf %123, %153 : vector<64x256xf32>
    %155 = tpu.concatenate %122, %154 in 1 : vector<64x256xf32>, vector<64x256xf32> -> vector<64x512xf32>
    %c0_42 = arith.constant 0 : index
    %c0_43 = arith.constant 0 : index
    %156 = vector.load %arg9[%c0_42, %c0_43] : memref<16x64xbf16, #tpu.memory_space<vmem>>, vector<16x64xbf16>
    %157 = arith.truncf %155 : vector<64x512xf32> to vector<64x512xbf16>
    %cst_44 = arith.constant dense<0.000000e+00> : vector<16x512xf32>
    %158 = tpu.matmul %156, %157, %cst_44 {dimension_numbers = #tpu.dot_dimension_numbers<[1], [0], [0], [1], [0, 0, 1, 1], [], []>} : vector<16x64xbf16>, vector<64x512xbf16>, vector<16x512xf32> -> vector<16x512xf32>
    %c0_45 = arith.constant 0 : index
    %c0_46 = arith.constant 0 : index
    %159 = vector.load %arg10[%c0_45, %c0_46] : memref<16x1xf32, #tpu.memory_space<vmem>>, vector<16x1xf32>
    %160 = vector.broadcast %159 : vector<16x1xf32> to vector<16x512xf32>
    %161 = arith.addf %158, %160 : vector<16x512xf32>
    %c0_47 = arith.constant 0 : index
    %c0_48 = arith.constant 0 : index
    %162 = vector.load %arg1[%c0_47, %c0_48] : memref<16x512xf32, #tpu.memory_space<vmem>>, vector<16x512xf32>
    %163 = arith.addf %161, %162 : vector<16x512xf32>
    %c0_49 = arith.constant 0 : index
    %c0_50 = arith.constant 0 : index
    %164 = vector.load %arg11[%c0_49, %c0_50] : memref<16x512xf32, #tpu.memory_space<vmem>>, vector<16x512xf32>
    tpu.vector_store %arg11[%c0_49, %c0_50], %163 {strides = array<i32>} : memref<16x512xf32, #tpu.memory_space<vmem>>, vector<16x512xf32>,
    return
  }
  func.func @transform_0(%arg0: i32) -> (i32, i32) {
    %c0_i32 = arith.constant 0 : i32
    %c0_i32_0 = arith.constant 0 : i32
    return %c0_i32, %arg0 : i32, i32
  }
  func.func @transform_1(%arg0: i32) -> (i32, i32) {
    %c0_i32 = arith.constant 0 : i32
    %c0_i32_0 = arith.constant 0 : i32
    %c0_i32_1 = arith.constant 0 : i32
    return %c0_i32, %c0_i32_0 : i32, i32
  }
  func.func @transform_2(%arg0: i32) -> (i32, i32) {
    %c0_i32 = arith.constant 0 : i32
    %c0_i32_0 = arith.constant 0 : i32
    %c0_i32_1 = arith.constant 0 : i32
    return %c0_i32, %c0_i32_0 : i32, i32
  }
  func.func @transform_3(%arg0: i32) -> (i32, i32) {
    %c0_i32 = arith.constant 0 : i32
    %c0_i32_0 = arith.constant 0 : i32
    %c0_i32_1 = arith.constant 0 : i32
    return %c0_i32, %c0_i32_0 : i32, i32
  }
  func.func @transform_4(%arg0: i32) -> (i32, i32) {
    %c0_i32 = arith.constant 0 : i32
    %c0_i32_0 = arith.constant 0 : i32
    %c0_i32_1 = arith.constant 0 : i32
    return %c0_i32, %c0_i32_0 : i32, i32
  }
  func.func @transform_5(%arg0: i32) -> (i32, i32) {
    %c0_i32 = arith.constant 0 : i32
    %c0_i32_0 = arith.constant 0 : i32
    %c0_i32_1 = arith.constant 0 : i32
    return %c0_i32, %c0_i32_0 : i32, i32
  }
  func.func @transform_6(%arg0: i32) -> (i32, i32) {
    %c0_i32 = arith.constant 0 : i32
    %c0_i32_0 = arith.constant 0 : i32
    %c0_i32_1 = arith.constant 0 : i32
    return %c0_i32, %c0_i32_0 : i32, i32
  }
  func.func @transform_7(%arg0: i32) -> (i32, i32) {
    %c0_i32 = arith.constant 0 : i32
    %c0_i32_0 = arith.constant 0 : i32
    %c0_i32_1 = arith.constant 0 : i32
    return %c0_i32, %c0_i32_0 : i32, i32
  }
  func.func @transform_8(%arg0: i32) -> (i32, i32) {
    %c0_i32 = arith.constant 0 : i32
    %c0_i32_0 = arith.constant 0 : i32
    %c0_i32_1 = arith.constant 0 : i32
    return %c0_i32, %c0_i32_0 : i32, i32
  }
  func.func @transform_9(%arg0: i32) -> (i32, i32) {
    %c0_i32 = arith.constant 0 : i32
    %c0_i32_0 = arith.constant 0 : i32
    %c0_i32_1 = arith.constant 0 : i32
    return %c0_i32, %c0_i32_0 : i32, i32
  }
  func.func @transform_10(%arg0: i32) -> (i32, i32) {
    %c0_i32 = arith.constant 0 : i32
    %c0_i32_0 = arith.constant 0 : i32
    return %c0_i32, %arg0 : i32, i32
  }
}

</mosaic_0001>

<bundles_post_ra>
// kernel: tpu_custom_call.1
= control target key start
LH: loop header
LB: loop body
LE: loop exit
PB: predicated region body
PF: predicated region fallthrough
CT: control target
= control target key end

     0   :  { %v8675_v7 = vmov 0   ;;  %v4034_v12 = vmov 4   ;;  %vm125_vm0 = vcmask 130048   ;;  %s8664_s0 = inlined_call_operand.vmem [shape: f32[16,512], index: 0, kind: input, shape index: {}]   ;;  %s8665_s1 = inlined_call_operand.vmem [shape: bf16[64,16], index: 1, kind: input, shape index: {}]   ;;  %s8666_s2 = inlined_call_operand.vmem [shape: f32[64,9], index: 2, kind: input, shape index: {}]   ;;  %s8667_s3 = inlined_call_operand.vmem [shape: f32[9,512], index: 3, kind: input, shape index: {}]   ;;  %s8668_s4 = inlined_call_operand.vmem [shape: f32[64,3], index: 4, kind: input, shape index: {}]   ;;  %s8669_s5 = inlined_call_operand.vmem [shape: f32[64,4], index: 5, kind: input, shape index: {}]   ;;  %s8670_s6 = inlined_call_operand.vmem [shape: f32[1,4], index: 6, kind: input, shape index: {}]   ;;  %s8671_s7 = inlined_call_operand.vmem [shape: f32[64,4], index: 7, kind: input, shape index: {}]   ;;  %s8672_s8 = inlined_call_operand.vmem [shape: bf16[16,64], index: 8, kind: input, shape index: {}]   ;;  %s8673_s9 = inlined_call_operand.vmem [shape: f32[16,1], index: 9, kind: input, shape index: {}]   ;;  %s8674_s10 = inlined_call_operand.hbm [shape: f32[16,512], index: 10, kind: output, shape index: {}]  }
   0x1   :  { %v54_v0 = vld [vmem:[%s8664_s0 + $0x8] sm:$0xff]  ;;  %v56_v2 = vld [vmem:[%s8664_s0 + $0x18] sm:$0xff]  ;;  %v53_v5 = vld [vmem:[%s8664_s0] sm:$0xff]  ;;  %170 = vmatprep.mubr.bf16.mxu0 %v8675_v7  ;;  %243 = vmatprep.mubr.bf16.mxu1 %v8675_v7 }
   0x2   :  { %v58_v1 = vld [vmem:[%s8664_s0 + $0x28] sm:$0xff]  ;;  %v60_v4 = vld [vmem:[%s8664_s0 + $0x38] sm:$0xff]  ;;  %v57_v6 = vld [vmem:[%s8664_s0 + $0x20] sm:$0xff]  ;;  %3595 = vset.pattern.permute.xlu0 %v4034_v12  ;;  %3594 = vset.pattern.permute.xlu1 %v8675_v7 }
   0x3   :  { %v62_v3 = vpack.c.bf16 %v58_v1, %v54_v0  ;;  %v64_v8 = vpack.c.bf16 %v60_v4, %v56_v2  ;;  %v61_v9 = vpack.c.bf16 %v57_v6, %v53_v5  ;;  %v55_v10 = vld [vmem:[%s8664_s0 + $0x10] sm:$0xff]  ;;  %v3632_v14 = vld [vmem:[%s8665_s1] sm:$0xff]   ;;  %v4150_v16 = vld [vmem:[%s8666_s2 + $0x18] sm:$0xff] }
   0x4   :  { %v59_v11 = vld [vmem:[%s8664_s0 + $0x30] sm:$0xff]  ;;  %v4141_v15 = vld [vmem:[%s8666_s2] sm:$0xff]  ;;  %v3633_v18 = vld [vmem:[%s8665_s1 + $0x8] sm:$0xff]  }
   0x5   :  { %138 = vmatprep.subr.bf16.mxu0 %v62_v3  ;;  %v63_v13 = vpack.c.bf16 %v59_v11, %v55_v10  ;;  %211 = vmatprep.subr.bf16.mxu1 %v64_v8  ;;  %v39_v17 = vld [vmem:[%s8668_s4 + $0x10] sm:$0xff]  ;;  %v4163_v19 = vld [vmem:[%s8666_s2 + $0x28] sm:$0xff] }
   0x6   :  { %139 = vmatpush1.bf16.msra.mxu0 %v61_v9  ;;  %518 = vperm.xlu0 %3595, %v4141_v15  }
   0x7   :  { %212 = vmatpush1.bf16.msra.mxu1 %v63_v13  ;;  %77 = vperm.xlu1 %3594, %v39_v17  }
   0x9   :  { %3474 = vmatmul.mubr.msk.bf16.vlgmr.msra.gmra.mrb[0].mxu0 %vm125_vm0, %v3632_v14 }
   0xa   :  { %3478 = vmatmul.mubr.msk.bf16.vlgmr.msra.gmra.mrb[0].mxu1 %vm125_vm0, %v3632_v14  ;;  %180 = vmatprep.mubr.bf16.mxu0 %v8675_v7 }
   0xb   :  { %253 = vmatprep.mubr.bf16.mxu1 %v8675_v7  ;;  %533 = vperm.xlu0 %3595, %v4150_v16  }
   0xc   :  { %15 = vsyncpa [#allocation3], 0  ;;  %v40_v20 = vld [vmem:[%s8668_s4 + $0x18] sm:$0xff]  ;;  %v42_v22 = vld [vmem:[%s8668_s4 + $0x28] sm:$0xff]  ;;  %v8677_v34 = vmov 2   ;;  %v8680_v35 = vmov 1  }
   0xd   :  { %v515_v21 = vld [vmem:[%s8666_s2 + $0x38] sm:$0xff]  ;;  %82 = vperm.xlu1 %3594, %v40_v20   ;;  %v3634_v23 = vld [vmem:[%s8665_s1 + $0x10] sm:$0xff]   ;;  %v37_v24 = vld [vmem:[%s8668_s4] sm:$0xff]  ;;  %s4037_s28 = smov 16   ;;  %s4038_s29 = smov 17   ;;  %vm2909_vm9 = vcmask 31744  }
   0xe   :  { %v44_v25 = vld [vmem:[%s8668_s4 + $0x38] sm:$0xff]  ;;  %v38_v26 = vld [vmem:[%s8668_s4 + $0x8] sm:$0xff]  ;;  %v41_v28 = vld [vmem:[%s8668_s4 + $0x20] sm:$0xff]  ;;  %s4039_s12 = smov 1   ;;  %s4040_s13 = smov 15   ;;  %vm3348_vm10 = vcmask 523264  }
   0xf   :  { %543 = vperm.xlu0 %3595, %v4163_v19   ;;  %v3635_v27 = vld [vmem:[%s8665_s1 + $0x18] sm:$0xff]   ;;  %v509_v29 = vld [vmem:[%s8666_s2 + $0x8] sm:$0xff]  ;;  %v510_v30 = vld [vmem:[%s8666_s2 + $0x10] sm:$0xff]  ;;  %s4043_s25 = smov 127   ;;  %s4047_s18 = smov 112  }
  0x10   :  { %v43_v31 = vld [vmem:[%s8668_s4 + $0x30] sm:$0xff]  ;;  %v512_v32 = vld [vmem:[%s8666_s2 + $0x20] sm:$0xff]  ;;  %s4049_s1 = smov 111  }
  0x11   :  { %3475 = vmatmul.mubr.msk.bf16.gmra.mrb[4].mxu0 %vm125_vm0, %v3633_v18  ;;  %92 = vperm.xlu1 %3594, %v42_v22   ;;  %v514_v33 = vld [vmem:[%s8666_s2 + $0x30] sm:$0xff] }
  0x12   :  { %3479 = vmatmul.mubr.msk.bf16.gmra.mrb[4].mxu1 %vm125_vm0, %v3633_v18  ;;  %190 = vmatprep.mubr.bf16.mxu0 %v8675_v7 }
  0x13   :  { %263 = vmatprep.mubr.bf16.mxu1 %v8675_v7  ;;  %553 = vperm.xlu0 %3595, %v515_v21  }
  0x15   :  { %102 = vperm.xlu1 %3594, %v44_v25  }
  0x17   :  { %3597 = vset.pattern.permute.xlu0 %v8675_v7 }
  0x18   :  { %67 = vperm.xlu0 %3597, %v37_v24  }
  0x19   :  { %3476 = vmatmul.mubr.msk.bf16.gmra.mrb[8].mxu0 %vm125_vm0, %v3634_v23  ;;  %3596 = vset.pattern.permute.xlu1 %v4034_v12 }
  0x1a   :  { %3480 = vmatmul.mubr.msk.bf16.gmra.mrb[8].mxu1 %vm125_vm0, %v3634_v23  ;;  %200 = vmatprep.mubr.bf16.mxu0 %v8675_v7 }
  0x1b   :  { %273 = vmatprep.mubr.bf16.mxu1 %v8675_v7  ;;  %523 = vperm.xlu1 %3596, %v509_v29  }
  0x1c   :  { %72 = vperm.xlu0 %3597, %v38_v26  }
  0x1f   :  { %528 = vperm.xlu1 %3596, %v510_v30  }
  0x20   :  { %87 = vperm.xlu0 %3597, %v41_v28  }
  0x21   :  { %3477 = vmatmul.mubr.msk.bf16.gmra.mrb[12].mxu0 %vm125_vm0, %v3635_v27 }
  0x22   :  { %3481 = vmatmul.mubr.msk.bf16.gmra.mrb[12].mxu1 %vm125_vm0, %v3635_v27  ;;  %3384 = vmatprep.mubr.bf16.mxu0 %v8675_v7 }
  0x23   :  { %3427 = vmatprep.mubr.bf16.mxu1 %v8675_v7  ;;  %538 = vperm.xlu1 %3596, %v512_v32  }
  0x24   :  { %97 = vperm.xlu0 %3597, %v43_v31  }
  0x27   :  { %548 = vperm.xlu1 %3596, %v514_v33  }
  0x28   :  { %746 = vperm.xlu0 %3597, %v509_v29  }
  0x2b   :  { %3598 = vset.pattern.permute.xlu1 %v8675_v7 }
  0x2c   :  { %758 = vperm.xlu0 %3597, %v512_v32   ;;  %742 = vperm.xlu1 %3598, %v4141_v15  }
  0x30   :  { %766 = vperm.xlu0 %3597, %v514_v33   ;;  %750 = vperm.xlu1 %3598, %v510_v30  }
  0x34   :  { %3601 = vset.pattern.permute.xlu0 %v8677_v34  ;;  %754 = vperm.xlu1 %3598, %v4150_v16  }
  0x35   :  { %1242 = vperm.xlu0 %3601, %v509_v29  }
  0x38   :  { %762 = vperm.xlu1 %3598, %v4163_v19  }
  0x39   :  { %1254 = vperm.xlu0 %3601, %v512_v32  }
  0x3c   :  { %770 = vperm.xlu1 %3598, %v515_v21  }
  0x3d   :  { %1262 = vperm.xlu0 %3601, %v514_v33  }
  0x40   :  { %3599 = vset.pattern.permute.xlu1 %v8680_v35 }
  0x41   :  { %994 = vperm.xlu1 %3599, %v509_v29  }
  0x45   :  { %998 = vperm.xlu1 %3599, %v510_v30  }
  0x49   :  { %1006 = vperm.xlu1 %3599, %v512_v32  }
  0x4d   :  { %1014 = vperm.xlu1 %3599, %v514_v33  }
  0x51   :  { %3600 = vset.pattern.permute.xlu1 %v8677_v34 }
  0x52   :  { %1238 = vperm.xlu1 %3600, %v4141_v15  }
  0x56   :  { %1246 = vperm.xlu1 %3600, %v510_v30  }
  0x5a   :  { %1250 = vperm.xlu1 %3600, %v4150_v16  }
  0x5e   :  { %1258 = vperm.xlu1 %3600, %v4163_v19  }
  0x62   :  { %1266 = vperm.xlu1 %3600, %v515_v21  }
  0x85   :  { %v4231_v36 = vpop.permute.xlu0 %518 }
  0x8a   :  { %v4233_v37 = vpop.permute.xlu0 %533 }
  0x8e   :  { %v4235_v38 = vpop.permute.xlu0 %543 }
  0x92   :  { %v4237_v39 = vpop.permute.xlu0 %553 }
  0x93   :  { %9037 = vst [vmem:[#allocation5_spill] sm:$0xff] %v4237_v39  ;;  %v9200_v39 = vmov 6  }
  0x97   :  { %v68_v40 = vpop.permute.xlu0 %67 }
  0x9b   :  { %v73_v56 = vpop.permute.xlu0 %72 }
  0xdc   :  { %v172_v41 = vpop.f32.mrb[0].mxu0 }
  0xdd   :  { %v4239_v42 = vadd.f32 %v172_v41, %v68_v40  ;;  %v245_v43 = vpop.f32.mrb[0].mxu1  ;;  %v174_v44 = vpop.f32.mrb[1].mxu0 }
  0xde   :  { %v4241_v45 = vadd.f32 %v245_v43, %v68_v40  ;;  %v247_v46 = vpop.f32.mrb[1].mxu1  ;;  %v176_v47 = vpop.f32.mrb[2].mxu0  ;;  %v4244_v49 = vadd.f32 %v174_v44, %v68_v40 }
  0xdf   :  { %v3482_v48 = vmul.f32 -1.442695, %v4239_v42  ;;  %v249_v50 = vpop.f32.mrb[2].mxu1  ;;  %v178_v51 = vpop.f32.mrb[3].mxu0  ;;  %v4248_v55 = vadd.f32 %v247_v46, %v68_v40  ;;  %v4261_v63 = vadd.f32 %v176_v47, %v73_v56 }
  0xe0   :  { %v3484_v52 = vmul.f32 -1.442695, %v4241_v45  ;;  %v251_v53 = vpop.f32.mrb[3].mxu1  ;;  %v3483_v54 = vmul.f32 -1.442695, %v4244_v49  ;;  %v4270_v5 = vadd.f32 %v249_v50, %v73_v56  ;;  %v4299_v27 = vadd.f32 %v178_v51, %v73_v56  ;;  %v4310_v41 = vpop.permute.xlu1 %77 }
  0xe1   :  { %3637 = vpow2.f32 %v3482_v48  ;;  %v3485_v62 = vmul.f32 -1.442695, %v4248_v55  ;;  %v3486_v4 = vmul.f32 -1.442695, %v4261_v63  ;;  %v4313_v46 = vadd.f32 %v251_v53, %v73_v56 }
  0xe2   :  { %3639 = vpow2.f32 %v3484_v52  ;;  %v3488_v15 = vmul.f32 -1.442695, %v4270_v5  ;;  %v3487_v44 = vmul.f32 -1.442695, %v4299_v27  ;;  %v8679_v50 = vlaneseq }
  0xe3   :  { %3641 = vpow2.f32 %v3483_v54  ;;  %v3489_v51 = vmul.f32 -1.442695, %v4313_v46 }
  0xe4   :  { %v4250_v57 = vpop.f32.mrb[4].mxu0  ;;  %3643 = vpow2.f32 %v3485_v62  ;;  %v4323_v52 = vpop.permute.xlu1 %82  ;;  %v4330_v54 = vshrl.u32 %v8679_v50, 7 }
  0xe5   :  { %v4252_v58 = vpop.f32.mrb[4].mxu1  ;;  %v4254_v59 = vpop.f32.mrb[5].mxu0  ;;  %v4337_v62 = vadd.f32 %v4250_v57, %v4310_v41 }
  0xe6   :  { %v4256_v60 = vpop.f32.mrb[5].mxu1  ;;  %v4258_v61 = vpop.f32.mrb[6].mxu0 }
  0xe7   :  { %v4263_v0 = vpop.f32.mrb[6].mxu1  ;;  %v4265_v1 = vpop.f32.mrb[7].mxu0 }
  0xe8   :  { %v4267_v2 = vpop.f32.mrb[7].mxu1  ;;  %v4467_v50 = vadd.f32 %v4265_v1, %v4323_v52 }
  0xe9   :  { %v4481_v1 = vadd.f32 %v4267_v2, %v4323_v52 }
  0xea   :  { %v3495_v35 = vmul.f32 -1.442695, %v4467_v50 }
  0xeb   :  { %v3638_v3 = vpop.eup %3637 }
  0xec   :  { %v3640_v6 = vpop.eup %3639  ;;  %v380_v8 = vadd.f32 1.0, %v3638_v3  ;;  %v4272_v9 = vpop.f32.mrb[8].mxu0 }
  0xed   :  { %v382_v10 = vadd.f32 1.0, %v3640_v6  ;;  %v4274_v11 = vpop.f32.mrb[8].mxu1  ;;  %v4276_v12 = vpop.f32.mrb[9].mxu0  ;;  %v687_v6 = vld [vmem:[%s8667_s3] ss:$8 sm:$0xf] }
  0xee   :  { %3645 = vrcp.f32 %v380_v8  ;;  %v4278_v13 = vpop.f32.mrb[9].mxu1  ;;  %v4280_v14 = vpop.f32.mrb[10].mxu0 }
  0xef   :  { %3647 = vpow2.f32 %v3486_v4  ;;  %v4283_v16 = vpop.f32.mrb[10].mxu1  ;;  %v4285_v17 = vpop.f32.mrb[11].mxu0  ;;  %v4346_v4 = vsub.s32 2, %v4330_v54 }
  0xf0   :  { %3649 = vrcp.f32 %v382_v10  ;;  %v4287_v18 = vpop.f32.mrb[11].mxu1  ;;  %v3642_v19 = vpop.eup %3641 }
  0xf1   :  { %3651 = vpow2.f32 %v3488_v15  ;;  %v381_v20 = vadd.f32 1.0, %v3642_v19  ;;  %v3644_v22 = vpop.eup %3643  ;;  %v4339_v3 = vpop.permute.xlu1 %92  ;;  %v3490_v15 = vmul.f32 -1.442695, %v4337_v62  ;;  %v4360_v19 = vadd.f32 %v4252_v58, %v4310_v41 }
  0xf2   :  { %v383_v31 = vadd.f32 1.0, %v3644_v22  ;;  %v4372_v22 = vsub.s32 3, %v4330_v54 }
  0xf3   :  { %3653 = vrcp.f32 %v381_v20 }
  0xf4   :  { %v4289_v21 = vpop.f32.mrb[12].mxu0  ;;  %3655 = vrcp.f32 %v383_v31 }
  0xf5   :  { %v4291_v23 = vpop.f32.mrb[12].mxu1  ;;  %v4293_v24 = vpop.f32.mrb[13].mxu0  ;;  %3657 = vpow2.f32 %v3487_v44  ;;  %v3492_v44 = vmul.f32 -1.442695, %v4360_v19 }
  0xf6   :  { %v4295_v25 = vpop.f32.mrb[13].mxu1  ;;  %v4297_v26 = vpop.f32.mrb[14].mxu0 }
  0xf7   :  { %v4301_v28 = vpop.f32.mrb[14].mxu1  ;;  %v4303_v29 = vpop.f32.mrb[15].mxu0 }
  0xf8   :  { %v3646_v30 = vpop.eup %3645  ;;  %v4305_v32 = vpop.f32.mrb[15].mxu1 }
  0xf9   :  { %v3648_v33 = vpop.eup %3647  ;;  %v4308_v40 = vmul.f32 %v3646_v30, %v4239_v42  ;;  %v4362_v20 = vpop.permute.xlu1 %102 }
  0xfa   :  { %v3650_v43 = vpop.eup %3649  ;;  %v384_v47 = vadd.f32 1.0, %v3648_v33 }
  0xfb   :  { %837 = vrot.lane.b32.xlu0 %v4308_v40, %s4037_s28  ;;  %588 = vrot.lane.b32.xlu1 %v4308_v40, %s4038_s29  ;;  %v3652_v48 = vpop.eup %3651  ;;  %v4320_v42 = vmul.f32 %v3650_v43, %v4241_v45  ;;  %v3514_v45 = vld [vmem:[%s8667_s3 + $0x1] ss:$8 sm:$0xf]  ;;  %v3515_v43 = vld [vmem:[%s8667_s3 + $0x2] ss:$8 sm:$0xf] }
  0xfc   :  { %3659 = vrcp.f32 %v384_v47  ;;  %v386_v53 = vadd.f32 1.0, %v3652_v48  ;;  %v4355_v8 = vrot.slane %v3514_v45, %v4346_v4  ;;  %v4378_v33 = vrot.slane %v3514_v45, %v4372_v22 }
  0xfd   :  { %v3654_v56 = vpop.eup %3653  ;;  %3661 = vpow2.f32 %v3489_v51  ;;  %v4384_v47 = vpop.permute.xlu1 %523 }
  0xfe   :  { %3663 = vrcp.f32 %v386_v53  ;;  %v4352_v57 = vmul.f32 %v3654_v56, %v4244_v49  ;;  %9038 = vst [vmem:[#allocation6_spill] sm:$0xff] %v4355_v8  ;;  %v3656_v10 = vpop.eup %3655  ;;  %v4369_v49 = vrot.slane %v687_v6, %v4346_v4  ;;  %9039 = vst [vmem:[#allocation7_spill] sm:$0xff] %v4378_v33  ;;  %v4397_v56 = vrot.slane %v3515_v43, %v4346_v4 }
  0xff   :  { %869 = vrot.lane.b32.xlu0 %v4320_v42, %s4037_s28  ;;  %620 = vrot.lane.b32.xlu1 %v4320_v42, %s4038_s29  ;;  %v3658_v30 = vpop.eup %3657  ;;  %v4375_v31 = vmul.f32 %v3656_v10, %v4248_v55  ;;  %3665 = vpow2.f32 %v3490_v15  ;;  %v4391_v55 = vrot.slane %v687_v6, %v4372_v22  ;;  %v4400_v10 = vrot.slane %v3515_v43, %v4372_v22 }
 0x100   :  { %v385_v48 = vadd.f32 1.0, %v3658_v30  ;;  %9041 = vst [vmem:[#allocation9_spill] sm:$0xff] %v4397_v56  ;;  %3667 = vpow2.f32 %v3492_v44  ;;  %v4404_v15 = vadd.f32 %v4254_v59, %v4310_v41  ;;  %v4429_v44 = vadd.f32 %v4258_v61, %v4323_v52 }
 0x101   :  { %9040 = vst [vmem:[#allocation8_spill] sm:$0xff] %v4391_v55  ;;  %9042 = vst [vmem:[#allocation10_spill] sm:$0xff] %v4400_v10  ;;  %v4406_v7 = vpop.permute.xlu1 %528 }
 0x102   :  { %3669 = vrcp.f32 %v385_v48  ;;  %v3491_v30 = vmul.f32 -1.442695, %v4404_v15 }
 0x103   :  { %1333 = vrot.lane.b32.xlu0 %v4308_v40, %s4039_s12  ;;  %1085 = vrot.lane.b32.xlu1 %v4308_v40, %s4040_s13 }
 0x105   :  { %v4424_v43 = vpop.permute.xlu1 %538 }
 0x106   :  { %v3660_v58 = vpop.eup %3659 }
 0x107   :  { %853 = vrot.lane.b32.xlu0 %v4352_v57, %s4037_s28  ;;  %1117 = vrot.lane.b32.xlu1 %v4320_v42, %s4040_s13  ;;  %v3662_v51 = vpop.eup %3661  ;;  %v4394_v53 = vmul.f32 %v3660_v58, %v4261_v63  ;;  %v4418_v58 = vadd.f32 %v4256_v60, %v4310_v41 }
 0x108   :  { %v3664_v45 = vpop.eup %3663  ;;  %v387_v63 = vadd.f32 1.0, %v3662_v51 }
 0x109   :  { %v4413_v6 = vmul.f32 %v3664_v45, %v4270_v5  ;;  %v3666_v59 = vpop.eup %3665  ;;  %v3493_v5 = vmul.f32 -1.442695, %v4418_v58  ;;  %v4435_v48 = vpop.permute.xlu1 %548  ;;  %v4439_v45 = vadd.f32 %v4263_v0, %v4323_v52 }
 0x10a   :  { %3671 = vrcp.f32 %v387_v63  ;;  %v388_v60 = vadd.f32 1.0, %v3666_v59  ;;  %v3668_v41 = vpop.eup %3667  ;;  %v3494_v63 = vmul.f32 -1.442695, %v4429_v44 }
 0x10b   :  { %885 = vrot.lane.b32.xlu0 %v4375_v31, %s4037_s28  ;;  %604 = vrot.lane.b32.xlu1 %v4352_v57, %s4038_s29  ;;  %3673 = vpow2.f32 %v3491_v30  ;;  %v390_v61 = vadd.f32 1.0, %v3668_v41  ;;  %v3496_v0 = vmul.f32 -1.442695, %v4439_v45 }
 0x10c   :  { %v3670_v51 = vpop.eup %3669  ;;  %3675 = vpow2.f32 %v3493_v5 }
 0x10d   :  { %3677 = vrcp.f32 %v388_v60  ;;  %v4447_v30 = vmul.f32 %v3670_v51, %v4299_v27  ;;  %v4449_v59 = vpop.permute.xlu1 %742 }
 0x10e   :  { %9043 = vst [vmem:[#allocation11_spill] sm:$0xff] %v4449_v59  ;;  %3679 = vpow2.f32 %v3494_v63 }
 0x10f   :  { %636 = vrot.lane.b32.xlu1 %v4375_v31, %s4038_s29  ;;  %590 = vrot.lane.b32.xlu0 %v4394_v53, %s4038_s29  ;;  %3681 = vrcp.f32 %v390_v61 }
 0x110   :  { %3683 = vpow2.f32 %v3496_v0 }
 0x111   :  { %v4463_v27 = vpop.permute.xlu1 %750 }
 0x112   :  { %9044 = vst [vmem:[#allocation12_spill] sm:$0xff] %v4463_v27 }
 0x113   :  { %1101 = vrot.lane.b32.xlu1 %v4352_v57, %s4040_s13  ;;  %622 = vrot.lane.b32.xlu0 %v4413_v6, %s4038_s29 }
 0x114   :  { %v3672_v5 = vpop.eup %3671 }
 0x115   :  { %v3674_v34 = vpop.eup %3673  ;;  %v4457_v60 = vmul.f32 %v3672_v5, %v4313_v46  ;;  %v4476_v0 = vpop.permute.xlu1 %754 }
 0x116   :  { %v389_v41 = vadd.f32 1.0, %v3674_v34  ;;  %v3676_v51 = vpop.eup %3675  ;;  %9045 = vst [vmem:[#allocation13_spill] sm:$0xff] %v4476_v0 }
 0x117   :  { %1133 = vrot.lane.b32.xlu1 %v4375_v31, %s4040_s13  ;;  %1087 = vrot.lane.b32.xlu0 %v4394_v53, %s4040_s13  ;;  %v3678_v63 = vpop.eup %3677  ;;  %v391_v46 = vadd.f32 1.0, %v3676_v51 }
 0x118   :  { %3685 = vrcp.f32 %v389_v41  ;;  %v3680_v61 = vpop.eup %3679  ;;  %v4474_v5 = vmul.f32 %v3678_v63, %v4337_v62  ;;  %v3497_v63 = vmul.f32 -1.442695, %v4481_v1 }
 0x119   :  { %v3682_v34 = vpop.eup %3681  ;;  %3687 = vrcp.f32 %v391_v46  ;;  %v392_v41 = vadd.f32 1.0, %v3680_v61  ;;  %v4495_v2 = vpop.permute.xlu1 %762 }
 0x11a   :  { %v3684_v51 = vpop.eup %3683  ;;  %v4488_v62 = vmul.f32 %v3682_v34, %v4360_v19  ;;  %3689 = vpow2.f32 %v3495_v35  ;;  %9046 = vst [vmem:[#allocation14_spill] sm:$0xff] %v4495_v2  ;;  %v88_v46 = vpop.permute.xlu0 %87 }
 0x11b   :  { %839 = vrot.lane.b32.xlu1 %v4394_v53, %s4037_s28  ;;  %1119 = vrot.lane.b32.xlu0 %v4413_v6, %s4040_s13  ;;  %v394_v52 = vadd.f32 1.0, %v3684_v51  ;;  %3691 = vrcp.f32 %v392_v41  ;;  %v4498_v61 = vadd.f32 %v4272_v9, %v88_v46  ;;  %v4511_v51 = vadd.f32 %v4274_v11, %v88_v46 }
 0x11c   :  { %3693 = vpow2.f32 %v3497_v63 }
 0x11d   :  { %3695 = vrcp.f32 %v394_v52  ;;  %v4507_v19 = vpop.permute.xlu1 %770  ;;  %v3498_v41 = vmul.f32 -1.442695, %v4498_v61  ;;  %v3500_v52 = vmul.f32 -1.442695, %v4511_v51 }
 0x11e   :  { %9047 = vst [vmem:[#allocation15_spill] sm:$0xff] %v4507_v19 }
 0x11f   :  { %871 = vrot.lane.b32.xlu1 %v4413_v6, %s4037_s28  ;;  %606 = vrot.lane.b32.xlu0 %v4447_v30, %s4038_s29  ;;  %3697 = vpow2.f32 %v3498_v41 }
 0x120   :  { %3699 = vpow2.f32 %v3500_v52  ;;  %v4550_v52 = vpop.permute.xlu0 %97 }
 0x122   :  { %v3686_v0 = vpop.eup %3685 }
 0x123   :  { %855 = vrot.lane.b32.xlu1 %v4447_v30, %s4037_s28  ;;  %638 = vrot.lane.b32.xlu0 %v4457_v60, %s4038_s29  ;;  %v4505_v35 = vmul.f32 %v3686_v0, %v4404_v15  ;;  %v3688_v34 = vpop.eup %3687  ;;  %v4520_v15 = vpop.permute.xlu1 %994 }
 0x124   :  { %v3690_v9 = vpop.eup %3689  ;;  %v4518_v63 = vmul.f32 %v3688_v34, %v4418_v58  ;;  %9048 = vst [vmem:[#allocation16_spill] sm:$0xff] %v4520_v15  ;;  %v4531_v58 = vadd.f32 %v4276_v12, %v88_v46 }
 0x125   :  { %v3692_v0 = vpop.eup %3691  ;;  %v393_v11 = vadd.f32 1.0, %v3690_v9 }
 0x126   :  { %v3694_v19 = vpop.eup %3693  ;;  %v4528_v2 = vmul.f32 %v3692_v0, %v4429_v44  ;;  %v3499_v44 = vmul.f32 -1.442695, %v4531_v58  ;;  %v4544_v0 = vadd.f32 %v4278_v13, %v88_v46 }
 0x127   :  { %887 = vrot.lane.b32.xlu1 %v4457_v60, %s4037_s28  ;;  %1103 = vrot.lane.b32.xlu0 %v4447_v30, %s4040_s13  ;;  %v3696_v27 = vpop.eup %3695  ;;  %v4537_v34 = vpop.permute.xlu1 %998  ;;  %3701 = vrcp.f32 %v393_v11  ;;  %v395_v41 = vadd.f32 1.0, %v3694_v19 }
 0x128   :  { %9049 = vst [vmem:[#allocation17_spill] sm:$0xff] %v4528_v2  ;;  %9050 = vst [vmem:[#allocation18_spill] sm:$0xff] %v4537_v34  ;;  %v4540_v9 = vmul.f32 %v3696_v27, %v4439_v45  ;;  %v3501_v45 = vmul.f32 -1.442695, %v4544_v0  ;;  %v4557_v27 = vadd.f32 %v4280_v14, %v4339_v3 }
 0x129   :  { %3703 = vrcp.f32 %v395_v41  ;;  %v3698_v12 = vpop.eup %3697  ;;  %v4563_v41 = vpop.permute.xlu0 %746 }
 0x12a   :  { %3705 = vpow2.f32 %v3499_v44  ;;  %v396_v13 = vadd.f32 1.0, %v3698_v12  ;;  %v3700_v46 = vpop.eup %3699  ;;  %9052 = vst [vmem:[#allocation20_spill] sm:$0xff] %v4563_v41  ;;  %v4567_v44 = vadd.f32 %v4283_v16, %v4339_v3 }
 0x12b   :  { %592 = vrot.lane.b32.xlu1 %v4474_v5, %s4038_s29  ;;  %1135 = vrot.lane.b32.xlu0 %v4457_v60, %s4040_s13  ;;  %v4552_v11 = vpop.permute.xlu1 %1006  ;;  %3707 = vpow2.f32 %v3501_v45  ;;  %v398_v12 = vadd.f32 1.0, %v3700_v46 }
 0x12c   :  { %9051 = vst [vmem:[#allocation19_spill] sm:$0xff] %v4552_v11  ;;  %v3502_v11 = vmul.f32 -1.442695, %v4557_v27  ;;  %3709 = vrcp.f32 %v396_v13  ;;  %v3504_v16 = vmul.f32 -1.442695, %v4567_v44 }
 0x12d   :  { %v4584_v41 = vpop.permute.xlu0 %758 }
 0x12e   :  { %3711 = vpow2.f32 %v3502_v11  ;;  %9055 = vst [vmem:[#allocation23_spill] sm:$0xff] %v4584_v41 }
 0x12f   :  { %624 = vrot.lane.b32.xlu1 %v4488_v62, %s4038_s29  ;;  %841 = vrot.lane.b32.xlu0 %v4474_v5, %s4037_s28  ;;  %v4574_v14 = vpop.permute.xlu1 %1014  ;;  %3713 = vrcp.f32 %v398_v12  ;;  %v4599_v12 = vadd.f32 %v4285_v17, %v4339_v3  ;;  %v4613_v17 = vadd.f32 %v4287_v18, %v4339_v3 }
 0x130   :  { %9053 = vst [vmem:[#allocation21_spill] sm:$0xff] %v4574_v14  ;;  %3715 = vpow2.f32 %v3504_v16 }
 0x131   :  { %v3702_v19 = vpop.eup %3701  ;;  %v4595_v14 = vpop.permute.xlu0 %766  ;;  %v3505_v18 = vmul.f32 -1.442695, %v4613_v17 }
 0x132   :  { %v4577_v34 = vmul.f32 %v3702_v19, %v4467_v50  ;;  %9058 = vst [vmem:[#allocation26_spill] sm:$0xff] %v4595_v14  ;;  %v3503_v14 = vmul.f32 -1.442695, %v4599_v12 }
 0x133   :  { %1089 = vrot.lane.b32.xlu1 %v4474_v5, %s4040_s13  ;;  %873 = vrot.lane.b32.xlu0 %v4488_v62, %s4037_s28  ;;  %v3704_v45 = vpop.eup %3703  ;;  %v4589_v46 = vpop.permute.xlu1 %1238 }
 0x134   :  { %9054 = vst [vmem:[#allocation22_spill] sm:$0xff] %v4577_v34  ;;  %v3706_v15 = vpop.eup %3705  ;;  %v4587_v13 = vmul.f32 %v3704_v45, %v4481_v1  ;;  %9057 = vst [vmem:[#allocation25_spill] sm:$0xff] %v4589_v46  ;;  %v4705_v46 = vadd.f32 %v4297_v26, %v4362_v20 }
 0x135   :  { %v397_v50 = vadd.f32 1.0, %v3706_v15  ;;  %v3708_v11 = vpop.eup %3707 }
 0x136   :  { %9056 = vst [vmem:[#allocation24_spill] sm:$0xff] %v4587_v13  ;;  %v3710_v19 = vpop.eup %3709  ;;  %v399_v45 = vadd.f32 1.0, %v3708_v11  ;;  %v3510_v26 = vmul.f32 -1.442695, %v4705_v46 }
 0x137   :  { %1121 = vrot.lane.b32.xlu1 %v4488_v62, %s4040_s13  ;;  %857 = vrot.lane.b32.xlu0 %v4505_v35, %s4037_s28  ;;  %v4605_v1 = vpop.permute.xlu1 %1246  ;;  %3717 = vrcp.f32 %v397_v50  ;;  %v4608_v15 = vmul.f32 %v3710_v19, %v4498_v61 }
 0x138   :  { %9059 = vst [vmem:[#allocation27_spill] sm:$0xff] %v4605_v1  ;;  %v3712_v16 = vpop.eup %3711  ;;  %v4619_v1 = vpop.permute.xlu0 %1242  ;;  %3719 = vrcp.f32 %v399_v45 }
 0x139   :  { %v3714_v41 = vpop.eup %3713  ;;  %9060 = vst [vmem:[#allocation28_spill] sm:$0xff] %v4619_v1  ;;  %v400_v50 = vadd.f32 1.0, %v3712_v16  ;;  %3721 = vpow2.f32 %v3503_v14 }
 0x13a   :  { %v3716_v11 = vpop.eup %3715  ;;  %v4622_v61 = vmul.f32 %v3714_v41, %v4511_v51  ;;  %v4641_v51 = vadd.f32 %v4289_v21, %v4550_v52 }
 0x13b   :  { %608 = vrot.lane.b32.xlu1 %v4505_v35, %s4038_s29  ;;  %889 = vrot.lane.b32.xlu0 %v4518_v63, %s4037_s28  ;;  %v4624_v19 = vpop.permute.xlu1 %1250  ;;  %v402_v3 = vadd.f32 1.0, %v3716_v11  ;;  %3723 = vrcp.f32 %v400_v50  ;;  %v4648_v50 = vadd.f32 %v4291_v23, %v4550_v52 }
 0x13c   :  { %9061 = vst [vmem:[#allocation29_spill] sm:$0xff] %v4624_v19  ;;  %v4631_v1 = vpop.permute.xlu0 %1254  ;;  %3725 = vpow2.f32 %v3505_v18  ;;  %v3506_v18 = vmul.f32 -1.442695, %v4641_v51 }
 0x13d   :  { %9062 = vst [vmem:[#allocation30_spill] sm:$0xff] %v4631_v1  ;;  %3727 = vrcp.f32 %v402_v3  ;;  %v3508_v23 = vmul.f32 -1.442695, %v4648_v50 }
 0x13e   :  { %3729 = vpow2.f32 %v3506_v18 }
 0x13f   :  { %640 = vrot.lane.b32.xlu1 %v4518_v63, %s4038_s29  ;;  %594 = vrot.lane.b32.xlu0 %v4528_v2, %s4038_s29  ;;  %v4633_v16 = vpop.permute.xlu1 %1258  ;;  %3731 = vpow2.f32 %v3508_v23 }
 0x140   :  { %9063 = vst [vmem:[#allocation31_spill] sm:$0xff] %v4633_v16  ;;  %v4654_v11 = vpop.permute.xlu0 %1262 }
 0x141   :  { %v3718_v45 = vpop.eup %3717  ;;  %9065 = vst [vmem:[#allocation33_spill] sm:$0xff] %v4654_v11 }
 0x142   :  { %v4644_v41 = vmul.f32 %v3718_v45, %v4531_v58  ;;  %v3720_v14 = vpop.eup %3719 }
 0x143   :  { %1105 = vrot.lane.b32.xlu1 %v4505_v35, %s4040_s13  ;;  %626 = vrot.lane.b32.xlu0 %v4540_v9, %s4038_s29  ;;  %v3722_v21 = vpop.eup %3721  ;;  %v4658_v3 = vmul.f32 %v3720_v14, %v4544_v0  ;;  %v4660_v58 = vpop.permute.xlu1 %1266 }
 0x144   :  { %9064 = vst [vmem:[#allocation32_spill] sm:$0xff] %v4644_v41  ;;  %9067 = vst [vmem:[#allocation35_spill] sm:$0xff] %v4660_v58  ;;  %v401_v16 = vadd.f32 1.0, %v3722_v21  ;;  %v4676_v58 = vadd.f32 %v4293_v24, %v4550_v52  ;;  %v4692_v24 = vadd.f32 %v4295_v25, %v4550_v52 }
 0x145   :  { %9066 = vst [vmem:[#allocation34_spill] sm:$0xff] %v4658_v3  ;;  %v3724_v45 = vpop.eup %3723 }
 0x146   :  { %v3726_v11 = vpop.eup %3725  ;;  %v4668_v1 = vmul.f32 %v3724_v45, %v4557_v27  ;;  %3733 = vrcp.f32 %v401_v16  ;;  %v3507_v23 = vmul.f32 -1.442695, %v4676_v58 }
 0x147   :  { %1137 = vrot.lane.b32.xlu1 %v4518_v63, %s4040_s13  ;;  %1091 = vrot.lane.b32.xlu0 %v4528_v2, %s4040_s13  ;;  %v3728_v14 = vpop.eup %3727  ;;  %v403_v18 = vadd.f32 1.0, %v3726_v11 }
 0x148   :  { %9068 = vst [vmem:[#allocation36_spill] sm:$0xff] %v4668_v1  ;;  %v4683_v27 = vmul.f32 %v3728_v14, %v4567_v44  ;;  %v3730_v11 = vpop.eup %3729  ;;  %v3509_v14 = vmul.f32 -1.442695, %v4692_v24 }
 0x149   :  { %3735 = vrcp.f32 %v403_v18  ;;  %v3732_v25 = vpop.eup %3731  ;;  %v404_v52 = vadd.f32 1.0, %v3730_v11 }
 0x14a   :  { %9069 = vst [vmem:[#allocation37_spill] sm:$0xff] %v4683_v27  ;;  %3737 = vpow2.f32 %v3507_v23  ;;  %v4717_v23 = vadd.f32 %v4301_v28, %v4362_v20  ;;  %v406_v56 = vadd.f32 1.0, %v3732_v25 }
 0x14b   :  { %843 = vrot.lane.b32.xlu1 %v4528_v2, %s4037_s28  ;;  %1123 = vrot.lane.b32.xlu0 %v4540_v9, %s4040_s13  ;;  %3739 = vpow2.f32 %v3509_v14 }
 0x14c   :  { %3741 = vrcp.f32 %v404_v52  ;;  %v3512_v33 = vmul.f32 -1.442695, %v4717_v23 }
 0x14d   :  { %3743 = vpow2.f32 %v3510_v26 }
 0x14e   :  { %3745 = vrcp.f32 %v406_v56  ;;  %v4755_v56 = vadd.f32 %v4303_v29, %v4362_v20 }
 0x14f   :  { %875 = vrot.lane.b32.xlu1 %v4540_v9, %s4037_s28  ;;  %610 = vrot.lane.b32.xlu0 %v4577_v34, %s4038_s29  ;;  %3747 = vpow2.f32 %v3512_v33 }
 0x150   :  { %v3511_v29 = vmul.f32 -1.442695, %v4755_v56 }
 0x153   :  { %859 = vrot.lane.b32.xlu1 %v4577_v34, %s4037_s28  ;;  %642 = vrot.lane.b32.xlu0 %v4587_v13, %s4038_s29 }
 0x157   :  { %891 = vrot.lane.b32.xlu1 %v4587_v13, %s4037_s28  ;;  %1107 = vrot.lane.b32.xlu0 %v4577_v34, %s4040_s13 }
 0x15b   :  { %1139 = vrot.lane.b32.xlu0 %v4587_v13, %s4040_s13  ;;  %596 = vrot.lane.b32.xlu1 %v4608_v15, %s4038_s29 }
 0x15f   :  { %845 = vrot.lane.b32.xlu0 %v4608_v15, %s4037_s28  ;;  %628 = vrot.lane.b32.xlu1 %v4622_v61, %s4038_s29 }
 0x163   :  { %877 = vrot.lane.b32.xlu0 %v4622_v61, %s4037_s28  ;;  %1093 = vrot.lane.b32.xlu1 %v4608_v15, %s4040_s13 }
 0x167   :  { %861 = vrot.lane.b32.xlu0 %v4644_v41, %s4037_s28  ;;  %1125 = vrot.lane.b32.xlu1 %v4622_v61, %s4040_s13 }
 0x16b   :  { %893 = vrot.lane.b32.xlu0 %v4658_v3, %s4037_s28  ;;  %612 = vrot.lane.b32.xlu1 %v4644_v41, %s4038_s29 }
 0x16d   :  { %v4670_v19 = vpop.permute.xlu1 %588  ;;  %v4672_v0 = vpop.permute.xlu0 %837 }
 0x16f   :  { %598 = vrot.lane.b32.xlu0 %v4668_v1, %s4038_s29  ;;  %644 = vrot.lane.b32.xlu1 %v4658_v3, %s4038_s29 }
 0x171   :  { %v4685_v21 = vpop.permute.xlu1 %620  ;;  %v4687_v45 = vpop.permute.xlu0 %869 }
 0x173   :  { %630 = vrot.lane.b32.xlu0 %v4683_v27, %s4038_s29  ;;  %1109 = vrot.lane.b32.xlu1 %v4644_v41, %s4040_s13 }
 0x175   :  { %v4698_v16 = vpop.permute.xlu1 %1085  ;;  %v4700_v44 = vpop.permute.xlu0 %1333 }
 0x176   :  { %9070 = vst [vmem:[#allocation38_spill] sm:$0xff] %v4698_v16  ;;  %9071 = vst [vmem:[#allocation39_spill] sm:$0xff] %v4700_v44  ;;  %v3734_v44 = vpop.eup %3733 }
 0x177   :  { %1095 = vrot.lane.b32.xlu0 %v4668_v1, %s4040_s13  ;;  %1141 = vrot.lane.b32.xlu1 %v4658_v3, %s4040_s13  ;;  %v4725_v11 = vmul.f32 %v3734_v44, %v4599_v12  ;;  %v3736_v28 = vpop.eup %3735 }
 0x178   :  { %v3738_v12 = vpop.eup %3737  ;;  %v4739_v44 = vmul.f32 %v3736_v28, %v4613_v17 }
 0x179   :  { %v4711_v18 = vpop.permute.xlu1 %1117  ;;  %v4713_v10 = vpop.permute.xlu0 %853  ;;  %9073 = vst [vmem:[#allocation41_spill] sm:$0xff] %v4725_v11  ;;  %v405_v26 = vadd.f32 1.0, %v3738_v12 }
 0x17a   :  { %9072 = vst [vmem:[#allocation40_spill] sm:$0xff] %v4711_v18  ;;  %v8707_v18 = vmov 3   ;;  %9075 = vst [vmem:[#allocation43_spill] sm:$0xff] %v4739_v44 }
 0x17b   :  { %1127 = vrot.lane.b32.xlu0 %v4683_v27, %s4040_s13  ;;  %847 = vrot.lane.b32.xlu1 %v4668_v1, %s4037_s28  ;;  %3749 = vrcp.f32 %v405_v26 }
 0x17c   :  { %3603 = vset.pattern.permute.xlu1 %v8707_v18  ;;  %3602 = vset.pattern.permute.xlu0 %v8707_v18  ;;  %v3740_v18 = vpop.eup %3739 }
 0x17d   :  { %v4727_v16 = vpop.permute.xlu1 %604  ;;  %v4729_v14 = vpop.permute.xlu0 %885  ;;  %v407_v33 = vadd.f32 1.0, %v3740_v18 }
 0x17e   :  { %9074 = vst [vmem:[#allocation42_spill] sm:$0xff] %v4729_v14  ;;  %v3742_v17 = vpop.eup %3741  ;;  %v4771_v14 = vadd.f32 %v4305_v32, %v4362_v20 }
 0x17f   :  { %614 = vrot.lane.b32.xlu0 %v4725_v11, %s4038_s29  ;;  %879 = vrot.lane.b32.xlu1 %v4683_v27, %s4037_s28  ;;  %v3744_v28 = vpop.eup %3743  ;;  %3751 = vrcp.f32 %v407_v33 }
 0x180   :  { %v408_v18 = vadd.f32 1.0, %v3744_v28  ;;  %3753 = vpow2.f32 %v3511_v29  ;;  %v3513_v32 = vmul.f32 -1.442695, %v4771_v14 }
 0x181   :  { %v4741_v25 = vpop.permute.xlu1 %636  ;;  %v4743_v52 = vpop.permute.xlu0 %590 }
 0x182   :  { %9076 = vst [vmem:[#allocation44_spill] sm:$0xff] %v4743_v52  ;;  %3755 = vrcp.f32 %v408_v18 }
 0x183   :  { %646 = vrot.lane.b32.xlu0 %v4739_v44, %s4038_s29  ;;  %863 = vrot.lane.b32.xlu1 %v4725_v11, %s4037_s28  ;;  %3757 = vpow2.f32 %v3513_v32 }
 0x185   :  { %v4749_v55 = vpop.permute.xlu1 %1101  ;;  %v4751_v8 = vpop.permute.xlu0 %622 }
 0x186   :  { %9077 = vst [vmem:[#allocation45_spill] sm:$0xff] %v4749_v55  ;;  %9078 = vst [vmem:[#allocation46_spill] sm:$0xff] %v4751_v8  ;;  %v4766_v55 = vmul.f32 %v3742_v17, %v4641_v51  ;;  %v3746_v8 = vpop.eup %3745 }
 0x187   :  { %1111 = vrot.lane.b32.xlu0 %v4725_v11, %s4040_s13  ;;  %895 = vrot.lane.b32.xlu1 %v4739_v44, %s4037_s28  ;;  %v3748_v26 = vpop.eup %3747  ;;  %v4782_v17 = vmul.f32 %v3746_v8, %v4648_v50 }
 0x188   :  { %9081 = vst [vmem:[#allocation49_spill] sm:$0xff] %v4766_v55  ;;  %v410_v20 = vadd.f32 1.0, %v3748_v26 }
 0x189   :  { %v4761_v12 = vpop.permute.xlu1 %1133  ;;  %v4763_v52 = vpop.permute.xlu0 %1087  ;;  %9084 = vst [vmem:[#allocation52_spill] sm:$0xff] %v4782_v17 }
 0x18a   :  { %9079 = vst [vmem:[#allocation47_spill] sm:$0xff] %v4761_v12  ;;  %9080 = vst [vmem:[#allocation48_spill] sm:$0xff] %v4763_v52  ;;  %3759 = vrcp.f32 %v410_v20 }
 0x18b   :  { %1143 = vrot.lane.b32.xlu0 %v4739_v44, %s4040_s13  ;;  %600 = vrot.lane.b32.xlu1 %v4766_v55, %s4038_s29 }
 0x18d   :  { %v4777_v52 = vpop.permute.xlu1 %839  ;;  %v4779_v51 = vpop.permute.xlu0 %1119 }
 0x18e   :  { %9082 = vst [vmem:[#allocation50_spill] sm:$0xff] %v4777_v52  ;;  %9083 = vst [vmem:[#allocation51_spill] sm:$0xff] %v4779_v51  ;;  %v3750_v52 = vpop.eup %3749 }
 0x18f   :  { %849 = vrot.lane.b32.xlu0 %v4766_v55, %s4037_s28  ;;  %632 = vrot.lane.b32.xlu1 %v4782_v17, %s4038_s29  ;;  %v4798_v8 = vmul.f32 %v3750_v52, %v4676_v58  ;;  %v3752_v18 = vpop.eup %3751 }
 0x190   :  { %v3754_v26 = vpop.eup %3753  ;;  %v4809_v32 = vmul.f32 %v3752_v18, %v4692_v24 }
 0x191   :  { %v4789_v33 = vpop.permute.xlu1 %871  ;;  %v4791_v28 = vpop.permute.xlu0 %606  ;;  %9087 = vst [vmem:[#allocation55_spill] sm:$0xff] %v4798_v8  ;;  %v409_v52 = vadd.f32 1.0, %v3754_v26 }
 0x192   :  { %9085 = vst [vmem:[#allocation53_spill] sm:$0xff] %v4789_v33  ;;  %9086 = vst [vmem:[#allocation54_spill] sm:$0xff] %v4791_v28  ;;  %v3756_v58 = vpop.eup %3755 }
 0x193   :  { %881 = vrot.lane.b32.xlu0 %v4782_v17, %s4037_s28  ;;  %1097 = vrot.lane.b32.xlu1 %v4766_v55, %s4040_s13  ;;  %9090 = vst [vmem:[#allocation58_spill] sm:$0xff] %v4809_v32  ;;  %v4820_v33 = vmul.f32 %v3756_v58, %v4705_v46  ;;  %3761 = vrcp.f32 %v409_v52 }
 0x195   :  { %v4800_v50 = vpop.permute.xlu1 %855  ;;  %v4802_v29 = vpop.permute.xlu0 %638  ;;  %9093 = vst [vmem:[#allocation61_spill] sm:$0xff] %v4820_v33 }
 0x196   :  { %9088 = vst [vmem:[#allocation56_spill] sm:$0xff] %v4800_v50  ;;  %9089 = vst [vmem:[#allocation57_spill] sm:$0xff] %v4802_v29  ;;  %v3758_v50 = vpop.eup %3757 }
 0x197   :  { %865 = vrot.lane.b32.xlu0 %v4798_v8, %s4037_s28  ;;  %1129 = vrot.lane.b32.xlu1 %v4782_v17, %s4040_s13  ;;  %v3760_v18 = vpop.eup %3759 }
 0x198   :  { %v4831_v26 = vmul.f32 %v3760_v18, %v4717_v23 }
 0x199   :  { %v4811_v20 = vpop.permute.xlu1 %887  ;;  %v4813_v51 = vpop.permute.xlu0 %1103 }
 0x19a   :  { %9091 = vst [vmem:[#allocation59_spill] sm:$0xff] %v4811_v20  ;;  %9092 = vst [vmem:[#allocation60_spill] sm:$0xff] %v4813_v51  ;;  %v411_v51 = vadd.f32 1.0, %v3758_v50 }
 0x19b   :  { %897 = vrot.lane.b32.xlu0 %v4809_v32, %s4037_s28  ;;  %616 = vrot.lane.b32.xlu1 %v4798_v8, %s4038_s29  ;;  %9096 = vst [vmem:[#allocation64_spill] sm:$0xff] %v4831_v26 }
 0x19c   :  { %3763 = vrcp.f32 %v411_v51 }
 0x19d   :  { %v4822_v12 = vpop.permute.xlu1 %592  ;;  %v4824_v24 = vpop.permute.xlu0 %1135 }
 0x19e   :  { %9094 = vst [vmem:[#allocation62_spill] sm:$0xff] %v4822_v12  ;;  %9095 = vst [vmem:[#allocation63_spill] sm:$0xff] %v4824_v24  ;;  %v3762_v18 = vpop.eup %3761 }
 0x19f   :  { %602 = vrot.lane.b32.xlu0 %v4820_v33, %s4038_s29  ;;  %648 = vrot.lane.b32.xlu1 %v4809_v32, %s4038_s29  ;;  %v4858_v51 = vmul.f32 %v3762_v18, %v4755_v56 }
 0x1a1   :  { %v4833_v20 = vpop.permute.xlu1 %624  ;;  %v4835_v46 = vpop.permute.xlu0 %841  ;;  %9103 = vst [vmem:[#allocation71_spill] sm:$0xff] %v4858_v51 }
 0x1a2   :  { %9097 = vst [vmem:[#allocation65_spill] sm:$0xff] %v4833_v20  ;;  %9098 = vst [vmem:[#allocation66_spill] sm:$0xff] %v4835_v46  ;;  %v9151_v20 = vmov 3  }
 0x1a3   :  { %634 = vrot.lane.b32.xlu0 %v4831_v26, %s4038_s29  ;;  %1113 = vrot.lane.b32.xlu1 %v4798_v8, %s4040_s13 }
 0x1a5   :  { %v4841_v58 = vpop.permute.xlu1 %1089  ;;  %v4843_v50 = vpop.permute.xlu0 %873 }
 0x1a6   :  { %9099 = vst [vmem:[#allocation67_spill] sm:$0xff] %v4841_v58  ;;  %9100 = vst [vmem:[#allocation68_spill] sm:$0xff] %v4843_v50  ;;  %v3764_v50 = vpop.eup %3763 }
 0x1a7   :  { %1099 = vrot.lane.b32.xlu0 %v4820_v33, %s4040_s13  ;;  %1145 = vrot.lane.b32.xlu1 %v4809_v32, %s4040_s13 }
 0x1a9   :  { %v4849_v23 = vpop.permute.xlu1 %1121  ;;  %v4851_v52 = vpop.permute.xlu0 %857 }
 0x1aa   :  { %9101 = vst [vmem:[#allocation69_spill] sm:$0xff] %v4849_v23  ;;  %9102 = vst [vmem:[#allocation70_spill] sm:$0xff] %v4851_v52  ;;  %v4869_v23 = vmul.f32 %v3764_v50, %v4771_v14 }
 0x1ab   :  { %1131 = vrot.lane.b32.xlu0 %v4831_v26, %s4040_s13  ;;  %851 = vrot.lane.b32.xlu1 %v4820_v33, %s4037_s28 }
 0x1ac   :  { %9106 = vst [vmem:[#allocation74_spill] sm:$0xff] %v4869_v23 }
 0x1ad   :  { %v4860_v58 = vpop.permute.xlu1 %608  ;;  %v4862_v46 = vpop.permute.xlu0 %889 }
 0x1ae   :  { %9104 = vst [vmem:[#allocation72_spill] sm:$0xff] %v4860_v58  ;;  %9105 = vst [vmem:[#allocation73_spill] sm:$0xff] %v4862_v46 }
 0x1af   :  { %618 = vrot.lane.b32.xlu0 %v4858_v51, %s4038_s29  ;;  %883 = vrot.lane.b32.xlu1 %v4831_v26, %s4037_s28 }
 0x1b1   :  { %v4871_v52 = vpop.permute.xlu1 %640  ;;  %v4873_v12 = vpop.permute.xlu0 %594 }
 0x1b2   :  { %9107 = vst [vmem:[#allocation75_spill] sm:$0xff] %v4871_v52  ;;  %9108 = vst [vmem:[#allocation76_spill] sm:$0xff] %v4873_v12 }
 0x1b3   :  { %650 = vrot.lane.b32.xlu0 %v4869_v23, %s4038_s29  ;;  %867 = vrot.lane.b32.xlu1 %v4858_v51, %s4037_s28 }
 0x1b5   :  { %v4879_v56 = vpop.permute.xlu1 %1105  ;;  %v4881_v18 = vpop.permute.xlu0 %626 }
 0x1b6   :  { %9109 = vst [vmem:[#allocation77_spill] sm:$0xff] %v4879_v56  ;;  %9110 = vst [vmem:[#allocation78_spill] sm:$0xff] %v4881_v18 }
 0x1b7   :  { %1337 = vrot.lane.b32.xlu0 %v4474_v5, %s4039_s12  ;;  %899 = vrot.lane.b32.xlu1 %v4869_v23, %s4037_s28 }
 0x1b9   :  { %v4887_v14 = vpop.permute.xlu1 %1137  ;;  %v4889_v50 = vpop.permute.xlu0 %1091 }
 0x1ba   :  { %9111 = vst [vmem:[#allocation79_spill] sm:$0xff] %v4887_v14  ;;  %9112 = vst [vmem:[#allocation80_spill] sm:$0xff] %v4889_v50 }
 0x1bb   :  { %1341 = vrot.lane.b32.xlu0 %v4608_v15, %s4039_s12  ;;  %1335 = vrot.lane.b32.xlu1 %v4394_v53, %s4039_s12 }
 0x1bd   :  { %v4895_v12 = vpop.permute.xlu1 %843  ;;  %v4897_v56 = vpop.permute.xlu0 %1123 }
 0x1be   :  { %9113 = vst [vmem:[#allocation81_spill] sm:$0xff] %v4895_v12  ;;  %9114 = vst [vmem:[#allocation82_spill] sm:$0xff] %v4897_v56 }
 0x1bf   :  { %1345 = vrot.lane.b32.xlu0 %v4766_v55, %s4039_s12  ;;  %1339 = vrot.lane.b32.xlu1 %v4528_v2, %s4039_s12 }
 0x1c1   :  { %v4903_v18 = vpop.permute.xlu1 %875  ;;  %v4905_v14 = vpop.permute.xlu0 %610 }
 0x1c2   :  { %9115 = vst [vmem:[#allocation83_spill] sm:$0xff] %v4903_v18  ;;  %9116 = vst [vmem:[#allocation84_spill] sm:$0xff] %v4905_v14 }
 0x1c3   :  { %1349 = vrot.lane.b32.xlu0 %v4352_v57, %s4039_s12  ;;  %1343 = vrot.lane.b32.xlu1 %v4668_v1, %s4039_s12 }
 0x1c5   :  { %v4911_v50 = vpop.permute.xlu1 %859  ;;  %v4913_v12 = vpop.permute.xlu0 %642 }
 0x1c6   :  { %9117 = vst [vmem:[#allocation85_spill] sm:$0xff] %v4911_v50  ;;  %9118 = vst [vmem:[#allocation86_spill] sm:$0xff] %v4913_v12  ;;  %v3516_v12 = vld [vmem:[%s8667_s3 + $0x3] ss:$8 sm:$0xf] }
 0x1c7   :  { %1115 = vrot.lane.b32.xlu0 %v4858_v51, %s4040_s13  ;;  %1347 = vrot.lane.b32.xlu1 %v4820_v33, %s4039_s12 }
 0x1c9   :  { %v4919_v56 = vpop.permute.xlu1 %891  ;;  %v4921_v18 = vpop.permute.xlu0 %1107 }
 0x1ca   :  { %9119 = vst [vmem:[#allocation87_spill] sm:$0xff] %v4919_v56  ;;  %9120 = vst [vmem:[#allocation88_spill] sm:$0xff] %v4921_v18  ;;  %v4937_v56 = vrot.slane %v3516_v12, %v4346_v4 }
 0x1cb   :  { %1147 = vrot.lane.b32.xlu0 %v4869_v23, %s4040_s13  ;;  %1351 = vrot.lane.b32.xlu1 %v4447_v30, %s4039_s12  ;;  %s4045_s13 = smov 113  }
 0x1cc   :  { %9123 = vst [vmem:[#allocation91_spill] sm:$0xff] %v4937_v56 }
 0x1cd   :  { %v4927_v14 = vpop.permute.xlu1 %596  ;;  %v4929_v50 = vpop.permute.xlu0 %1139 }
 0x1ce   :  { %9121 = vst [vmem:[#allocation89_spill] sm:$0xff] %v4927_v14  ;;  %9122 = vst [vmem:[#allocation90_spill] sm:$0xff] %v4929_v50 }
 0x1cf   :  { %1353 = vrot.lane.b32.xlu0 %v4505_v35, %s4039_s12  ;;  %1355 = vrot.lane.b32.xlu1 %v4577_v34, %s4039_s12 }
 0x1d1   :  { %v4941_v18 = vpop.permute.xlu1 %628  ;;  %v4943_v46 = vpop.permute.xlu0 %845 }
 0x1d2   :  { %9124 = vst [vmem:[#allocation92_spill] sm:$0xff] %v4941_v18  ;;  %9125 = vst [vmem:[#allocation93_spill] sm:$0xff] %v4943_v46 }
 0x1d3   :  { %1357 = vrot.lane.b32.xlu0 %v4644_v41, %s4039_s12  ;;  %1359 = vrot.lane.b32.xlu1 %v4725_v11, %s4039_s12 }
 0x1d5   :  { %v4949_v50 = vpop.permute.xlu1 %1093  ;;  %v4951_v14 = vpop.permute.xlu0 %877 }
 0x1d6   :  { %9126 = vst [vmem:[#allocation94_spill] sm:$0xff] %v4949_v50  ;;  %9127 = vst [vmem:[#allocation95_spill] sm:$0xff] %v4951_v14  ;;  %v4966_v50 = vrot.slane %v3516_v12, %v4372_v22 }
 0x1d7   :  { %1361 = vrot.lane.b32.xlu0 %v4798_v8, %s4039_s12  ;;  %1363 = vrot.lane.b32.xlu1 %v4858_v51, %s4039_s12  ;;  %v5169_v51 = vld [vmem:[%s8666_s2 + $0x28] sm:$0xff] }
 0x1d8   :  { %9130 = vst [vmem:[#allocation98_spill] sm:$0xff] %v4966_v50 }
 0x1d9   :  { %v4957_v56 = vpop.permute.xlu1 %1125  ;;  %v4959_v18 = vpop.permute.xlu0 %861 }
 0x1da   :  { %9128 = vst [vmem:[#allocation96_spill] sm:$0xff] %v4957_v56  ;;  %9129 = vst [vmem:[#allocation97_spill] sm:$0xff] %v4959_v18 }
 0x1db   :  { %1365 = vrot.lane.b32.xlu0 %v4320_v42, %s4039_s12  ;;  %1367 = vrot.lane.b32.xlu1 %v4413_v6, %s4039_s12 }
 0x1dd   :  { %v4968_v46 = vpop.permute.xlu1 %612  ;;  %v4970_v14 = vpop.permute.xlu0 %893 }
 0x1de   :  { %9131 = vst [vmem:[#allocation99_spill] sm:$0xff] %v4968_v46  ;;  %9132 = vst [vmem:[#allocation100_spill] sm:$0xff] %v4970_v14 }
 0x1df   :  { %1369 = vrot.lane.b32.xlu0 %v4488_v62, %s4039_s12  ;;  %1371 = vrot.lane.b32.xlu1 %v4540_v9, %s4039_s12 }
 0x1e1   :  { %v4976_v56 = vpop.permute.xlu1 %644  ;;  %v4978_v18 = vpop.permute.xlu0 %598 }
 0x1e2   :  { %9133 = vst [vmem:[#allocation101_spill] sm:$0xff] %v4976_v56  ;;  %9134 = vst [vmem:[#allocation102_spill] sm:$0xff] %v4978_v18 }
 0x1e3   :  { %1373 = vrot.lane.b32.xlu0 %v4622_v61, %s4039_s12  ;;  %1375 = vrot.lane.b32.xlu1 %v4683_v27, %s4039_s12 }
 0x1e5   :  { %v4984_v12 = vpop.permute.xlu1 %1109  ;;  %v4986_v50 = vpop.permute.xlu0 %630 }
 0x1e6   :  { %9135 = vst [vmem:[#allocation103_spill] sm:$0xff] %v4984_v12  ;;  %9136 = vst [vmem:[#allocation104_spill] sm:$0xff] %v4986_v50 }
 0x1e7   :  { %1377 = vrot.lane.b32.xlu0 %v4782_v17, %s4039_s12  ;;  %1379 = vrot.lane.b32.xlu1 %v4831_v26, %s4039_s12 }
 0x1e9   :  { %v4992_v14 = vpop.permute.xlu1 %1141  ;;  %v4994_v56 = vpop.permute.xlu0 %1095 }
 0x1ea   :  { %9137 = vst [vmem:[#allocation105_spill] sm:$0xff] %v4992_v14  ;;  %9138 = vst [vmem:[#allocation106_spill] sm:$0xff] %v4994_v56 }
 0x1eb   :  { %1381 = vrot.lane.b32.xlu0 %v4375_v31, %s4039_s12  ;;  %1383 = vrot.lane.b32.xlu1 %v4457_v60, %s4039_s12 }
 0x1ed   :  { %v5000_v18 = vpop.permute.xlu1 %847  ;;  %v5002_v12 = vpop.permute.xlu0 %1127 }
 0x1ee   :  { %9139 = vst [vmem:[#allocation107_spill] sm:$0xff] %v5000_v18  ;;  %9140 = vst [vmem:[#allocation108_spill] sm:$0xff] %v5002_v12  ;;  %v5023_v12 = vld [vmem:[%s8666_s2] sm:$0xff] }
 0x1ef   :  { %1385 = vrot.lane.b32.xlu0 %v4518_v63, %s4039_s12  ;;  %1387 = vrot.lane.b32.xlu1 %v4587_v13, %s4039_s12 }
 0x1f1   :  { %v5008_v50 = vpop.permute.xlu0 %614  ;;  %v5010_v14 = vpop.permute.xlu1 %879 }
 0x1f2   :  { %9141 = vst [vmem:[#allocation109_spill] sm:$0xff] %v5008_v50  ;;  %9142 = vst [vmem:[#allocation110_spill] sm:$0xff] %v5010_v14  ;;  %v5029_v14 = vld [vmem:[%s8666_s2 + $0x8] sm:$0xff] }
 0x1f3   :  { %1389 = vrot.lane.b32.xlu0 %v4658_v3, %s4039_s12  ;;  %1391 = vrot.lane.b32.xlu1 %v4739_v44, %s4039_s12 }
 0x1f5   :  { %v5016_v56 = vpop.permute.xlu0 %646  ;;  %v5018_v18 = vpop.permute.xlu1 %863 }
 0x1f6   :  { %9143 = vst [vmem:[#allocation111_spill] sm:$0xff] %v5016_v56  ;;  %9144 = vst [vmem:[#allocation112_spill] sm:$0xff] %v5018_v18  ;;  %v8773_v56 = vmov 5   ;;  %v5040_v18 = vld [vmem:[%s8666_s2 + $0x10] sm:$0xff] }
 0x1f7   :  { %1486 = vperm.xlu0 %3602, %v5023_v12   ;;  %1490 = vperm.xlu1 %3603, %v5029_v14  }
 0x1f9   :  { %v5032_v50 = vpop.permute.xlu0 %1111  ;;  %v5034_v46 = vpop.permute.xlu1 %895 }
 0x1fa   :  { %9145 = vst [vmem:[#allocation113_spill] sm:$0xff] %v5032_v50  ;;  %9146 = vst [vmem:[#allocation114_spill] sm:$0xff] %v5034_v46 }
 0x1fb   :  { %3604 = vset.pattern.permute.xlu0 %v8773_v56  ;;  %1494 = vperm.xlu1 %3603, %v5040_v18  }
 0x1fc   :  { %1734 = vperm.xlu0 %3604, %v5023_v12  }
 0x1fd   :  { %v5044_v52 = vpop.permute.xlu0 %1143  ;;  %v5046_v58 = vpop.permute.xlu1 %600 }
 0x1fe   :  { %9147 = vst [vmem:[#allocation115_spill] sm:$0xff] %v5044_v52  ;;  %9148 = vst [vmem:[#allocation116_spill] sm:$0xff] %v5046_v58 }
 0x1ff   :  { %3605 = vset.pattern.permute.xlu1 %v8773_v56  ;;  %v5063_v56 = vld [vmem:[%s8666_s2 + $0x18] sm:$0xff] }
 0x200   :  { %1738 = vperm.xlu1 %3605, %v5029_v14   ;;  %1742 = vperm.xlu0 %3604, %v5040_v18  }
 0x201   :  { %v5051_v46 = vpop.permute.xlu0 %849  ;;  %v5053_v50 = vpop.permute.xlu1 %632 }
 0x202   :  { %9149 = vst [vmem:[#allocation117_spill] sm:$0xff] %v5051_v46  ;;  %9150 = vst [vmem:[#allocation118_spill] sm:$0xff] %v5053_v50  ;;  %v8782_v50 = vmov 6  }
 0x204   :  { %3606 = vset.pattern.permute.xlu1 %v9151_v20  ;;  %1583 = vrot.lane.b32.xlu0 %v4394_v53, %s4043_s25 }
 0x205   :  { %v5058_v24 = vpop.permute.xlu0 %881  ;;  %1498 = vperm.xlu1 %3606, %v5063_v56   ;;  %v5066_v58 = vpop.permute.xlu1 %1097 }
 0x206   :  { %9152 = vst [vmem:[#allocation119_spill] sm:$0xff] %v5058_v24  ;;  %9153 = vst [vmem:[#allocation120_spill] sm:$0xff] %v5066_v58  ;;  %v5086_v58 = vld [vmem:[%s8666_s2 + $0x20] sm:$0xff] }
 0x208   :  { %1599 = vrot.lane.b32.xlu0 %v4447_v30, %s4043_s25 }
 0x209   :  { %v5070_v46 = vpop.permute.xlu0 %865  ;;  %3607 = vset.pattern.permute.xlu1 %v8782_v50  ;;  %v5073_v52 = vpop.permute.xlu1 %1129 }
 0x20a   :  { %9154 = vst [vmem:[#allocation121_spill] sm:$0xff] %v5070_v46  ;;  %9155 = vst [vmem:[#allocation122_spill] sm:$0xff] %v5073_v52  ;;  %1982 = vperm.xlu1 %3607, %v5023_v12   ;;  %v3517_v52 = vld [vmem:[%s8667_s3 + $0x5] ss:$8 sm:$0xf] }
 0x20b   :  { %v5099_v46 = vrot.slane %v3517_v52, %v4346_v4 }
 0x20c   :  { %1615 = vrot.lane.b32.xlu0 %v4413_v6, %s4043_s25 }
 0x20d   :  { %v5078_v24 = vpop.permute.xlu0 %897  ;;  %v5080_v29 = vpop.permute.xlu1 %616  ;;  %9160 = vst [vmem:[#allocation127_spill] sm:$0xff] %v5099_v46 }
 0x20e   :  { %9156 = vst [vmem:[#allocation123_spill] sm:$0xff] %v5078_v24  ;;  %9157 = vst [vmem:[#allocation124_spill] sm:$0xff] %v5080_v29  ;;  %3608 = vset.pattern.permute.xlu1 %v9151_v20  ;;  %v5102_v29 = vrot.slane %v3517_v52, %v4372_v22 }
 0x20f   :  { %1502 = vperm.xlu1 %3608, %v5086_v58  }
 0x210   :  { %1631 = vrot.lane.b32.xlu0 %v4457_v60, %s4043_s25  ;;  %9161 = vst [vmem:[#allocation128_spill] sm:$0xff] %v5102_v29 }
 0x211   :  { %v5091_v50 = vpop.permute.xlu0 %602  ;;  %v5096_v24 = vpop.permute.xlu1 %648 }
 0x212   :  { %9158 = vst [vmem:[#allocation125_spill] sm:$0xff] %v5091_v50  ;;  %9159 = vst [vmem:[#allocation126_spill] sm:$0xff] %v5096_v24  ;;  %v9163_v50 = vmov 5   ;;  %v3518_v24 = vld [vmem:[%s8667_s3 + $0x6] ss:$8 sm:$0xf] }
 0x213   :  { %1581 = vrot.lane.b32.xlu1 %v4308_v40, %s4043_s25 }
 0x214   :  { %1601 = vrot.lane.b32.xlu0 %v4505_v35, %s4043_s25  ;;  %3609 = vset.pattern.permute.xlu1 %v9163_v50 }
 0x215   :  { %v5108_v28 = vpop.permute.xlu0 %634  ;;  %v5111_v23 = vpop.permute.xlu1 %1113 }
 0x216   :  { %9162 = vst [vmem:[#allocation129_spill] sm:$0xff] %v5108_v28  ;;  %9164 = vst [vmem:[#allocation130_spill] sm:$0xff] %v5111_v23 }
 0x217   :  { %1597 = vrot.lane.b32.xlu1 %v4352_v57, %s4043_s25 }
 0x218   :  { %1633 = vrot.lane.b32.xlu0 %v4518_v63, %s4043_s25 }
 0x219   :  { %v5117_v52 = vpop.permute.xlu0 %1099  ;;  %v5119_v29 = vpop.permute.xlu1 %1145 }
 0x21a   :  { %9165 = vst [vmem:[#allocation131_spill] sm:$0xff] %v5117_v52  ;;  %9166 = vst [vmem:[#allocation132_spill] sm:$0xff] %v5119_v29 }
 0x21b   :  { %1613 = vrot.lane.b32.xlu1 %v4320_v42, %s4043_s25 }
 0x21c   :  { %1829 = vrot.lane.b32.xlu0 %v4308_v40, %s4045_s13 }
 0x21d   :  { %v5125_v46 = vpop.permute.xlu0 %1131  ;;  %v5127_v28 = vpop.permute.xlu1 %851 }
 0x21e   :  { %9167 = vst [vmem:[#allocation133_spill] sm:$0xff] %v5125_v46  ;;  %9168 = vst [vmem:[#allocation134_spill] sm:$0xff] %v5127_v28  ;;  %v8804_v28 = vmov 7  }
 0x21f   :  { %1629 = vrot.lane.b32.xlu1 %v4375_v31, %s4043_s25 }
 0x220   :  { %1845 = vrot.lane.b32.xlu0 %v4352_v57, %s4045_s13 }
 0x221   :  { %v5133_v52 = vpop.permute.xlu0 %618  ;;  %v5135_v29 = vpop.permute.xlu1 %883 }
 0x222   :  { %9169 = vst [vmem:[#allocation135_spill] sm:$0xff] %v5133_v52  ;;  %9170 = vst [vmem:[#allocation136_spill] sm:$0xff] %v5135_v29  ;;  %v5154_v52 = vrot.slane %v3518_v24, %v4346_v4 }
 0x223   :  { %1746 = vperm.xlu1 %3609, %v5063_v56  }
 0x224   :  { %1861 = vrot.lane.b32.xlu0 %v4320_v42, %s4045_s13  ;;  %9174 = vst [vmem:[#allocation140_spill] sm:$0xff] %v5154_v52 }
 0x225   :  { %v5140_v23 = vpop.permute.xlu0 %650  ;;  %v5142_v46 = vpop.permute.xlu1 %867 }
 0x226   :  { %9171 = vst [vmem:[#allocation137_spill] sm:$0xff] %v5140_v23  ;;  %9172 = vst [vmem:[#allocation138_spill] sm:$0xff] %v5142_v46  ;;  %v5157_v23 = vrot.slane %v3518_v24, %v4372_v22 }
 0x227   :  { %3610 = vset.pattern.permute.xlu1 %v8804_v28 }
 0x228   :  { %2230 = vperm.xlu1 %3610, %v5023_v12   ;;  %1877 = vrot.lane.b32.xlu0 %v4375_v31, %s4045_s13  ;;  %9175 = vst [vmem:[#allocation141_spill] sm:$0xff] %v5157_v23 }
 0x229   :  { %v5151_v29 = vpop.permute.xlu0 %1337  ;;  %v5159_v46 = vpop.permute.xlu1 %899 }
 0x22a   :  { %9173 = vst [vmem:[#allocation139_spill] sm:$0xff] %v5151_v29  ;;  %9176 = vst [vmem:[#allocation142_spill] sm:$0xff] %v5159_v46 }
 0x22c   :  { %3611 = vset.pattern.permute.xlu1 %v9151_v20  ;;  %1603 = vrot.lane.b32.xlu0 %v4577_v34, %s4043_s25 }
 0x22d   :  { %v5164_v28 = vpop.permute.xlu0 %1341  ;;  %1506 = vperm.xlu1 %3611, %v5169_v51   ;;  %v5172_v52 = vpop.permute.xlu1 %1335 }
 0x22e   :  { %9177 = vst [vmem:[#allocation143_spill] sm:$0xff] %v5164_v28  ;;  %9178 = vst [vmem:[#allocation144_spill] sm:$0xff] %v5172_v52 }
 0x230   :  { %1635 = vrot.lane.b32.xlu0 %v4587_v13, %s4043_s25 }
 0x231   :  { %v5176_v24 = vpop.permute.xlu0 %1345  ;;  %1585 = vrot.lane.b32.xlu1 %v4474_v5, %s4043_s25  ;;  %v5180_v23 = vpop.permute.xlu1 %1339 }
 0x232   :  { %9179 = vst [vmem:[#allocation145_spill] sm:$0xff] %v5176_v24  ;;  %9180 = vst [vmem:[#allocation146_spill] sm:$0xff] %v5180_v23  ;;  %3612 = vset.pattern.permute.xlu1 %v9163_v50 }
 0x234   :  { %1833 = vrot.lane.b32.xlu0 %v4474_v5, %s4045_s13 }
 0x235   :  { %v5185_v28 = vpop.permute.xlu0 %1349  ;;  %1617 = vrot.lane.b32.xlu1 %v4488_v62, %s4043_s25  ;;  %v5189_v29 = vpop.permute.xlu1 %1343 }
 0x236   :  { %9181 = vst [vmem:[#allocation147_spill] sm:$0xff] %v5185_v28  ;;  %9182 = vst [vmem:[#allocation148_spill] sm:$0xff] %v5189_v29  ;;  %v9187_v29 = vmov 7  }
 0x238   :  { %1865 = vrot.lane.b32.xlu0 %v4488_v62, %s4045_s13 }
 0x239   :  { %v5193_v24 = vpop.permute.xlu0 %1115  ;;  %1750 = vperm.xlu1 %3612, %v5086_v58   ;;  %v5196_v23 = vpop.permute.xlu1 %1347 }
 0x23a   :  { %9183 = vst [vmem:[#allocation149_spill] sm:$0xff] %v5193_v24  ;;  %9184 = vst [vmem:[#allocation150_spill] sm:$0xff] %v5196_v23 }
 0x23c   :  { %2093 = vrot.lane.b32.xlu0 %v4352_v57, %s4047_s18 }
 0x23d   :  { %v5200_v52 = vpop.permute.xlu0 %1147  ;;  %1831 = vrot.lane.b32.xlu1 %v4394_v53, %s4045_s13  ;;  %v5204_v28 = vpop.permute.xlu1 %1351 }
 0x23e   :  { %9185 = vst [vmem:[#allocation151_spill] sm:$0xff] %v5200_v52  ;;  %9186 = vst [vmem:[#allocation152_spill] sm:$0xff] %v5204_v28  ;;  %3613 = vset.pattern.permute.xlu1 %v9187_v29  ;;  %v3519_v52 = vld [vmem:[%s8667_s3 + $0x7] ss:$8 sm:$0xf] }
 0x23f   :  { %v5219_v24 = vrot.slane %v3519_v52, %v4346_v4 }
 0x240   :  { %2109 = vrot.lane.b32.xlu0 %v4320_v42, %s4047_s18 }
 0x241   :  { %v5209_v46 = vpop.permute.xlu0 %1353  ;;  %1847 = vrot.lane.b32.xlu1 %v4447_v30, %s4045_s13  ;;  %v5213_v23 = vpop.permute.xlu1 %1355  ;;  %9190 = vst [vmem:[#allocation155_spill] sm:$0xff] %v5219_v24 }
 0x242   :  { %9188 = vst [vmem:[#allocation153_spill] sm:$0xff] %v5209_v46  ;;  %9189 = vst [vmem:[#allocation154_spill] sm:$0xff] %v5213_v23 }
 0x244   :  { %2125 = vrot.lane.b32.xlu0 %v4375_v31, %s4047_s18 }
 0x245   :  { %v5223_v28 = vpop.permute.xlu0 %1357  ;;  %1863 = vrot.lane.b32.xlu1 %v4413_v6, %s4045_s13  ;;  %v5227_v46 = vpop.permute.xlu1 %1359 }
 0x246   :  { %9191 = vst [vmem:[#allocation156_spill] sm:$0xff] %v5223_v28  ;;  %9192 = vst [vmem:[#allocation157_spill] sm:$0xff] %v5227_v46  ;;  %v5247_v46 = vld [vmem:[%s8666_s2 + $0x30] sm:$0xff] }
 0x247   :  { %9197 = vst [vmem:[#allocation162_spill] sm:$0xff] %v5247_v46 }
 0x248   :  { %1589 = vrot.lane.b32.xlu0 %v4608_v15, %s4043_s25 }
 0x249   :  { %v5231_v23 = vpop.permute.xlu0 %1361  ;;  %1879 = vrot.lane.b32.xlu1 %v4457_v60, %s4045_s13  ;;  %v5235_v59 = vpop.permute.xlu1 %1363 }
 0x24a   :  { %9193 = vst [vmem:[#allocation158_spill] sm:$0xff] %v5231_v23  ;;  %9194 = vst [vmem:[#allocation159_spill] sm:$0xff] %v5235_v59  ;;  %v8835_v23 = vmov 8  }
 0x24c   :  { %1621 = vrot.lane.b32.xlu0 %v4622_v61, %s4043_s25 }
 0x24d   :  { %2238 = vperm.xlu1 %3613, %v5040_v18   ;;  %v5240_v24 = vpop.permute.xlu0 %1365  ;;  %v5242_v28 = vpop.permute.xlu1 %1367 }
 0x24e   :  { %9195 = vst [vmem:[#allocation160_spill] sm:$0xff] %v5240_v24  ;;  %9196 = vst [vmem:[#allocation161_spill] sm:$0xff] %v5242_v28 }
 0x250   :  { %1758 = vperm.xlu0 %3604, %v5247_v46  }
 0x251   :  { %3614 = vset.pattern.permute.xlu1 %v8835_v23  ;;  %v5252_v59 = vpop.permute.xlu0 %1369  ;;  %v5254_v33 = vpop.permute.xlu1 %1371 }
 0x252   :  { %2478 = vperm.xlu1 %3614, %v5023_v12   ;;  %9198 = vst [vmem:[#allocation163_spill] sm:$0xff] %v5252_v59  ;;  %9199 = vst [vmem:[#allocation164_spill] sm:$0xff] %v5254_v33  ;;  %v5614_v33 = vmul.f32 %v4233_v37, %v4587_v13 }
 0x254   :  { %3619 = vset.pattern.permute.xlu0 %v9200_v39  ;;  %9266 = vst [vmem:[#allocation227_spill] sm:$0xff] %v5614_v33 }
 0x255   :  { %1986 = vperm.xlu0 %3619, %v5029_v14   ;;  %v5260_v24 = vpop.permute.xlu0 %1373  ;;  %v5263_v28 = vpop.permute.xlu1 %1375 }
 0x256   :  { %3615 = vset.pattern.permute.xlu1 %v9151_v20  ;;  %9201 = vst [vmem:[#allocation165_spill] sm:$0xff] %v5260_v24  ;;  %9202 = vst [vmem:[#allocation166_spill] sm:$0xff] %v5263_v28 }
 0x257   :  { %1510 = vperm.xlu1 %3615, %v5247_v46  }
 0x259   :  { %1990 = vperm.xlu0 %3619, %v5040_v18   ;;  %v5269_v39 = vpop.permute.xlu0 %1377  ;;  %v5273_v12 = vpop.permute.xlu1 %1379 }
 0x25a   :  { %9203 = vst [vmem:[#allocation167_spill] sm:$0xff] %v5269_v39  ;;  %9204 = vst [vmem:[#allocation168_spill] sm:$0xff] %v5273_v12  ;;  %v9207_v39 = vmov 8  }
 0x25b   :  { %1587 = vrot.lane.b32.xlu1 %v4528_v2, %s4043_s25 }
 0x25c   :  { %3616 = vset.pattern.permute.xlu1 %v9163_v50 }
 0x25d   :  { %1994 = vperm.xlu0 %3619, %v5063_v56   ;;  %v5277_v23 = vpop.permute.xlu0 %1381  ;;  %v5281_v24 = vpop.permute.xlu1 %1383 }
 0x25e   :  { %9205 = vst [vmem:[#allocation169_spill] sm:$0xff] %v5277_v23  ;;  %9206 = vst [vmem:[#allocation170_spill] sm:$0xff] %v5281_v24  ;;  %v5298_v24 = vrot.slane %v3519_v52, %v4372_v22  ;;  %v3520_v52 = vld [vmem:[%s8667_s3 + $0x20] ss:$8 sm:$0xf] }
 0x25f   :  { %1619 = vrot.lane.b32.xlu1 %v4540_v9, %s4043_s25 }
 0x260   :  { %9210 = vst [vmem:[#allocation173_spill] sm:$0xff] %v5298_v24  ;;  %v5320_v24 = vrot.slane %v3520_v52, %v4346_v4 }
 0x261   :  { %1998 = vperm.xlu0 %3619, %v5086_v58   ;;  %v5287_v28 = vpop.permute.xlu0 %1385  ;;  %v5291_v12 = vpop.permute.xlu1 %1387 }
 0x262   :  { %9208 = vst [vmem:[#allocation171_spill] sm:$0xff] %v5287_v28  ;;  %9209 = vst [vmem:[#allocation172_spill] sm:$0xff] %v5291_v12 }
 0x263   :  { %1754 = vperm.xlu1 %3616, %v5169_v51   ;;  %9215 = vst [vmem:[#allocation178_spill] sm:$0xff] %v5320_v24 }
 0x265   :  { %1867 = vrot.lane.b32.xlu0 %v4540_v9, %s4045_s13  ;;  %v5300_v23 = vpop.permute.xlu0 %1389  ;;  %v5304_v28 = vpop.permute.xlu1 %1391 }
 0x266   :  { %9211 = vst [vmem:[#allocation174_spill] sm:$0xff] %v5300_v23  ;;  %9212 = vst [vmem:[#allocation175_spill] sm:$0xff] %v5304_v28 }
 0x267   :  { %1849 = vrot.lane.b32.xlu1 %v4505_v35, %s4045_s13 }
 0x268   :  { %3617 = vset.pattern.permute.xlu1 %v9207_v39 }
 0x269   :  { %2002 = vperm.xlu0 %3619, %v5169_v51  }
 0x26b   :  { %1881 = vrot.lane.b32.xlu1 %v4518_v63, %s4045_s13 }
 0x26d   :  { %2113 = vrot.lane.b32.xlu0 %v4488_v62, %s4047_s18 }
 0x26f   :  { %2077 = vrot.lane.b32.xlu1 %v4308_v40, %s4047_s18 }
 0x271   :  { %2341 = vrot.lane.b32.xlu0 %v4352_v57, %s4049_s1 }
 0x273   :  { %2079 = vrot.lane.b32.xlu1 %v4394_v53, %s4047_s18 }
 0x275   :  { %2357 = vrot.lane.b32.xlu0 %v4320_v42, %s4049_s1 }
 0x276   :  { %v5310_v12 = vpop.permute.xlu0 %1486  ;;  %v5312_v59 = vpop.permute.xlu1 %1490 }
 0x277   :  { %9213 = vst [vmem:[#allocation176_spill] sm:$0xff] %v5310_v12  ;;  %9214 = vst [vmem:[#allocation177_spill] sm:$0xff] %v5312_v59  ;;  %2095 = vrot.lane.b32.xlu1 %v4447_v30, %s4047_s18 }
 0x279   :  { %2373 = vrot.lane.b32.xlu0 %v4375_v31, %s4049_s1 }
 0x27a   :  { %v5324_v28 = vpop.permute.xlu1 %1494 }
 0x27b   :  { %9216 = vst [vmem:[#allocation179_spill] sm:$0xff] %v5324_v28  ;;  %2111 = vrot.lane.b32.xlu1 %v4413_v6, %s4047_s18  ;;  %v5328_v12 = vpop.permute.xlu0 %1734 }
 0x27c   :  { %9217 = vst [vmem:[#allocation180_spill] sm:$0xff] %v5328_v12 }
 0x27d   :  { %1393 = vrot.lane.b32.xlu0 %v4809_v32, %s4039_s12 }
 0x27f   :  { %2127 = vrot.lane.b32.xlu1 %v4457_v60, %s4047_s18  ;;  %v5334_v59 = vpop.permute.xlu1 %1738  ;;  %v5336_v4 = vpop.permute.xlu0 %1742 }
 0x280   :  { %9218 = vst [vmem:[#allocation181_spill] sm:$0xff] %v5334_v59  ;;  %9219 = vst [vmem:[#allocation182_spill] sm:$0xff] %v5336_v4  ;;  %v5353_v4 = vld [vmem:[%s8666_s2 + $0x38] sm:$0xff] }
 0x281   :  { %1607 = vrot.lane.b32.xlu0 %v4725_v11, %s4043_s25  ;;  %9223 = vst [vmem:[#allocation186_spill] sm:$0xff] %v5353_v4 }
 0x283   :  { %2486 = vperm.xlu1 %3617, %v5040_v18   ;;  %v5341_v24 = vpop.permute.xlu0 %1583 }
 0x284   :  { %9220 = vst [vmem:[#allocation183_spill] sm:$0xff] %v5341_v24  ;;  %v5343_v28 = vpop.permute.xlu1 %1498 }
 0x285   :  { %9221 = vst [vmem:[#allocation184_spill] sm:$0xff] %v5343_v28  ;;  %1639 = vrot.lane.b32.xlu0 %v4739_v44, %s4043_s25 }
 0x287   :  { %3618 = vset.pattern.permute.xlu1 %v9151_v20  ;;  %v5348_v12 = vpop.permute.xlu0 %1599  ;;  %v9226_v20 = vmov 1  }
 0x288   :  { %9222 = vst [vmem:[#allocation185_spill] sm:$0xff] %v5348_v12  ;;  %1514 = vperm.xlu1 %3618, %v5353_v4  }
 0x289   :  { %v5356_v59 = vpop.permute.xlu1 %1982  ;;  %1837 = vrot.lane.b32.xlu0 %v4608_v15, %s4045_s13 }
 0x28a   :  { %9224 = vst [vmem:[#allocation187_spill] sm:$0xff] %v5356_v59 }
 0x28b   :  { %v5360_v18 = vpop.permute.xlu0 %1615 }
 0x28c   :  { %9225 = vst [vmem:[#allocation188_spill] sm:$0xff] %v5360_v18  ;;  %1605 = vrot.lane.b32.xlu1 %v4644_v41, %s4043_s25 }
 0x28d   :  { %1869 = vrot.lane.b32.xlu0 %v4622_v61, %s4045_s13  ;;  %3620 = vset.pattern.permute.xlu1 %v9226_v20 }
 0x28e   :  { %v5367_v28 = vpop.permute.xlu1 %1502 }
 0x28f   :  { %9227 = vst [vmem:[#allocation189_spill] sm:$0xff] %v5367_v28  ;;  %v5369_v23 = vpop.permute.xlu0 %1631 }
 0x290   :  { %9228 = vst [vmem:[#allocation190_spill] sm:$0xff] %v5369_v23  ;;  %1637 = vrot.lane.b32.xlu1 %v4658_v3, %s4043_s25 }
 0x291   :  { %2006 = vperm.xlu0 %3619, %v5247_v46  }
 0x292   :  { %v5374_v59 = vpop.permute.xlu1 %1581 }
 0x293   :  { %9229 = vst [vmem:[#allocation191_spill] sm:$0xff] %v5374_v59  ;;  %v5376_v18 = vpop.permute.xlu0 %1601 }
 0x294   :  { %9230 = vst [vmem:[#allocation192_spill] sm:$0xff] %v5376_v18  ;;  %1835 = vrot.lane.b32.xlu1 %v4528_v2, %s4045_s13 }
 0x295   :  { %2115 = vrot.lane.b32.xlu0 %v4540_v9, %s4047_s18 }
 0x296   :  { %v5382_v24 = vpop.permute.xlu1 %1597 }
 0x297   :  { %9231 = vst [vmem:[#allocation193_spill] sm:$0xff] %v5382_v24  ;;  %v5384_v28 = vpop.permute.xlu0 %1633 }
 0x298   :  { %9232 = vst [vmem:[#allocation194_spill] sm:$0xff] %v5384_v28  ;;  %1851 = vrot.lane.b32.xlu1 %v4577_v34, %s4045_s13 }
 0x299   :  { %2361 = vrot.lane.b32.xlu0 %v4488_v62, %s4049_s1 }
 0x29a   :  { %v5390_v23 = vpop.permute.xlu1 %1613 }
 0x29b   :  { %9233 = vst [vmem:[#allocation195_spill] sm:$0xff] %v5390_v23  ;;  %v5392_v59 = vpop.permute.xlu0 %1829 }
 0x29c   :  { %9234 = vst [vmem:[#allocation196_spill] sm:$0xff] %v5392_v59  ;;  %1883 = vrot.lane.b32.xlu1 %v4587_v13, %s4045_s13 }
 0x29d   :  { %1593 = vrot.lane.b32.xlu0 %v4766_v55, %s4043_s25 }
 0x29e   :  { %v5398_v18 = vpop.permute.xlu1 %1629 }
 0x29f   :  { %9235 = vst [vmem:[#allocation197_spill] sm:$0xff] %v5398_v18  ;;  %v5400_v24 = vpop.permute.xlu0 %1845 }
 0x2a0   :  { %9236 = vst [vmem:[#allocation198_spill] sm:$0xff] %v5400_v24  ;;  %2081 = vrot.lane.b32.xlu1 %v4474_v5, %s4047_s18 }
 0x2a1   :  { %1625 = vrot.lane.b32.xlu0 %v4782_v17, %s4043_s25 }
 0x2a2   :  { %v5406_v28 = vpop.permute.xlu1 %1746 }
 0x2a3   :  { %9237 = vst [vmem:[#allocation199_spill] sm:$0xff] %v5406_v28  ;;  %v5408_v23 = vpop.permute.xlu0 %1861 }
 0x2a4   :  { %9238 = vst [vmem:[#allocation200_spill] sm:$0xff] %v5408_v23  ;;  %2097 = vrot.lane.b32.xlu1 %v4505_v35, %s4047_s18  ;;  %v5430_v23 = vrot.slane %v3520_v52, %v4372_v22 }
 0x2a5   :  { %1839 = vrot.lane.b32.xlu0 %v4668_v1, %s4045_s13 }
 0x2a6   :  { %9243 = vst [vmem:[#allocation205_spill] sm:$0xff] %v5430_v23 }
 0x2a7   :  { %v5414_v59 = vpop.permute.xlu1 %2230  ;;  %v5416_v18 = vpop.permute.xlu0 %1877 }
 0x2a8   :  { %9239 = vst [vmem:[#allocation201_spill] sm:$0xff] %v5414_v59  ;;  %9240 = vst [vmem:[#allocation202_spill] sm:$0xff] %v5416_v18  ;;  %2129 = vrot.lane.b32.xlu1 %v4518_v63, %s4047_s18 }
 0x2a9   :  { %1871 = vrot.lane.b32.xlu0 %v4683_v27, %s4045_s13 }
 0x2ab   :  { %v5422_v24 = vpop.permute.xlu0 %1603 }
 0x2ac   :  { %9241 = vst [vmem:[#allocation203_spill] sm:$0xff] %v5422_v24  ;;  %2325 = vrot.lane.b32.xlu1 %v4308_v40, %s4049_s1  ;;  %v5426_v28 = vpop.permute.xlu1 %1506 }
 0x2ad   :  { %9242 = vst [vmem:[#allocation204_spill] sm:$0xff] %v5426_v28  ;;  %2010 = vperm.xlu0 %3619, %v5353_v4  }
 0x2af   :  { %v5432_v59 = vpop.permute.xlu0 %1635 }
 0x2b0   :  { %9244 = vst [vmem:[#allocation206_spill] sm:$0xff] %v5432_v59  ;;  %2327 = vrot.lane.b32.xlu1 %v4394_v53, %s4049_s1  ;;  %v5436_v18 = vpop.permute.xlu1 %1585 }
 0x2b1   :  { %9245 = vst [vmem:[#allocation207_spill] sm:$0xff] %v5436_v18  ;;  %3623 = vset.pattern.permute.xlu0 %v9187_v29  ;;  %v5620_v29 = vmul.f32 %v4424_v43, %v4608_v15 }
 0x2b2   :  { %2234 = vperm.xlu0 %3623, %v5029_v14  }
 0x2b3   :  { %v5440_v24 = vpop.permute.xlu0 %1833  ;;  %9268 = vst [vmem:[#allocation229_spill] sm:$0xff] %v5620_v29  ;;  %v5640_v29 = vmul.f32 %v4235_v38, %v4683_v27 }
 0x2b4   :  { %9246 = vst [vmem:[#allocation208_spill] sm:$0xff] %v5440_v24  ;;  %2343 = vrot.lane.b32.xlu1 %v4447_v30, %s4049_s1  ;;  %v5444_v28 = vpop.permute.xlu1 %1617 }
 0x2b5   :  { %9247 = vst [vmem:[#allocation209_spill] sm:$0xff] %v5444_v28  ;;  %9272 = vst [vmem:[#allocation233_spill] sm:$0xff] %v5640_v29 }
 0x2b6   :  { %2242 = vperm.xlu0 %3623, %v5063_v56  }
 0x2b7   :  { %v5447_v22 = vpop.permute.xlu0 %1865 }
 0x2b8   :  { %9248 = vst [vmem:[#allocation210_spill] sm:$0xff] %v5447_v22  ;;  %2359 = vrot.lane.b32.xlu1 %v4413_v6, %s4049_s1  ;;  %v5451_v52 = vpop.permute.xlu1 %1750  ;;  %v3973_v22 = vld [vmem:[%s8668_s4] sm:$0xff] }
 0x2b9   :  { %9249 = vst [vmem:[#allocation211_spill] sm:$0xff] %v5451_v52 }
 0x2ba   :  { %2246 = vperm.xlu0 %3623, %v5086_v58  }
 0x2bb   :  { %v5454_v23 = vpop.permute.xlu0 %2093 }
 0x2bc   :  { %9250 = vst [vmem:[#allocation212_spill] sm:$0xff] %v5454_v23  ;;  %2375 = vrot.lane.b32.xlu1 %v4457_v60, %s4049_s1  ;;  %v5458_v24 = vpop.permute.xlu1 %1831  ;;  %v3974_v23 = vld [vmem:[%s8668_s4 + $0x8] sm:$0xff] }
 0x2bd   :  { %9251 = vst [vmem:[#allocation213_spill] sm:$0xff] %v5458_v24  ;;  %v5497_v24 = vsub.s32 1, %v4330_v54 }
 0x2be   :  { %2250 = vperm.xlu0 %3623, %v5169_v51  }
 0x2bf   :  { %v5461_v59 = vpop.permute.xlu0 %2109 }
 0x2c0   :  { %9252 = vst [vmem:[#allocation214_spill] sm:$0xff] %v5461_v59  ;;  %2574 = vperm.xlu1 %3620, %v3973_v22   ;;  %v5466_v28 = vpop.permute.xlu1 %1847 }
 0x2c1   :  { %9253 = vst [vmem:[#allocation215_spill] sm:$0xff] %v5466_v28 }
 0x2c2   :  { %2117 = vrot.lane.b32.xlu0 %v4622_v61, %s4047_s18 }
 0x2c3   :  { %v5470_v52 = vpop.permute.xlu0 %2125 }
 0x2c4   :  { %9254 = vst [vmem:[#allocation216_spill] sm:$0xff] %v5470_v52  ;;  %2578 = vperm.xlu1 %3620, %v3974_v23   ;;  %v5475_v18 = vpop.permute.xlu1 %1863 }
 0x2c5   :  { %9255 = vst [vmem:[#allocation217_spill] sm:$0xff] %v5475_v18  ;;  %v9260_v18 = vlaneseq }
 0x2c6   :  { %2254 = vperm.xlu0 %3623, %v5247_v46  }
 0x2c7   :  { %v5478_v59 = vpop.permute.xlu0 %1589 }
 0x2c8   :  { %9256 = vst [vmem:[#allocation218_spill] sm:$0xff] %v5478_v59  ;;  %1591 = vrot.lane.b32.xlu1 %v4668_v1, %s4043_s25  ;;  %v5482_v22 = vpop.permute.xlu1 %1879  ;;  %v5494_v59 = vand.u32 127, %v9260_v18  ;;  %v5515_v18 = vsub.s32 0, %v4330_v54  ;;  %v5535_v54 = vmul.f32 %v4406_v7, %v4474_v5 }
 0x2c9   :  { %9257 = vst [vmem:[#allocation219_spill] sm:$0xff] %v5482_v22  ;;  %3621 = vset.pattern.permute.xlu1 %v9163_v50 }
 0x2ca   :  { %3624 = vset.pattern.permute.xlu0 %v9207_v39  ;;  %v5508_v39 = vmul.f32 %v4231_v36, %v4352_v57  ;;  %9262 = vst [vmem:[#allocation223_spill] sm:$0xff] %v5515_v18  ;;  %v5528_v57 = vmul.f32 %v4384_v47, %v4457_v60  ;;  %vm901_vm1 = vcmp.lt.s32.totalorder %v5494_v59, 16  ;;  %vm654_vm2 = vcmp.lt.s32.totalorder %v5494_v59, 17 }
 0x2cb   :  { %2482 = vperm.xlu0 %3624, %v5029_v14   ;;  %v5487_v52 = vpop.permute.xlu0 %1621  ;;  %v5504_v14 = vmul.f32 %v4384_v47, %v4394_v53  ;;  %v5524_v53 = vmul.f32 %v4384_v47, %v4413_v6  ;;  %v3975_v6 = vld [vmem:[%s8667_s3 + $0x1] ss:$8 sm:$0xf]  ;;  %v5554_v60 = vmul.f32 %v4406_v7, %v4518_v63  ;;  %vm1149_vm3 = vcmp.lt.s32.totalorder %v5494_v59, 15 }
 0x2cc   :  { %9258 = vst [vmem:[#allocation220_spill] sm:$0xff] %v5487_v52  ;;  %1623 = vrot.lane.b32.xlu1 %v4683_v27, %s4043_s25  ;;  %v5491_v23 = vpop.permute.xlu1 %2238  ;;  %v5512_v52 = vmul.f32 %v4231_v36, %v4320_v42  ;;  %v5568_v22 = vrot.slane %v3975_v6, %v5515_v18  ;;  %v5668_v27 = vmul.f32 %v4435_v48, %v4798_v8  ;;  %vm1397_vm4 = vcmp.lt.s32.totalorder %v5494_v59, 1 }
 0x2cd   :  { %9259 = vst [vmem:[#allocation221_spill] sm:$0xff] %v5491_v23  ;;  %v5564_v23 = vmul.f32 %v4231_v36, %v4375_v31  ;;  %v663_v31 = vsel %vm654_vm2, %v4727_v16, %v4685_v21  ;;  %vm1645_vm5 = vcmp.lt.s32.totalorder %v5494_v59, 127  ;;  %vm1893_vm6 = vcmp.lt.s32.totalorder %v5494_v59, 113 }
 0x2ce   :  { %9279 = vst [vmem:[#allocation240_spill] sm:$0xff] %v5668_v27  ;;  %v655_v27 = vsel %vm654_vm2, %v4685_v21, %v4741_v25  ;;  %v9287_v21 = vld [vmem:[#allocation42_spill] sm:$0xff]  ;;  %vm2141_vm7 = vcmp.lt.s32.totalorder %v5494_v59, 112  ;;  %vm2389_vm8 = vcmp.lt.s32.totalorder %v5494_v59, 111 }
 0x2cf   :  { %2490 = vperm.xlu0 %3624, %v5063_v56   ;;  %v5500_v50 = vpop.permute.xlu0 %1758  ;;  %v5520_v56 = vmul.f32 %v4384_v47, %v4447_v30  ;;  %v5539_v30 = vmul.f32 %v4406_v7, %v4488_v62  ;;  %v5550_v47 = vmul.f32 %v4406_v7, %v4505_v35  ;;  %v3976_v62 = vld [vmem:[%s8667_s3] ss:$8 sm:$0xf]  ;;  %v5575_v7 = vmul.f32 %v4231_v36, %v4308_v40  ;;  %v3977_v36 = vld [vmem:[%s8667_s3 + $0x2] ss:$8 sm:$0xf] }
 0x2d0   :  { %9261 = vst [vmem:[#allocation222_spill] sm:$0xff] %v5500_v50  ;;  %1762 = vperm.xlu1 %3621, %v5353_v4   ;;  %v5545_v50 = vrot.slane %v3975_v6, %v5497_v24  ;;  %v5571_v28 = vrot.slane %v3976_v62, %v5515_v18  ;;  %v5594_v40 = vrot.slane %v3977_v36, %v5497_v24 }
 0x2d1   :  { %v5531_v42 = vpop.permute.xlu1 %2478  ;;  %v5597_v6 = vrot.slane %v3977_v36, %v5515_v18  ;;  %v5628_v4 = vmul.f32 %v4424_v43, %v4622_v61  ;;  %v5632_v18 = vmul.f32 %v4424_v43, %v4658_v3 }
 0x2d2   :  { %9263 = vst [vmem:[#allocation224_spill] sm:$0xff] %v5531_v42  ;;  %v5560_v42 = vrot.slane %v3976_v62, %v5497_v24  ;;  %v5602_v62 = vmul.f32 %v4233_v37, %v4577_v34 }
 0x2d3   :  { %2494 = vperm.xlu0 %3624, %v5086_v58   ;;  %v671_v58 = vsel %vm654_vm2, %v4670_v19, %v4727_v16  ;;  %v5610_v16 = vmul.f32 %v4233_v37, %v4528_v2  ;;  %9270 = vst [vmem:[#allocation231_spill] sm:$0xff] %v5628_v4  ;;  %9271 = vst [vmem:[#allocation232_spill] sm:$0xff] %v5632_v18  ;;  %v9297_v18 = vld [vmem:[#allocation46_spill] sm:$0xff] }
 0x2d4   :  { %1853 = vrot.lane.b32.xlu1 %v4644_v41, %s4045_s13  ;;  %v5580_v12 = vpop.permute.xlu0 %1986 }
 0x2d5   :  { %9264 = vst [vmem:[#allocation225_spill] sm:$0xff] %v5580_v12  ;;  %3622 = vset.pattern.permute.xlu1 %v9226_v20  ;;  %v5606_v12 = vmul.f32 %v4233_v37, %v4540_v9  ;;  %9265 = vst [vmem:[#allocation226_spill] sm:$0xff] %v5610_v16  ;;  %v5624_v20 = vmul.f32 %v4424_v43, %v4644_v41  ;;  %v710_v37 = vmul.f32 %v5560_v42, %v671_v58 }
 0x2d6   :  { %v5616_v36 = vpop.permute.xlu1 %1510  ;;  %v5644_v41 = vmul.f32 %v4235_v38, %v4668_v1  ;;  %v5660_v58 = vmul.f32 %v4235_v38, %v4725_v11  ;;  %v902_v1 = vsel %vm901_vm1, %v4687_v45, %v9287_v21 }
 0x2d7   :  { %9267 = vst [vmem:[#allocation228_spill] sm:$0xff] %v5616_v36  ;;  %9269 = vst [vmem:[#allocation230_spill] sm:$0xff] %v5624_v20  ;;  %2363 = vrot.lane.b32.xlu0 %v4540_v9, %s4049_s1  ;;  %v711_v36 = vmul.f32 %v4369_v49, %v663_v31  ;;  %v5652_v9 = vmul.f32 %v4435_v48, %v4766_v55  ;;  %v5656_v31 = vmul.f32 %v4435_v48, %v4782_v17  ;;  %v9306_v20 = vld [vmem:[#allocation38_spill] sm:$0xff] }
 0x2d8   :  { %9273 = vst [vmem:[#allocation234_spill] sm:$0xff] %v5644_v41  ;;  %1885 = vrot.lane.b32.xlu1 %v4658_v3, %s4045_s13  ;;  %v5648_v43 = vpop.permute.xlu0 %1990  ;;  %9277 = vst [vmem:[#allocation238_spill] sm:$0xff] %v5660_v58  ;;  %v5664_v41 = vmul.f32 %v4235_v38, %v4739_v44  ;;  %v9284_v3 = vld [vmem:[#allocation61_spill] sm:$0xff] }
 0x2d9   :  { %9274 = vst [vmem:[#allocation235_spill] sm:$0xff] %v5648_v43  ;;  %9275 = vst [vmem:[#allocation236_spill] sm:$0xff] %v5652_v9  ;;  %v5672_v43 = vmul.f32 %v4435_v48, %v4809_v32  ;;  %v910_v9 = vsel %vm901_vm1, %v4713_v10, %v4687_v45  ;;  %v679_v48 = vsel %vm654_vm2, %v4741_v25, %v4670_v19  ;;  %v9294_v45 = vld [vmem:[#allocation74_spill] sm:$0xff] }
 0x2da   :  { %9276 = vst [vmem:[#allocation237_spill] sm:$0xff] %v5656_v31  ;;  %9278 = vst [vmem:[#allocation239_spill] sm:$0xff] %v5664_v41  ;;  %v918_v31 = vsel %vm901_vm1, %v4672_v0, %v4713_v10  ;;  %v5682_v38 = vpop.permute.xlu1 %1587  ;;  %v9286_v10 = vld [vmem:[#allocation11_spill] sm:$0xff]  ;;  %v926_v19 = vsel %vm901_vm1, %v9287_v21, %v4672_v0  ;;  %v709_v0 = vmul.f32 %v5571_v28, %v679_v48  ;;  %v9296_v21 = vld [vmem:[#allocation8_spill] sm:$0xff] }
 0x2db   :  { %9280 = vst [vmem:[#allocation241_spill] sm:$0xff] %v5672_v43  ;;  %9281 = vst [vmem:[#allocation242_spill] sm:$0xff] %v5682_v38  ;;  %v9282_v43 = vld [vmem:[#allocation5_spill] sm:$0xff]  ;;  %2498 = vperm.xlu0 %3624, %v5169_v51   ;;  %v774_v38 = vmul.f32 %v9286_v10, %v710_v37  ;;  %v775_v58 = vmul.f32 %v9286_v10, %v711_v36  ;;  %v5716_v51 = vmul.f32 %v5545_v50, %v918_v31  ;;  %v9290_v37 = vld [vmem:[#allocation6_spill] sm:$0xff] }
 0x2dc   :  { %v5694_v41 = vmul.f32 %v9282_v43, %v4831_v26  ;;  %v5698_v29 = vmul.f32 %v9282_v43, %v9284_v3  ;;  %2083 = vrot.lane.b32.xlu1 %v4528_v2, %s4047_s18  ;;  %v5713_v25 = vpop.permute.xlu0 %1994  ;;  %v5719_v36 = vmul.f32 %v9290_v37, %v910_v9  ;;  %v5727_v17 = vmul.f32 %v9282_v43, %v9294_v45  ;;  %v9299_v9 = vld [vmem:[#allocation44_spill] sm:$0xff] }
 0x2dd   :  { %9288 = vst [vmem:[#allocation11_spill] sm:$0xff] %v5713_v25  ;;  %9289 = vst [vmem:[#allocation42_spill] sm:$0xff] %v5716_v51  ;;  %v712_v2 = vmul.f32 %v9296_v21, %v655_v27  ;;  %v9298_v25 = vld [vmem:[#allocation54_spill] sm:$0xff]  ;;  %v9304_v48 = vld [vmem:[#allocation40_spill] sm:$0xff] }
 0x2de   :  { %9283 = vst [vmem:[#allocation5_spill] sm:$0xff] %v5694_v41  ;;  %9285 = vst [vmem:[#allocation243_spill] sm:$0xff] %v5698_v29  ;;  %v9292_v29 = vld [vmem:[#allocation71_spill] sm:$0xff]  ;;  %v664_v31 = vsel %vm654_vm2, %v9298_v25, %v9297_v18  ;;  %v5739_v51 = vpop.permute.xlu1 %1619  ;;  %v9305_v27 = vld [vmem:[#allocation45_spill] sm:$0xff] }
 0x2df   :  { %9291 = vst [vmem:[#allocation6_spill] sm:$0xff] %v5719_v36  ;;  %v5723_v41 = vmul.f32 %v9282_v43, %v9292_v29  ;;  %9295 = vst [vmem:[#allocation245_spill] sm:$0xff] %v5727_v17  ;;  %v672_v36 = vsel %vm654_vm2, %v9299_v9, %v9298_v25  ;;  %v9302_v43 = vld [vmem:[#allocation7_spill] sm:$0xff]  ;;  %v1158_v4 = vsel %vm1149_vm3, %v9305_v27, %v9304_v48  ;;  %1611 = vrot.lane.b32.xlu0 %v9292_v29, %s4043_s25  ;;  %v9315_v29 = vld [vmem:[#allocation56_spill] sm:$0xff] }
 0x2e0   :  { %9300 = vst [vmem:[#allocation8_spill] sm:$0xff] %v5739_v51  ;;  %v5745_v17 = vmul.f32 %v9302_v43, %v902_v1  ;;  %v1166_v55 = vsel %vm1149_vm3, %v9306_v20, %v9305_v27  ;;  %v5758_v25 = vadd.f32 %v774_v38, %v5508_v39  ;;  %v9309_v1 = vld [vmem:[#allocation57_spill] sm:$0xff]  ;;  %2099 = vrot.lane.b32.xlu1 %v4577_v34, %s4047_s18  ;;  %v5773_v27 = vpop.permute.xlu0 %1998  ;;  %v9311_v39 = vld [vmem:[#allocation47_spill] sm:$0xff]  ;;  %v9322_v26 = vld [vmem:[#allocation60_spill] sm:$0xff] }
 0x2e1   :  { %9293 = vst [vmem:[#allocation244_spill] sm:$0xff] %v5723_v41  ;;  %v5742_v41 = vmul.f32 %v5568_v22, %v926_v19  ;;  %v5761_v19 = vadd.f32 %v775_v58, %v5512_v52  ;;  %9310 = vst [vmem:[#allocation40_spill] sm:$0xff] %v5773_v27  ;;  %v1150_v52 = vsel %vm1149_vm3, %v9304_v48, %v9311_v39  ;;  %v9314_v48 = vld [vmem:[#allocation53_spill] sm:$0xff] }
 0x2e2   :  { %9303 = vst [vmem:[#allocation54_spill] sm:$0xff] %v5745_v17  ;;  %9307 = vst [vmem:[#allocation44_spill] sm:$0xff] %v5758_v25  ;;  %v656_v17 = vsel %vm654_vm2, %v9297_v18, %v9309_v1  ;;  %v1174_v18 = vsel %vm1149_vm3, %v9311_v39, %v9306_v20  ;;  %v714_v58 = vmul.f32 %v5560_v42, %v672_v36  ;;  %v9312_v25 = vld [vmem:[#allocation9_spill] sm:$0xff]  ;;  %v5789_v51 = vpop.permute.xlu1 %1754  ;;  %v9316_v20 = vld [vmem:[#allocation50_spill] sm:$0xff] }
 0x2e3   :  { %9301 = vst [vmem:[#allocation46_spill] sm:$0xff] %v5742_v41  ;;  %9308 = vst [vmem:[#allocation7_spill] sm:$0xff] %v5761_v19  ;;  %v680_v41 = vsel %vm654_vm2, %v9309_v1, %v9299_v9  ;;  %v715_v38 = vmul.f32 %v4369_v49, %v664_v31  ;;  %v773_v9 = vmul.f32 %v9286_v10, %v709_v0  ;;  %1643 = vrot.lane.b32.xlu0 %v9294_v45, %s4043_s25  ;;  %v9318_v31 = vld [vmem:[#allocation59_spill] sm:$0xff] }
 0x2e4   :  { %v776_v1 = vmul.f32 %v9286_v10, %v712_v2  ;;  %v1206_v19 = vmul.f32 %v5594_v40, %v1166_v55  ;;  %v1207_v27 = vmul.f32 %v9312_v25, %v1158_v4  ;;  %9313 = vst [vmem:[#allocation45_spill] sm:$0xff] %v5789_v51  ;;  %v911_v34 = vsel %vm901_vm1, %v9315_v29, %v9314_v48  ;;  %v9317_v4 = vld [vmem:[#allocation10_spill] sm:$0xff] }
 0x2e5   :  { %v919_v36 = vsel %vm901_vm1, %v9316_v20, %v9315_v29  ;;  %v713_v0 = vmul.f32 %v5571_v28, %v680_v41  ;;  %v716_v2 = vmul.f32 %v9296_v21, %v656_v17  ;;  %v1205_v55 = vmul.f32 %v5597_v6, %v1174_v18  ;;  %2131 = vrot.lane.b32.xlu1 %v4587_v13, %s4047_s18  ;;  %v5815_v41 = vpop.permute.xlu0 %1867  ;;  %v9320_v17 = vld [vmem:[#allocation20_spill] sm:$0xff] }
 0x2e6   :  { %v1208_v10 = vmul.f32 %v9317_v4, %v1150_v52  ;;  %v903_v39 = vsel %vm901_vm1, %v9314_v48, %v9318_v31  ;;  %v927_v29 = vsel %vm901_vm1, %v9318_v31, %v9316_v20  ;;  %9319 = vst [vmem:[#allocation38_spill] sm:$0xff] %v5815_v41  ;;  %v778_v51 = vmul.f32 %v9320_v17, %v714_v58  ;;  %v9321_v52 = vld [vmem:[#allocation51_spill] sm:$0xff]  ;;  %v9323_v48 = vld [vmem:[#allocation48_spill] sm:$0xff]  ;;  %v5835_v41 = vpop.permute.xlu1 %1849 }
 0x2e7   :  { %v779_v18 = vmul.f32 %v9320_v17, %v715_v38  ;;  %v1159_v33 = vsel %vm1149_vm3, %v9322_v26, %v9321_v52  ;;  %v1167_v16 = vsel %vm1149_vm3, %v9323_v48, %v9322_v26  ;;  %v5828_v20 = vadd.f32 %v773_v9, %v5575_v7  ;;  %9326 = vst [vmem:[#allocation9_spill] sm:$0xff] %v5835_v41  ;;  %v9327_v7 = vld [vmem:[#allocation25_spill] sm:$0xff] }
 0x2e8   :  { %v5831_v31 = vadd.f32 %v776_v1, %v5564_v23  ;;  %v962_v58 = vmul.f32 %v5545_v50, %v919_v36  ;;  %v963_v38 = vmul.f32 %v9290_v37, %v911_v34  ;;  %v777_v13 = vmul.f32 %v9320_v17, %v713_v0  ;;  %1857 = vrot.lane.b32.xlu0 %v4798_v8, %s4045_s13 }
 0x2e9   :  { %9324 = vst [vmem:[#allocation57_spill] sm:$0xff] %v5828_v20  ;;  %v780_v3 = vmul.f32 %v9320_v17, %v716_v2  ;;  %v961_v46 = vmul.f32 %v5568_v22, %v927_v29  ;;  %v964_v26 = vmul.f32 %v9302_v43, %v903_v39  ;;  %v5844_v23 = vmul.f32 %v9327_v7, %v1206_v19  ;;  %v5853_v36 = vpop.permute.xlu0 %2002  ;;  %v9333_v39 = vld [vmem:[#allocation16_spill] sm:$0xff] }
 0x2ea   :  { %9325 = vst [vmem:[#allocation47_spill] sm:$0xff] %v5831_v31  ;;  %v5847_v9 = vmul.f32 %v9327_v7, %v1207_v27  ;;  %v1210_v34 = vmul.f32 %v5594_v40, %v1167_v16  ;;  %v1211_v1 = vmul.f32 %v9312_v25, %v1159_v33  ;;  %2329 = vrot.lane.b32.xlu1 %v4474_v5, %s4049_s1  ;;  %9330 = vst [vmem:[#allocation50_spill] sm:$0xff] %v5853_v36  ;;  %v9334_v33 = vld [vmem:[#allocation63_spill] sm:$0xff] }
 0x2eb   :  { %9328 = vst [vmem:[#allocation53_spill] sm:$0xff] %v5844_v23  ;;  %v5856_v0 = vmul.f32 %v9327_v7, %v1205_v55  ;;  %v5859_v2 = vmul.f32 %v9327_v7, %v1208_v10  ;;  %v810_v19 = vadd.f32 %v778_v51, %v5520_v56  ;;  %v811_v27 = vadd.f32 %v779_v18, %v5524_v53  ;;  %v5873_v10 = vpop.permute.xlu1 %1881  ;;  %v9336_v18 = vld [vmem:[#allocation28_spill] sm:$0xff] }
 0x2ec   :  { %9329 = vst [vmem:[#allocation56_spill] sm:$0xff] %v5847_v9  ;;  %v1026_v29 = vmul.f32 %v9333_v39, %v962_v58  ;;  %v1027_v16 = vmul.f32 %v9333_v39, %v963_v38  ;;  %v1151_v5 = vsel %vm1149_vm3, %v9321_v52, %v9334_v33  ;;  %v1175_v55 = vsel %vm1149_vm3, %v9334_v33, %v9323_v48  ;;  %v9337_v38 = vld [vmem:[#allocation65_spill] sm:$0xff]  ;;  %v9338_v7 = vld [vmem:[#allocation72_spill] sm:$0xff] }
 0x2ed   :  { %9331 = vst [vmem:[#allocation10_spill] sm:$0xff] %v5856_v0  ;;  %9332 = vst [vmem:[#allocation59_spill] sm:$0xff] %v5859_v2  ;;  %v809_v56 = vadd.f32 %v777_v13, %v5504_v14  ;;  %v812_v53 = vadd.f32 %v780_v3, %v5528_v57  ;;  %v1025_v51 = vmul.f32 %v9333_v39, %v961_v46  ;;  %1889 = vrot.lane.b32.xlu0 %v4809_v32, %s4045_s13  ;;  %v9339_v13 = vld [vmem:[#allocation62_spill] sm:$0xff]  ;;  %v5893_v46 = vpop.permute.xlu0 %2113 }
 0x2ee   :  { %9335 = vst [vmem:[#allocation20_spill] sm:$0xff] %v5873_v10  ;;  %v1028_v17 = vmul.f32 %v9333_v39, %v964_v26  ;;  %v1274_v52 = vmul.f32 %v9336_v18, %v1210_v34  ;;  %v1275_v58 = vmul.f32 %v9336_v18, %v1211_v1  ;;  %v665_v48 = vsel %vm654_vm2, %v9338_v7, %v9337_v38  ;;  %v9341_v26 = vld [vmem:[#allocation75_spill] sm:$0xff] }
 0x2ef   :  { %v673_v3 = vsel %vm654_vm2, %v9339_v13, %v9338_v7  ;;  %2345 = vrot.lane.b32.xlu1 %v4505_v35, %s4049_s1  ;;  %9340 = vst [vmem:[#allocation51_spill] sm:$0xff] %v5893_v46  ;;  %v1209_v14 = vmul.f32 %v5597_v6, %v1175_v55  ;;  %v1212_v57 = vmul.f32 %v9317_v4, %v1151_v5  ;;  %v9342_v7 = vld [vmem:[#allocation68_spill] sm:$0xff]  ;;  %v9343_v35 = vld [vmem:[#allocation70_spill] sm:$0xff]  ;;  %v5913_v9 = vpop.permute.xlu1 %2077 }
 0x2f0   :  { %v657_v34 = vsel %vm654_vm2, %v9337_v38, %v9341_v26  ;;  %v681_v1 = vsel %vm654_vm2, %v9341_v26, %v9339_v13  ;;  %v1058_v39 = vadd.f32 %v1026_v29, %v810_v19  ;;  %v1059_v33 = vadd.f32 %v1027_v16, %v811_v27  ;;  %v9344_v55 = vld [vmem:[#allocation66_spill] sm:$0xff]  ;;  %9345 = vst [vmem:[#allocation60_spill] sm:$0xff] %v5913_v9  ;;  %v9349_v26 = vld [vmem:[#allocation77_spill] sm:$0xff] }
 0x2f1   :  { %v912_v2 = vsel %vm901_vm1, %v9343_v35, %v9342_v7  ;;  %v920_v5 = vsel %vm901_vm1, %v9344_v55, %v9343_v35  ;;  %v1057_v38 = vadd.f32 %v1025_v51, %v809_v56  ;;  %v1060_v23 = vadd.f32 %v1028_v17, %v812_v53  ;;  %2103 = vrot.lane.b32.xlu0 %v4725_v11, %s4047_s18  ;;  %v5927_v56 = vpop.permute.xlu0 %2341 }
 0x2f2   :  { %v718_v0 = vmul.f32 %v5560_v42, %v673_v3  ;;  %v719_v13 = vmul.f32 %v4369_v49, %v665_v48  ;;  %v5919_v19 = vadd.f32 %v1274_v52, %v1058_v39  ;;  %v5921_v27 = vadd.f32 %v1275_v58, %v1059_v33  ;;  %9346 = vst [vmem:[#allocation48_spill] sm:$0xff] %v5927_v56  ;;  %v9347_v48 = vld [vmem:[#allocation73_spill] sm:$0xff]  ;;  %v9353_v33 = vld [vmem:[#allocation79_spill] sm:$0xff] }
 0x2f3   :  { %v717_v29 = vmul.f32 %v5571_v28, %v681_v1  ;;  %v720_v16 = vmul.f32 %v9296_v21, %v657_v34  ;;  %2377 = vrot.lane.b32.xlu1 %v4518_v63, %s4049_s1  ;;  %v1273_v53 = vmul.f32 %v9336_v18, %v1209_v14  ;;  %v1276_v51 = vmul.f32 %v9336_v18, %v1212_v57  ;;  %v9348_v3 = vld [vmem:[#allocation69_spill] sm:$0xff]  ;;  %v9350_v18 = vld [vmem:[#allocation67_spill] sm:$0xff]  ;;  %v5949_v57 = vpop.permute.xlu1 %2079  ;;  %v9352_v34 = vld [vmem:[#allocation12_spill] sm:$0xff] }
 0x2f4   :  { %v966_v17 = vmul.f32 %v5545_v50, %v920_v5  ;;  %v967_v52 = vmul.f32 %v9290_v37, %v912_v2  ;;  %v904_v58 = vsel %vm901_vm1, %v9342_v7, %v9347_v48  ;;  %v928_v63 = vsel %vm901_vm1, %v9347_v48, %v9344_v55  ;;  %9351 = vst [vmem:[#allocation25_spill] sm:$0xff] %v5949_v57  ;;  %v9355_v48 = vld [vmem:[#allocation84_spill] sm:$0xff] }
 0x2f5   :  { %v1160_v14 = vsel %vm1149_vm3, %v9349_v26, %v9348_v3  ;;  %v1168_v2 = vsel %vm1149_vm3, %v9350_v18, %v9349_v26  ;;  %v782_v1 = vmul.f32 %v9352_v34, %v718_v0  ;;  %v783_v39 = vmul.f32 %v9352_v34, %v719_v13  ;;  %2135 = vrot.lane.b32.xlu0 %v4739_v44, %s4047_s18  ;;  %v9354_v0 = vld [vmem:[#allocation78_spill] sm:$0xff]  ;;  %v9356_v26 = vld [vmem:[#allocation76_spill] sm:$0xff] }
 0x2f6   :  { %v1152_v7 = vsel %vm1149_vm3, %v9348_v3, %v9353_v33  ;;  %v1176_v35 = vsel %vm1149_vm3, %v9353_v33, %v9350_v18  ;;  %v781_v55 = vmul.f32 %v9352_v34, %v717_v29  ;;  %v784_v5 = vmul.f32 %v9352_v34, %v720_v16  ;;  %v3978_v18 = vld [vmem:[%s8668_s4 + $0x10] sm:$0xff]  ;;  %v5976_v33 = vpop.permute.xlu0 %2357 }
 0x2f7   :  { %v666_v13 = vsel %vm654_vm2, %v9355_v48, %v9354_v0  ;;  %v674_v3 = vsel %vm654_vm2, %v9356_v26, %v9355_v48  ;;  %2582 = vperm.xlu1 %3622, %v3978_v18   ;;  %9357 = vst [vmem:[#allocation16_spill] sm:$0xff] %v5976_v33  ;;  %v5978_v29 = vadd.f32 %v1273_v53, %v1057_v38  ;;  %v5988_v9 = vpop.permute.xlu1 %2095 }
 0x2f8   :  { %v5980_v16 = vadd.f32 %v1276_v51, %v1060_v23  ;;  %v1214_v34 = vmul.f32 %v5594_v40, %v1168_v2  ;;  %v1215_v31 = vmul.f32 %v9312_v25, %v1160_v14  ;;  %v965_v20 = vmul.f32 %v5568_v22, %v928_v63  ;;  %v9359_v51 = vld [vmem:[#allocation18_spill] sm:$0xff] }
 0x2f9   :  { %v968_v36 = vmul.f32 %v9302_v43, %v904_v58  ;;  %v1213_v48 = vmul.f32 %v5597_v6, %v1176_v35  ;;  %v1216_v56 = vmul.f32 %v9317_v4, %v1152_v7  ;;  %v814_v18 = vadd.f32 %v782_v1, %v5550_v47  ;;  %2333 = vrot.lane.b32.xlu0 %v4608_v15, %s4049_s1  ;;  %v9362_v7 = vld [vmem:[#allocation86_spill] sm:$0xff] }
 0x2fa   :  { %9358 = vst [vmem:[#allocation63_spill] sm:$0xff] %v5980_v16  ;;  %v815_v38 = vadd.f32 %v783_v39, %v5539_v30  ;;  %v722_v23 = vmul.f32 %v5560_v42, %v674_v3  ;;  %v723_v53 = vmul.f32 %v4369_v49, %v666_v13  ;;  %v1030_v63 = vmul.f32 %v9359_v51, %v966_v17  ;;  %v6002_v47 = vpop.permute.xlu0 %2373  ;;  %v9361_v30 = vld [vmem:[#allocation27_spill] sm:$0xff]  ;;  %v9363_v3 = vld [vmem:[#allocation13_spill] sm:$0xff] }
 0x2fb   :  { %v1031_v58 = vmul.f32 %v9359_v51, %v967_v52  ;;  %v813_v14 = vadd.f32 %v781_v55, %v5535_v54  ;;  %v816_v2 = vadd.f32 %v784_v5, %v5554_v60  ;;  %1395 = vrot.lane.b32.xlu1 %v9294_v45, %s4039_s12  ;;  %9360 = vst [vmem:[#allocation28_spill] sm:$0xff] %v6002_v47  ;;  %v6018_v5 = vpop.permute.xlu1 %2111 }
 0x2fc   :  { %v1278_v1 = vmul.f32 %v9361_v30, %v1214_v34  ;;  %v1279_v39 = vmul.f32 %v9361_v30, %v1215_v31  ;;  %v658_v17 = vsel %vm654_vm2, %v9354_v0, %v9362_v7  ;;  %v682_v54 = vsel %vm654_vm2, %v9362_v7, %v9356_v26 }
 0x2fd   :  { %v1029_v60 = vmul.f32 %v9359_v51, %v965_v20  ;;  %v1032_v52 = vmul.f32 %v9359_v51, %v968_v36  ;;  %v1277_v35 = vmul.f32 %v9361_v30, %v1213_v48  ;;  %v1280_v55 = vmul.f32 %v9361_v30, %v1216_v56  ;;  %2365 = vrot.lane.b32.xlu0 %v4622_v61, %s4049_s1 }
 0x2fe   :  { %v1062_v31 = vadd.f32 %v1030_v63, %v814_v18  ;;  %v1063_v13 = vadd.f32 %v1031_v58, %v815_v38  ;;  %v786_v34 = vmul.f32 %v9363_v3, %v722_v23  ;;  %v787_v0 = vmul.f32 %v9363_v3, %v723_v53  ;;  %v6028_v56 = vpop.permute.xlu0 %1393  ;;  %v9367_v38 = vld [vmem:[#allocation85_spill] sm:$0xff] }
 0x2ff   :  { %v1061_v26 = vadd.f32 %v1029_v60, %v813_v14  ;;  %v1064_v7 = vadd.f32 %v1032_v52, %v816_v2  ;;  %v721_v20 = vmul.f32 %v5571_v28, %v682_v54  ;;  %v724_v36 = vmul.f32 %v9296_v21, %v658_v17  ;;  %1609 = vrot.lane.b32.xlu1 %v4798_v8, %s4043_s25  ;;  %v9368_v23 = vld [vmem:[#allocation81_spill] sm:$0xff]  ;;  %v9371_v14 = vld [vmem:[#allocation82_spill] sm:$0xff]  ;;  %v9372_v2 = vld [vmem:[#allocation88_spill] sm:$0xff]  ;;  %v6059_v17 = vpop.permute.xlu1 %2127 }
 0x300   :  { %9364 = vst [vmem:[#allocation65_spill] sm:$0xff] %v6028_v56  ;;  %v6030_v48 = vadd.f32 %v1278_v1, %v1062_v31  ;;  %v6032_v18 = vadd.f32 %v1279_v39, %v1063_v13  ;;  %v921_v61 = vsel %vm901_vm1, %v9368_v23, %v9367_v38  ;;  %v6041_v53 = vld [vmem:[%s8667_s3 + $0x3] ss:$8 sm:$0xf]  ;;  %v1161_v30 = vsel %vm1149_vm3, %v9372_v2, %v9371_v14 }
 0x301   :  { %v6045_v51 = vrot.slane %v6041_v53, %v5497_v24  ;;  %v6047_v63 = vadd.f32 %v1277_v35, %v1061_v26  ;;  %v6049_v58 = vadd.f32 %v1280_v55, %v1064_v7  ;;  %v9373_v1 = vld [vmem:[#allocation80_spill] sm:$0xff]  ;;  %9374 = vst [vmem:[#allocation70_spill] sm:$0xff] %v6059_v17  ;;  %v6062_v54 = vadd.f32 %v786_v34, %v5602_v62  ;;  %v9377_v52 = vld [vmem:[#allocation83_spill] sm:$0xff]  ;;  %v9379_v13 = vld [vmem:[#allocation162_spill] sm:$0xff] }
 0x302   :  { %9365 = vst [vmem:[#allocation72_spill] sm:$0xff] %v6030_v48  ;;  %9366 = vst [vmem:[#allocation62_spill] sm:$0xff] %v6032_v18  ;;  %v1169_v39 = vsel %vm1149_vm3, %v9373_v1, %v9372_v2  ;;  %v6065_v60 = vadd.f32 %v787_v0, %v5606_v12  ;;  %v913_v35 = vsel %vm901_vm1, %v9367_v38, %v9377_v52  ;;  %v9378_v55 = vld [vmem:[#allocation87_spill] sm:$0xff]  ;;  %2502 = vperm.xlu0 %3624, %v9379_v13   ;;  %v9382_v0 = vld [vmem:[#allocation89_spill] sm:$0xff]  ;;  %v6087_v38 = vpop.permute.xlu0 %1607 }
 0x303   :  { %9369 = vst [vmem:[#allocation75_spill] sm:$0xff] %v6047_v63  ;;  %9370 = vst [vmem:[#allocation68_spill] sm:$0xff] %v6049_v58  ;;  %v929_v31 = vsel %vm901_vm1, %v9378_v55, %v9368_v23  ;;  %v6077_v26 = vmul.f32 %v5545_v50, %v921_v61  ;;  %v785_v62 = vmul.f32 %v9363_v3, %v721_v20  ;;  %v9381_v34 = vld [vmem:[#allocation99_spill] sm:$0xff]  ;;  %1641 = vrot.lane.b32.xlu1 %v4809_v32, %s4043_s25  ;;  %v9423_v32 = vld [vmem:[#allocation232_spill] sm:$0xff] }
 0x304   :  { %9375 = vst [vmem:[#allocation66_spill] sm:$0xff] %v6062_v54  ;;  %9376 = vst [vmem:[#allocation73_spill] sm:$0xff] %v6065_v60  ;;  %v788_v12 = vmul.f32 %v9363_v3, %v724_v36  ;;  %v675_v7 = vsel %vm654_vm2, %v9382_v0, %v9381_v34  ;;  %v905_v23 = vsel %vm901_vm1, %v9377_v52, %v9378_v55  ;;  %v9384_v3 = vld [vmem:[#allocation92_spill] sm:$0xff]  ;;  %v9387_v60 = vld [vmem:[#allocation101_spill] sm:$0xff] }
 0x305   :  { %9380 = vst [vmem:[#allocation69_spill] sm:$0xff] %v6077_v26  ;;  %9383 = vst [vmem:[#allocation77_spill] sm:$0xff] %v6087_v38  ;;  %v1218_v61 = vmul.f32 %v5594_v40, %v1169_v39  ;;  %v1219_v20 = vmul.f32 %v9312_v25, %v1161_v30  ;;  %v667_v36 = vsel %vm654_vm2, %v9381_v34, %v9384_v3  ;;  %v6113_v39 = vpop.permute.xlu1 %2486  ;;  %v9389_v55 = vld [vmem:[#allocation90_spill] sm:$0xff]  ;;  %v9390_v34 = vld [vmem:[#allocation95_spill] sm:$0xff] }
 0x306   :  { %v6100_v2 = vmul.f32 %v9290_v37, %v913_v35  ;;  %v6103_v13 = vmul.f32 %v5568_v22, %v929_v31  ;;  %v659_v52 = vsel %vm654_vm2, %v9384_v3, %v9387_v60  ;;  %v683_v30 = vsel %vm654_vm2, %v9387_v60, %v9382_v0  ;;  %9388 = vst [vmem:[#allocation79_spill] sm:$0xff] %v6113_v39  ;;  %v9391_v31 = vld [vmem:[#allocation97_spill] sm:$0xff]  ;;  %v9394_v0 = vld [vmem:[#allocation226_spill] sm:$0xff]  ;;  %v9396_v38 = vld [vmem:[#allocation227_spill] sm:$0xff] }
 0x307   :  { %v1177_v35 = vsel %vm1149_vm3, %v9389_v55, %v9373_v1  ;;  %v914_v54 = vsel %vm901_vm1, %v9391_v31, %v9390_v34  ;;  %v726_v26 = vmul.f32 %v5560_v42, %v675_v7  ;;  %v9393_v60 = vld [vmem:[#allocation61_spill] sm:$0xff]  ;;  %v6134_v1 = vadd.f32 %v788_v12, %v9396_v38  ;;  %1855 = vrot.lane.b32.xlu1 %v4725_v11, %s4045_s13 }
 0x308   :  { %9385 = vst [vmem:[#allocation67_spill] sm:$0xff] %v6100_v2  ;;  %9386 = vst [vmem:[#allocation12_spill] sm:$0xff] %v6103_v13  ;;  %v9392_v2 = vld [vmem:[#allocation93_spill] sm:$0xff]  ;;  %1843 = vrot.lane.b32.xlu0 %v9393_v60, %s4045_s13  ;;  %v6131_v13 = vadd.f32 %v785_v62, %v9394_v0  ;;  %v6137_v47 = vmul.f32 %v9302_v43, %v905_v23  ;;  %v727_v33 = vmul.f32 %v4369_v49, %v667_v36 }
 0x309   :  { %v922_v3 = vsel %vm901_vm1, %v9392_v2, %v9391_v31  ;;  %9397 = vst [vmem:[#allocation84_spill] sm:$0xff] %v6134_v1  ;;  %v6142_v31 = vpop.permute.xlu0 %1639  ;;  %v9400_v7 = vld [vmem:[#allocation29_spill] sm:$0xff]  ;;  %v725_v62 = vmul.f32 %v5571_v28, %v683_v30  ;;  %v728_v12 = vmul.f32 %v9296_v21, %v659_v52  ;;  %v1153_v38 = vsel %vm1149_vm3, %v9371_v14, %v9389_v55  ;;  %v9404_v1 = vld [vmem:[#allocation100_spill] sm:$0xff]  ;;  %v9405_v30 = vld [vmem:[#allocation103_spill] sm:$0xff] }
 0x30a   :  { %9395 = vst [vmem:[#allocation78_spill] sm:$0xff] %v6131_v13  ;;  %9398 = vst [vmem:[#allocation76_spill] sm:$0xff] %v6137_v47  ;;  %v6145_v56 = vmul.f32 %v9400_v7, %v1218_v61  ;;  %v6148_v39 = vmul.f32 %v9400_v7, %v1219_v20  ;;  %v1217_v23 = vmul.f32 %v5597_v6, %v1177_v35  ;;  %v9403_v61 = vld [vmem:[#allocation23_spill] sm:$0xff]  ;;  %v9406_v14 = vld [vmem:[#allocation94_spill] sm:$0xff]  ;;  %v6172_v35 = vpop.permute.xlu1 %1514 }
 0x30b   :  { %9399 = vst [vmem:[#allocation18_spill] sm:$0xff] %v6142_v31  ;;  %v974_v36 = vmul.f32 %v5545_v50, %v922_v3  ;;  %v975_v0 = vmul.f32 %v9290_v37, %v914_v54  ;;  %v906_v20 = vsel %vm901_vm1, %v9390_v34, %v9404_v1  ;;  %v930_v52 = vsel %vm901_vm1, %v9404_v1, %v9392_v2  ;;  %v9408_v54 = vld [vmem:[#allocation64_spill] sm:$0xff]  ;;  %v9413_v31 = vld [vmem:[#allocation109_spill] sm:$0xff] }
 0x30c   :  { %9401 = vst [vmem:[#allocation27_spill] sm:$0xff] %v6145_v56  ;;  %9402 = vst [vmem:[#allocation86_spill] sm:$0xff] %v6148_v39  ;;  %v790_v56 = vmul.f32 %v9403_v61, %v726_v26  ;;  %v1170_v55 = vsel %vm1149_vm3, %v9406_v14, %v9405_v30  ;;  %1875 = vrot.lane.b32.xlu0 %v9408_v54, %s4045_s13  ;;  %v791_v26 = vmul.f32 %v9403_v61, %v727_v33  ;;  %v9409_v3 = vld [vmem:[#allocation96_spill] sm:$0xff]  ;;  %v9410_v39 = vld [vmem:[#allocation105_spill] sm:$0xff] }
 0x30d   :  { %9407 = vst [vmem:[#allocation13_spill] sm:$0xff] %v6172_v35  ;;  %v1162_v34 = vsel %vm1149_vm3, %v9405_v30, %v9409_v3  ;;  %v1154_v2 = vsel %vm1149_vm3, %v9409_v3, %v9410_v39  ;;  %v1178_v1 = vsel %vm1149_vm3, %v9410_v39, %v9406_v14  ;;  %1887 = vrot.lane.b32.xlu1 %v4739_v44, %s4045_s13  ;;  %v6191_v13 = vpop.permute.xlu0 %1837  ;;  %v9412_v30 = vld [vmem:[#allocation104_spill] sm:$0xff]  ;;  %v9414_v3 = vld [vmem:[#allocation102_spill] sm:$0xff] }
 0x30e   :  { %9411 = vst [vmem:[#allocation85_spill] sm:$0xff] %v6191_v13  ;;  %v789_v33 = vmul.f32 %v9403_v61, %v725_v62  ;;  %v792_v47 = vmul.f32 %v9403_v61, %v728_v12  ;;  %v668_v35 = vsel %vm654_vm2, %v9413_v31, %v9412_v30  ;;  %v676_v46 = vsel %vm654_vm2, %v9414_v3, %v9413_v31  ;;  %v6213_v17 = vpop.permute.xlu1 %1605  ;;  %v9417_v31 = vld [vmem:[#allocation49_spill] sm:$0xff] }
 0x30f   :  { %v1220_v39 = vmul.f32 %v9317_v4, %v1153_v38  ;;  %v6205_v14 = vmul.f32 %v9400_v7, %v1217_v23  ;;  %v973_v13 = vmul.f32 %v5568_v22, %v930_v52  ;;  %v1222_v62 = vmul.f32 %v5594_v40, %v1170_v55  ;;  %9416 = vst [vmem:[#allocation82_spill] sm:$0xff] %v6213_v17  ;;  %v9418_v38 = vld [vmem:[#allocation230_spill] sm:$0xff]  ;;  %v9422_v17 = vld [vmem:[#allocation229_spill] sm:$0xff] }
 0x310   :  { %v976_v12 = vmul.f32 %v9302_v43, %v906_v20  ;;  %v1223_v61 = vmul.f32 %v9312_v25, %v1162_v34  ;;  %v1221_v10 = vmul.f32 %v5597_v6, %v1178_v1  ;;  %v1224_v44 = vmul.f32 %v9317_v4, %v1154_v2  ;;  %2089 = vrot.lane.b32.xlu0 %v9417_v31, %s4047_s18  ;;  %v9421_v34 = vld [vmem:[#allocation19_spill] sm:$0xff] }
 0x311   :  { %9415 = vst [vmem:[#allocation81_spill] sm:$0xff] %v6205_v14  ;;  %v822_v23 = vadd.f32 %v790_v56, %v9418_v38  ;;  %v9419_v14 = vld [vmem:[#allocation231_spill] sm:$0xff]  ;;  %v730_v52 = vmul.f32 %v5560_v42, %v676_v46  ;;  %v731_v55 = vmul.f32 %v4369_v49, %v668_v35  ;;  %2085 = vrot.lane.b32.xlu1 %v4608_v15, %s4047_s18  ;;  %v6223_v20 = vpop.permute.xlu0 %1869 }
 0x312   :  { %v823_v41 = vadd.f32 %v791_v26, %v9419_v14  ;;  %9420 = vst [vmem:[#allocation88_spill] sm:$0xff] %v6223_v20  ;;  %v1038_v2 = vmul.f32 %v9421_v34, %v974_v36  ;;  %v1039_v1 = vmul.f32 %v9421_v34, %v975_v0  ;;  %v821_v11 = vadd.f32 %v789_v33, %v9422_v17  ;;  %v9424_v26 = vld [vmem:[#allocation30_spill] sm:$0xff]  ;;  %v9425_v46 = vld [vmem:[#allocation111_spill] sm:$0xff]  ;;  %v9427_v0 = vld [vmem:[#allocation52_spill] sm:$0xff] }
 0x313   :  { %v824_v8 = vadd.f32 %v792_v47, %v9423_v32  ;;  %v1037_v56 = vmul.f32 %v9421_v34, %v973_v13  ;;  %v1286_v14 = vmul.f32 %v9424_v26, %v1222_v62  ;;  %v660_v35 = vsel %vm654_vm2, %v9412_v30, %v9425_v46  ;;  %v6243_v13 = vpop.permute.xlu1 %1637  ;;  %v9428_v62 = vld [vmem:[#allocation14_spill] sm:$0xff] }
 0x314   :  { %v684_v15 = vsel %vm654_vm2, %v9425_v46, %v9414_v3  ;;  %v1040_v36 = vmul.f32 %v9421_v34, %v976_v12  ;;  %v1287_v17 = vmul.f32 %v9424_v26, %v1223_v61  ;;  %v1285_v32 = vmul.f32 %v9424_v26, %v1221_v10  ;;  %9426 = vst [vmem:[#allocation80_spill] sm:$0xff] %v6243_v13  ;;  %v9429_v3 = vld [vmem:[#allocation32_spill] sm:$0xff]  ;;  %v9440_v46 = vld [vmem:[#allocation110_spill] sm:$0xff]  ;;  %v9468_v13 = vld [vmem:[#allocation239_spill] sm:$0xff] }
 0x315   :  { %v1288_v47 = vmul.f32 %v9424_v26, %v1224_v44  ;;  %2121 = vrot.lane.b32.xlu0 %v9427_v0, %s4047_s18  ;;  %v1070_v33 = vadd.f32 %v1038_v2, %v822_v23  ;;  %v1071_v30 = vadd.f32 %v1039_v1, %v823_v41  ;;  %v794_v38 = vmul.f32 %v9428_v62, %v730_v52  ;;  %v6251_v12 = vpop.permute.xlu0 %2006  ;;  %v9433_v41 = vld [vmem:[#allocation112_spill] sm:$0xff]  ;;  %v9434_v52 = vld [vmem:[#allocation107_spill] sm:$0xff] }
 0x316   :  { %v795_v20 = vmul.f32 %v9428_v62, %v731_v55  ;;  %2101 = vrot.lane.b32.xlu1 %v9429_v3, %s4047_s18  ;;  %9430 = vst [vmem:[#allocation83_spill] sm:$0xff] %v6251_v12  ;;  %v1069_v61 = vadd.f32 %v1037_v56, %v821_v11  ;;  %v1072_v10 = vadd.f32 %v1040_v36, %v824_v8  ;;  %v9435_v2 = vld [vmem:[#allocation223_spill] sm:$0xff] }
 0x317   :  { %v729_v44 = vmul.f32 %v5571_v28, %v684_v15  ;;  %v732_v34 = vmul.f32 %v9296_v21, %v660_v35  ;;  %v6256_v26 = vmul.f32 %v9400_v7, %v1220_v39  ;;  %v6258_v23 = vadd.f32 %v1286_v14, %v1070_v33  ;;  %v6278_v39 = vpop.permute.xlu1 %1835  ;;  %v9442_v14 = vld [vmem:[#allocation36_spill] sm:$0xff]  ;;  %v9443_v35 = vld [vmem:[#allocation238_spill] sm:$0xff] }
 0x318   :  { %v923_v55 = vsel %vm901_vm1, %v9434_v52, %v9433_v41  ;;  %v6266_v1 = vrot.slane %v6041_v53, %v9435_v2  ;;  %v6268_v11 = vadd.f32 %v1287_v17, %v1071_v30  ;;  %v6270_v8 = vadd.f32 %v1285_v32, %v1069_v61  ;;  %9441 = vst [vmem:[#allocation90_spill] sm:$0xff] %v6278_v39  ;;  %v9445_v53 = vld [vmem:[#allocation233_spill] sm:$0xff]  ;;  %v9447_v17 = vld [vmem:[#allocation108_spill] sm:$0xff]  ;;  %v9449_v33 = vld [vmem:[#allocation106_spill] sm:$0xff] }
 0x319   :  { %9431 = vst [vmem:[#allocation87_spill] sm:$0xff] %v6256_v26  ;;  %9432 = vst [vmem:[#allocation162_spill] sm:$0xff] %v6258_v23  ;;  %v6272_v56 = vadd.f32 %v1288_v47, %v1072_v10  ;;  %v915_v7 = vsel %vm901_vm1, %v9433_v41, %v9440_v46  ;;  %2335 = vrot.lane.b32.xlu0 %v9442_v14, %s4049_s1  ;;  %v6283_v15 = vadd.f32 %v794_v38, %v9443_v35  ;;  %v9448_v32 = vld [vmem:[#allocation113_spill] sm:$0xff]  ;;  %v9450_v61 = vld [vmem:[#allocation34_spill] sm:$0xff]  ;;  %v6298_v10 = vpop.permute.xlu0 %2115 }
 0x31a   :  { %9436 = vst [vmem:[#allocation99_spill] sm:$0xff] %v6266_v1  ;;  %9437 = vst [vmem:[#allocation89_spill] sm:$0xff] %v6268_v11  ;;  %v6286_v36 = vadd.f32 %v795_v20, %v9445_v53  ;;  %v1163_v47 = vsel %vm1149_vm3, %v9448_v32, %v9447_v17  ;;  %v1171_v30 = vsel %vm1149_vm3, %v9449_v33, %v9448_v32  ;;  %2133 = vrot.lane.b32.xlu1 %v9450_v61, %s4047_s18  ;;  %v9453_v35 = vld [vmem:[#allocation115_spill] sm:$0xff]  ;;  %v9455_v32 = vld [vmem:[#allocation114_spill] sm:$0xff] }
 0x31b   :  { %9438 = vst [vmem:[#allocation92_spill] sm:$0xff] %v6270_v8  ;;  %9439 = vst [vmem:[#allocation101_spill] sm:$0xff] %v6272_v56  ;;  %v6301_v38 = vmul.f32 %v5545_v50, %v923_v55  ;;  %v793_v20 = vmul.f32 %v9428_v62, %v729_v44  ;;  %v796_v41 = vmul.f32 %v9428_v62, %v732_v34  ;;  %v9456_v55 = vld [vmem:[#allocation124_spill] sm:$0xff]  ;;  %v9462_v26 = vld [vmem:[#allocation117_spill] sm:$0xff] }
 0x31c   :  { %9444 = vst [vmem:[#allocation95_spill] sm:$0xff] %v6283_v15  ;;  %9446 = vst [vmem:[#allocation97_spill] sm:$0xff] %v6286_v36  ;;  %v1179_v53 = vsel %vm1149_vm3, %v9453_v35, %v9449_v33  ;;  %v6310_v12 = vmul.f32 %v9290_v37, %v915_v7  ;;  %v907_v36 = vsel %vm901_vm1, %v9440_v46, %v9455_v32  ;;  %v9457_v62 = vld [vmem:[#allocation116_spill] sm:$0xff]  ;;  %v9458_v46 = vld [vmem:[#allocation118_spill] sm:$0xff] }
 0x31d   :  { %9451 = vst [vmem:[#allocation93_spill] sm:$0xff] %v6298_v10  ;;  %9452 = vst [vmem:[#allocation226_spill] sm:$0xff] %v6301_v38  ;;  %v931_v44 = vsel %vm901_vm1, %v9455_v32, %v9434_v52  ;;  %v677_v34 = vsel %vm654_vm2, %v9457_v62, %v9456_v55  ;;  %v1226_v33 = vmul.f32 %v5594_v40, %v1171_v30  ;;  %v6334_v52 = vpop.permute.xlu1 %1851  ;;  %v9460_v32 = vld [vmem:[#allocation37_spill] sm:$0xff]  ;;  %v9463_v10 = vld [vmem:[#allocation126_spill] sm:$0xff]  ;;  %v6353_v39 = vpop.permute.xlu0 %2361 }
 0x31e   :  { %9454 = vst [vmem:[#allocation227_spill] sm:$0xff] %v6310_v12  ;;  %v1227_v7 = vmul.f32 %v9312_v25, %v1163_v47  ;;  %v1155_v15 = vsel %vm1149_vm3, %v9447_v17, %v9453_v35  ;;  %v669_v12 = vsel %vm654_vm2, %v9456_v55, %v9458_v46  ;;  %9459 = vst [vmem:[#allocation29_spill] sm:$0xff] %v6334_v52  ;;  %2367 = vrot.lane.b32.xlu0 %v9460_v32, %s4049_s1  ;;  %v9461_v30 = vld [vmem:[#allocation121_spill] sm:$0xff]  ;;  %v9470_v11 = vld [vmem:[#allocation119_spill] sm:$0xff] }
 0x31f   :  { %v1225_v38 = vmul.f32 %v5597_v6, %v1179_v53  ;;  %v924_v47 = vsel %vm901_vm1, %v9462_v26, %v9461_v30  ;;  %v661_v17 = vsel %vm654_vm2, %v9458_v46, %v9463_v10  ;;  %v685_v35 = vsel %vm654_vm2, %v9463_v10, %v9457_v62  ;;  %v9464_v55 = vld [vmem:[#allocation17_spill] sm:$0xff]  ;;  %9465 = vst [vmem:[#allocation23_spill] sm:$0xff] %v6353_v39  ;;  %v9466_v53 = vld [vmem:[#allocation234_spill] sm:$0xff]  ;;  %v9491_v23 = vld [vmem:[#allocation135_spill] sm:$0xff] }
 0x320   :  { %2331 = vrot.lane.b32.xlu1 %v9464_v55, %s4049_s1  ;;  %v6356_v52 = vadd.f32 %v793_v20, %v9466_v53  ;;  %v6359_v56 = vadd.f32 %v796_v41, %v9468_v13  ;;  %v916_v46 = vsel %vm901_vm1, %v9461_v30, %v9470_v11  ;;  %v734_v45 = vmul.f32 %v5560_v42, %v677_v34  ;;  %v9473_v20 = vld [vmem:[#allocation123_spill] sm:$0xff]  ;;  %v9492_v8 = vld [vmem:[#allocation125_spill] sm:$0xff] }
 0x321   :  { %v6367_v10 = vmul.f32 %v5568_v22, %v931_v44  ;;  %v6370_v62 = vmul.f32 %v9302_v43, %v907_v36  ;;  %v735_v55 = vmul.f32 %v4369_v49, %v669_v12  ;;  %v932_v13 = vsel %vm901_vm1, %v9473_v20, %v9462_v26  ;;  %v6381_v44 = vpop.permute.xlu1 %1883  ;;  %v9476_v36 = vld [vmem:[#allocation31_spill] sm:$0xff] }
 0x322   :  { %9467 = vst [vmem:[#allocation100_spill] sm:$0xff] %v6356_v52  ;;  %9469 = vst [vmem:[#allocation103_spill] sm:$0xff] %v6359_v56  ;;  %v1228_v41 = vmul.f32 %v9317_v4, %v1155_v15  ;;  %v982_v53 = vmul.f32 %v5545_v50, %v924_v47  ;;  %v733_v30 = vmul.f32 %v5571_v28, %v685_v35  ;;  %v9475_v56 = vld [vmem:[#allocation186_spill] sm:$0xff]  ;;  %v6396_v35 = vpop.permute.xlu0 %1593 }
 0x323   :  { %9471 = vst [vmem:[#allocation94_spill] sm:$0xff] %v6367_v10  ;;  %9472 = vst [vmem:[#allocation64_spill] sm:$0xff] %v6370_v62  ;;  %v736_v34 = vmul.f32 %v9296_v21, %v661_v17  ;;  %2506 = vperm.xlu0 %3624, %v9475_v56   ;;  %v6385_v52 = vmul.f32 %v9476_v36, %v1226_v33  ;;  %v6388_v12 = vmul.f32 %v9476_v36, %v1227_v7  ;;  %v9480_v47 = vld [vmem:[#allocation22_spill] sm:$0xff] }
 0x324   :  { %9474 = vst [vmem:[#allocation96_spill] sm:$0xff] %v6381_v44  ;;  %v6391_v26 = vmul.f32 %v9476_v36, %v1225_v38  ;;  %v983_v15 = vmul.f32 %v9290_v37, %v916_v46  ;;  %2347 = vrot.lane.b32.xlu1 %v9480_v47, %s4049_s1  ;;  %9481 = vst [vmem:[#allocation102_spill] sm:$0xff] %v6396_v35  ;;  %v9482_v17 = vld [vmem:[#allocation26_spill] sm:$0xff]  ;;  %v908_v56 = vsel %vm901_vm1, %v9470_v11, %v9473_v20  ;;  %v9490_v44 = vmov 1  }
 0x325   :  { %9477 = vst [vmem:[#allocation105_spill] sm:$0xff] %v6385_v52  ;;  %9478 = vst [vmem:[#allocation104_spill] sm:$0xff] %v6388_v12  ;;  %v798_v62 = vmul.f32 %v9482_v17, %v734_v45  ;;  %v981_v33 = vmul.f32 %v5568_v22, %v932_v13  ;;  %v9483_v7 = vld [vmem:[#allocation130_spill] sm:$0xff]  ;;  %v9484_v12 = vld [vmem:[#allocation120_spill] sm:$0xff]  ;;  %v799_v46 = vmul.f32 %v9482_v17, %v735_v55 }
 0x326   :  { %9479 = vst [vmem:[#allocation109_spill] sm:$0xff] %v6391_v26  ;;  %v1172_v38 = vsel %vm1149_vm3, %v9484_v12, %v9483_v7  ;;  %v9485_v52 = vld [vmem:[#allocation122_spill] sm:$0xff]  ;;  %v9486_v45 = vld [vmem:[#allocation132_spill] sm:$0xff]  ;;  %v6422_v20 = vmul.f32 %v9476_v36, %v1228_v41  ;;  %v9488_v13 = vld [vmem:[#allocation21_spill] sm:$0xff]  ;;  %v797_v10 = vmul.f32 %v9482_v17, %v733_v30  ;;  %v800_v35 = vmul.f32 %v9482_v17, %v736_v34  ;;  %v6441_v30 = vpop.permute.xlu0 %1625 }
 0x327   :  { %v1164_v47 = vsel %vm1149_vm3, %v9483_v7, %v9485_v52  ;;  %v1156_v26 = vsel %vm1149_vm3, %v9485_v52, %v9486_v45  ;;  %v1180_v11 = vsel %vm1149_vm3, %v9486_v45, %v9484_v12  ;;  %v1046_v55 = vmul.f32 %v9488_v13, %v982_v53  ;;  %v6427_v7 = vpop.permute.xlu1 %2081  ;;  %3627 = vset.pattern.permute.xlu0 %v9490_v44  ;;  %v9493_v36 = vld [vmem:[#allocation24_spill] sm:$0xff]  ;;  %v3980_v53 = vld [vmem:[%s8666_s2] sm:$0xff] }
 0x328   :  { %9487 = vst [vmem:[#allocation49_spill] sm:$0xff] %v6422_v20  ;;  %9489 = vst [vmem:[#allocation230_spill] sm:$0xff] %v6427_v7  ;;  %v984_v52 = vmul.f32 %v9302_v43, %v908_v56  ;;  %v1230_v39 = vmul.f32 %v5594_v40, %v1172_v38  ;;  %v678_v41 = vsel %vm654_vm2, %v9492_v8, %v9491_v23  ;;  %2379 = vrot.lane.b32.xlu1 %v9493_v36, %s4049_s1  ;;  %v9495_v56 = vld [vmem:[#allocation129_spill] sm:$0xff]  ;;  %v9496_v36 = vld [vmem:[#allocation240_spill] sm:$0xff] }
 0x329   :  { %990 = vperm.xlu0 %3627, %v3980_v53   ;;  %9494 = vst [vmem:[#allocation231_spill] sm:$0xff] %v6441_v30  ;;  %v1231_v34 = vmul.f32 %v9312_v25, %v1164_v47  ;;  %v1229_v12 = vmul.f32 %v5597_v6, %v1180_v11  ;;  %v1232_v17 = vmul.f32 %v9317_v4, %v1156_v26  ;;  %v9497_v7 = vld [vmem:[#allocation237_spill] sm:$0xff]  ;;  %v9498_v30 = vld [vmem:[#allocation236_spill] sm:$0xff] }
 0x32a   :  { %v670_v38 = vsel %vm654_vm2, %v9491_v23, %v9495_v56  ;;  %v1047_v45 = vmul.f32 %v9488_v13, %v983_v15  ;;  %v830_v20 = vadd.f32 %v798_v62, %v9496_v36  ;;  %v831_v18 = vadd.f32 %v799_v46, %v9497_v7  ;;  %v9499_v47 = vld [vmem:[#allocation241_spill] sm:$0xff] }
 0x32b   :  { %v1045_v53 = vmul.f32 %v9488_v13, %v981_v33  ;;  %v829_v48 = vadd.f32 %v797_v10, %v9498_v30  ;;  %v832_v58 = vadd.f32 %v800_v35, %v9499_v47  ;;  %v738_v11 = vmul.f32 %v5560_v42, %v678_v41  ;;  %v9500_v26 = vld [vmem:[#allocation137_spill] sm:$0xff]  ;;  %v6461_v23 = vpop.permute.xlu1 %2097  ;;  %v3981_v42 = vld [vmem:[%s8668_s4 + $0x18] sm:$0xff]  ;;  %v6475_v35 = vpop.permute.xlu0 %1839 }
 0x32c   :  { %v686_v63 = vsel %vm654_vm2, %v9500_v26, %v9492_v8  ;;  %9501 = vst [vmem:[#allocation19_spill] sm:$0xff] %v6461_v23  ;;  %v9502_v15 = vld [vmem:[#allocation33_spill] sm:$0xff]  ;;  %v739_v62 = vmul.f32 %v4369_v49, %v670_v38  ;;  %v662_v10 = vsel %vm654_vm2, %v9495_v56, %v9500_v26  ;;  %2586 = vperm.xlu1 %3622, %v3981_v42   ;;  %v3982_v8 = vld [vmem:[%s8666_s2 + $0x18] sm:$0xff]  ;;  %9503 = vst [vmem:[#allocation229_spill] sm:$0xff] %v6475_v35 }
 0x32d   :  { %v1294_v16 = vmul.f32 %v9502_v15, %v1230_v39  ;;  %1002 = vperm.xlu0 %3627, %v3982_v8   ;;  %v1048_v39 = vmul.f32 %v9488_v13, %v984_v52  ;;  %v1295_v49 = vmul.f32 %v9502_v15, %v1231_v34  ;;  %v1293_v33 = vmul.f32 %v9502_v15, %v1229_v12  ;;  %v3983_v56 = vld [vmem:[%s8667_s3 + $0x5] ss:$8 sm:$0xf] }
 0x32e   :  { %v1296_v46 = vmul.f32 %v9502_v15, %v1232_v17  ;;  %v1078_v7 = vadd.f32 %v1046_v55, %v830_v20  ;;  %v1079_v41 = vadd.f32 %v1047_v45, %v831_v18  ;;  %v737_v30 = vmul.f32 %v5571_v28, %v686_v63  ;;  %v9504_v13 = vld [vmem:[#allocation15_spill] sm:$0xff]  ;;  %v9514_v26 = vld [vmem:[#allocation149_spill] sm:$0xff]  ;;  %v9517_v8 = vld [vmem:[#allocation244_spill] sm:$0xff] }
 0x32f   :  { %v6486_v38 = vrot.slane %v3983_v56, %v9435_v2  ;;  %v1077_v36 = vadd.f32 %v1045_v53, %v829_v48  ;;  %v1080_v47 = vadd.f32 %v1048_v39, %v832_v58  ;;  %v802_v52 = vmul.f32 %v9504_v13, %v738_v11  ;;  %v6490_v12 = vpop.permute.xlu1 %2129  ;;  %v3984_v48 = vld [vmem:[%s8666_s2 + $0x28] sm:$0xff]  ;;  %v9513_v11 = vld [vmem:[#allocation133_spill] sm:$0xff] }
 0x330   :  { %v740_v34 = vmul.f32 %v9296_v21, %v662_v10  ;;  %9505 = vst [vmem:[#allocation232_spill] sm:$0xff] %v6490_v12  ;;  %v6492_v17 = vadd.f32 %v1294_v16, %v1078_v7  ;;  %v803_v18 = vmul.f32 %v9504_v13, %v739_v62  ;;  %v6497_v28 = vrot.slane %v3983_v56, %v5497_v24  ;;  %v6504_v21 = vpop.permute.xlu0 %1871  ;;  %v3985_v20 = vld [vmem:[%s8667_s3 + $0x6] ss:$8 sm:$0xf] }
 0x331   :  { %1595 = vrot.lane.b32.xlu1 %v9393_v60, %s4043_s25  ;;  %1010 = vperm.xlu0 %3627, %v3984_v48   ;;  %9507 = vst [vmem:[#allocation111_spill] sm:$0xff] %v6504_v21  ;;  %v6506_v63 = vadd.f32 %v1295_v49, %v1079_v41  ;;  %v6508_v16 = vadd.f32 %v1293_v33, %v1077_v36  ;;  %v9512_v45 = vmov 7   ;;  %v9515_v62 = vld [vmem:[#allocation131_spill] sm:$0xff]  ;;  %v9519_v49 = vld [vmem:[#allocation136_spill] sm:$0xff]  ;;  %v9520_v33 = vld [vmem:[#allocation138_spill] sm:$0xff] }
 0x332   :  { %9506 = vst [vmem:[#allocation30_spill] sm:$0xff] %v6492_v17  ;;  %v6510_v58 = vadd.f32 %v1296_v46, %v1080_v47  ;;  %v6516_v55 = vrot.slane %v3985_v20, %v9435_v2  ;;  %3625 = vset.pattern.permute.xlu1 %v9512_v45  ;;  %v801_v53 = vmul.f32 %v9504_v13, %v737_v30  ;;  %v9521_v7 = vld [vmem:[#allocation134_spill] sm:$0xff]  ;;  %v9523_v36 = vld [vmem:[#allocation5_spill] sm:$0xff]  ;;  %v9525_v48 = vld [vmem:[#allocation151_spill] sm:$0xff] }
 0x333   :  { %9508 = vst [vmem:[#allocation52_spill] sm:$0xff] %v6506_v63  ;;  %9509 = vst [vmem:[#allocation14_spill] sm:$0xff] %v6508_v16  ;;  %v1165_v15 = vsel %vm1149_vm3, %v9514_v26, %v9513_v11  ;;  %v1173_v10 = vsel %vm1149_vm3, %v9515_v62, %v9514_v26  ;;  %v6529_v42 = vrot.slane %v3985_v20, %v5497_v24  ;;  %v6543_v56 = vpop.permute.xlu1 %2325  ;;  %v9557_v16 = vld [vmem:[#allocation150_spill] sm:$0xff]  ;;  %v9566_v23 = vld [vmem:[#allocation165_spill] sm:$0xff] }
 0x334   :  { %9510 = vst [vmem:[#allocation32_spill] sm:$0xff] %v6510_v58  ;;  %9511 = vst [vmem:[#allocation112_spill] sm:$0xff] %v6516_v55  ;;  %v6532_v39 = vadd.f32 %v802_v52, %v9517_v8  ;;  %v917_v46 = vsel %vm901_vm1, %v9520_v33, %v9519_v49  ;;  %v925_v41 = vsel %vm901_vm1, %v9521_v7, %v9520_v33  ;;  %v9556_v58 = vld [vmem:[#allocation159_spill] sm:$0xff] }
 0x335   :  { %9516 = vst [vmem:[#allocation107_spill] sm:$0xff] %v6529_v42  ;;  %v804_v30 = vmul.f32 %v9504_v13, %v740_v34  ;;  %9522 = vst [vmem:[#allocation36_spill] sm:$0xff] %v6543_v56  ;;  %v6546_v47 = vadd.f32 %v803_v18, %v9523_v36  ;;  %v1157_v52 = vsel %vm1149_vm3, %v9513_v11, %v9525_v48  ;;  %1627 = vrot.lane.b32.xlu1 %v9408_v54, %s4043_s25  ;;  %v6561_v13 = vld [vmem:[%s8666_s2 + $0x38] sm:$0xff]  ;;  %v6564_v34 = vpop.permute.xlu0 %2010  ;;  %v9527_v18 = vld [vmem:[#allocation142_spill] sm:$0xff]  ;;  %s4050_s2 = smov [#allocation2]  }
 0x336   :  { %9518 = vst [vmem:[#allocation110_spill] sm:$0xff] %v6532_v39  ;;  %v1181_v20 = vsel %vm1149_vm3, %v9525_v48, %v9515_v62  ;;  %1018 = vperm.xlu0 %3627, %v6561_v13   ;;  %9526 = vst [vmem:[#allocation233_spill] sm:$0xff] %v6564_v34  ;;  %v909_v45 = vsel %vm901_vm1, %v9519_v49, %v9527_v18  ;;  %v933_v11 = vsel %vm901_vm1, %v9527_v18, %v9521_v7  ;;  %v9530_v36 = vld [vmem:[#allocation243_spill] sm:$0xff]  ;;  %v9534_v39 = vld [vmem:[#allocation245_spill] sm:$0xff]  ;;  %s3459_s25 = sshll.u32 %s4050_s2, 4  ;;  %s3460_s25 = int_to_ptr.vmem [resolvable:$true] %s3459_s25 }
 0x337   :  { %9524 = vst [vmem:[#allocation238_spill] sm:$0xff] %v6546_v47  ;;  %v1234_v26 = vmul.f32 %v5594_v40, %v1173_v10  ;;  %v1235_v62 = vmul.f32 %v9312_v25, %v1165_v15  ;;  %v6577_v8 = vmul.f32 %v5545_v50, %v925_v41  ;;  %v6580_v33 = vmul.f32 %v9290_v37, %v917_v46  ;;  %v9532_v34 = vld [vmem:[#allocation147_spill] sm:$0xff]  ;;  %v9536_v40 = vld [vmem:[#allocation152_spill] sm:$0xff]  ;;  %v6598_v15 = vpop.permute.xlu1 %2327  ;;  %v9540_v41 = vld [vmem:[#allocation153_spill] sm:$0xff]  ;;  %p4014_p1 = scmp.lt.s32.totalorder %s3460_s25, %s3460_s25 }
 0x338   :  { %v6583_v48 = vadd.f32 %v801_v53, %v9530_v36  ;;  %v9533_v49 = vld [vmem:[#allocation39_spill] sm:$0xff]  ;;  %v6590_v7 = vadd.f32 %v804_v30, %v9534_v39  ;;  %v9537_v10 = vld [vmem:[#allocation144_spill] sm:$0xff]  ;;  %v1233_v25 = vmul.f32 %v5597_v6, %v1181_v20  ;;  %v1236_v37 = vmul.f32 %v9317_v4, %v1157_v52  ;;  %v9545_v52 = vld [vmem:[#allocation154_spill] sm:$0xff] }
 0x339   :  { %9528 = vst [vmem:[#allocation108_spill] sm:$0xff] %v6577_v8  ;;  %9529 = vst [vmem:[#allocation113_spill] sm:$0xff] %v6580_v33  ;;  %v1414_v47 = vsel %vm1397_vm4, %v9533_v49, %v9532_v34  ;;  %v1415_v50 = vsel %vm1397_vm4, %v9537_v10, %v9536_v40  ;;  %v6601_v53 = vmul.f32 %v5568_v22, %v933_v11  ;;  %v9541_v39 = vld [vmem:[#allocation139_spill] sm:$0xff]  ;;  %1841 = vrot.lane.b32.xlu1 %v9417_v31, %s4045_s13  ;;  %v9546_v20 = vld [vmem:[#allocation146_spill] sm:$0xff] }
 0x33a   :  { %9531 = vst [vmem:[#allocation106_spill] sm:$0xff] %v6583_v48  ;;  %9535 = vst [vmem:[#allocation34_spill] sm:$0xff] %v6590_v7  ;;  %v6604_v46 = vmul.f32 %v9302_v43, %v909_v45  ;;  %v1416_v30 = vsel %vm1397_vm4, %v9541_v39, %v9540_v41  ;;  %2091 = vrot.lane.b32.xlu0 %v9393_v60, %s4047_s18  ;;  %v6616_v6 = vmul.f32 %v6045_v51, %v1414_v47  ;;  %v9542_v22 = vld [vmem:[#allocation35_spill] sm:$0xff]  ;;  %v6628_v45 = vpop.permute.xlu0 %2234  ;;  %v9547_v36 = vld [vmem:[#allocation157_spill] sm:$0xff] }
 0x33b   :  { %9538 = vst [vmem:[#allocation115_spill] sm:$0xff] %v6601_v53  ;;  %v6619_v4 = vmul.f32 %v9542_v22, %v1234_v26  ;;  %v6622_v43 = vmul.f32 %v9542_v22, %v1235_v62  ;;  %v1417_v18 = vsel %vm1397_vm4, %v9546_v20, %v9545_v52  ;;  %v6631_v11 = vmul.f32 %v6045_v51, %v1415_v50  ;;  %v9548_v7 = vld [vmem:[#allocation148_spill] sm:$0xff]  ;;  %v9554_v8 = vld [vmem:[#allocation158_spill] sm:$0xff]  ;;  %v9555_v53 = vld [vmem:[#allocation145_spill] sm:$0xff]  ;;  %v6663_v21 = vpop.permute.xlu1 %2343 }
 0x33c   :  { %9539 = vst [vmem:[#allocation114_spill] sm:$0xff] %v6604_v46  ;;  %v1419_v47 = vsel %vm1397_vm4, %v9548_v7, %v9547_v36  ;;  %v9549_v26 = vld [vmem:[#allocation156_spill] sm:$0xff]  ;;  %v6651_v50 = vmul.f32 %v9542_v22, %v1233_v25  ;;  %v6654_v46 = vmul.f32 %v9542_v22, %v1236_v37  ;;  %v6657_v33 = vmul.f32 %v6045_v51, %v1416_v30  ;;  %v9558_v37 = vld [vmem:[#allocation161_spill] sm:$0xff]  ;;  %v9567_v63 = vld [vmem:[#allocation167_spill] sm:$0xff] }
 0x33d   :  { %9543 = vst [vmem:[#allocation124_spill] sm:$0xff] %v6619_v4  ;;  %9544 = vst [vmem:[#allocation116_spill] sm:$0xff] %v6622_v43  ;;  %v9550_v4 = vld [vmem:[#allocation143_spill] sm:$0xff]  ;;  %v1420_v35 = vsel %vm1397_vm4, %v9555_v53, %v9554_v8  ;;  %v6666_v56 = vmul.f32 %v6045_v51, %v1417_v18  ;;  %v1421_v25 = vsel %vm1397_vm4, %v9557_v16, %v9556_v58  ;;  %v9559_v22 = vld [vmem:[#allocation160_spill] sm:$0xff]  ;;  %1873 = vrot.lane.b32.xlu1 %v9427_v0, %s4045_s13 }
 0x33e   :  { %v1418_v62 = vsel %vm1397_vm4, %v9550_v4, %v9549_v26  ;;  %v6644_v43 = vld [vmem:[%s8667_s3 + $0x7] ss:$8 sm:$0xf]  ;;  %9552 = vst [vmem:[#allocation37_spill] sm:$0xff] %v6651_v50  ;;  %9553 = vst [vmem:[#allocation121_spill] sm:$0xff] %v6654_v46  ;;  %v1407_v30 = vsel %vm1397_vm4, %v9536_v40, %v9558_v37  ;;  %v1406_v46 = vsel %vm1397_vm4, %v9532_v34, %v9559_v22  ;;  %2123 = vrot.lane.b32.xlu0 %v9408_v54, %s4047_s18  ;;  %v6698_v34 = vpop.permute.xlu0 %2242 }
 0x33f   :  { %v6648_v48 = vrot.slane %v6644_v43, %v5497_v24  ;;  %v6683_v18 = vmul.f32 %v6045_v51, %v1419_v47  ;;  %v6686_v50 = vmul.f32 %v6045_v51, %v1418_v62  ;;  %v9561_v16 = vld [vmem:[#allocation164_spill] sm:$0xff]  ;;  %v9562_v40 = vld [vmem:[#allocation163_spill] sm:$0xff]  ;;  %9563 = vst [vmem:[#allocation126_spill] sm:$0xff] %v6698_v34  ;;  %v6701_v47 = vmul.f32 %v6045_v51, %v1420_v35  ;;  %v9565_v62 = vld [vmem:[#allocation166_spill] sm:$0xff] }
 0x340   :  { %v1409_v60 = vsel %vm1397_vm4, %v9545_v52, %v9561_v16  ;;  %v1408_v53 = vsel %vm1397_vm4, %v9540_v41, %v9562_v40  ;;  %v1411_v12 = vsel %vm1397_vm4, %v9547_v36, %v9565_v62  ;;  %v1410_v52 = vsel %vm1397_vm4, %v9549_v26, %v9566_v23  ;;  %v9569_v34 = vld [vmem:[#allocation91_spill] sm:$0xff] }
 0x341   :  { %9551 = vst [vmem:[#allocation118_spill] sm:$0xff] %v6648_v48  ;;  %9560 = vst [vmem:[#allocation117_spill] sm:$0xff] %v6683_v18  ;;  %v1412_v41 = vsel %vm1397_vm4, %v9554_v8, %v9567_v63  ;;  %v6717_v35 = vmul.f32 %v6045_v51, %v1421_v25  ;;  %v6720_v17 = vmul.f32 %v9569_v34, %v1407_v30  ;;  %v6729_v18 = vpop.permute.xlu1 %2359  ;;  %v9571_v51 = vld [vmem:[#allocation169_spill] sm:$0xff]  ;;  %2087 = vrot.lane.b32.xlu1 %v9442_v14, %s4047_s18  ;;  %v9573_v30 = vld [vmem:[#allocation170_spill] sm:$0xff] }
 0x342   :  { %9564 = vst [vmem:[#allocation17_spill] sm:$0xff] %v6701_v47  ;;  %v6723_v36 = vmul.f32 %v9569_v34, %v1406_v46  ;;  %v9570_v47 = vld [vmem:[#allocation168_spill] sm:$0xff]  ;;  %v6732_v8 = vmul.f32 %v9569_v34, %v1409_v60  ;;  %v6735_v63 = vmul.f32 %v9569_v34, %v1408_v53  ;;  %v1398_v25 = vsel %vm1397_vm4, %v9559_v22, %v9571_v51  ;;  %v6763_v14 = vpop.permute.xlu0 %2246 }
 0x343   :  { %9568 = vst [vmem:[#allocation234_spill] sm:$0xff] %v6717_v35  ;;  %v1413_v26 = vsel %vm1397_vm4, %v9556_v58, %v9570_v47  ;;  %v1422_v46 = vsel %vm1397_vm4, %v9571_v51, %v9533_v49  ;;  %v6748_v58 = vmul.f32 %v9569_v34, %v1411_v12  ;;  %v6751_v60 = vmul.f32 %v9569_v34, %v1410_v52  ;;  %v9576_v52 = vld [vmem:[#allocation171_spill] sm:$0xff]  ;;  %v9577_v51 = vld [vmem:[#allocation98_spill] sm:$0xff] }
 0x344   :  { %v6754_v53 = vmul.f32 %v9569_v34, %v1412_v41  ;;  %v1423_v22 = vsel %vm1397_vm4, %v9573_v30, %v9537_v10  ;;  %2337 = vrot.lane.b32.xlu0 %v9417_v31, %s4049_s1  ;;  %9574 = vst [vmem:[#allocation119_spill] sm:$0xff] %v6763_v14  ;;  %v6766_v12 = vmul.f32 %v9569_v34, %v1413_v26  ;;  %v9578_v26 = vld [vmem:[#allocation172_spill] sm:$0xff]  ;;  %v9580_v14 = vld [vmem:[#allocation183_spill] sm:$0xff] }
 0x345   :  { %v1399_v49 = vsel %vm1397_vm4, %v9558_v37, %v9573_v30  ;;  %v1400_v10 = vsel %vm1397_vm4, %v9562_v40, %v9576_v52  ;;  %v1424_v31 = vsel %vm1397_vm4, %v9576_v52, %v9541_v39  ;;  %v1453_v41 = vmul.f32 %v6266_v1, %v1422_v46  ;;  %v9579_v30 = vld [vmem:[#allocation185_spill] sm:$0xff]  ;;  %v6792_v47 = vpop.permute.xlu1 %2375  ;;  %2119 = vrot.lane.b32.xlu1 %v9460_v32, %s4047_s18  ;;  %v9585_v32 = vld [vmem:[#allocation175_spill] sm:$0xff] }
 0x346   :  { %9572 = vst [vmem:[#allocation239_spill] sm:$0xff] %v6754_v53  ;;  %9575 = vst [vmem:[#allocation123_spill] sm:$0xff] %v6766_v12  ;;  %v6782_v34 = vmul.f32 %v9577_v51, %v1398_v25  ;;  %v1425_v37 = vsel %vm1397_vm4, %v9578_v26, %v9546_v20  ;;  %v1663_v40 = vsel %vm1645_vm5, %v9580_v14, %v9579_v30  ;;  %v9582_v25 = vld [vmem:[#allocation174_spill] sm:$0xff]  ;;  %v9583_v20 = vld [vmem:[#allocation188_spill] sm:$0xff] }
 0x347   :  { %9581 = vst [vmem:[#allocation186_spill] sm:$0xff] %v6792_v47  ;;  %v1457_v12 = vmul.f32 %v6266_v1, %v1423_v22  ;;  %v1401_v39 = vsel %vm1397_vm4, %v9561_v16, %v9578_v26  ;;  %v1426_v46 = vsel %vm1397_vm4, %v9582_v25, %v9550_v4  ;;  %v1655_v52 = vsel %vm1645_vm5, %v9579_v30, %v9583_v20  ;;  %v6818_v4 = vpop.permute.xlu0 %2250  ;;  %v9586_v30 = vld [vmem:[#allocation215_spill] sm:$0xff] }
 0x348   :  { %v1460_v22 = vmul.f32 %v9577_v51, %v1399_v49  ;;  %v1461_v35 = vmul.f32 %v6266_v1, %v1424_v31  ;;  %v1464_v47 = vmul.f32 %v9577_v51, %v1400_v10  ;;  %v1402_v16 = vsel %vm1397_vm4, %v9566_v23, %v9582_v25  ;;  %2369 = vrot.lane.b32.xlu0 %v9427_v0, %s4049_s1  ;;  %v9587_v25 = vld [vmem:[#allocation213_spill] sm:$0xff] }
 0x349   :  { %9584 = vst [vmem:[#allocation31_spill] sm:$0xff] %v6818_v4  ;;  %v6821_v26 = vmul.f32 %v6266_v1, %v1425_v37  ;;  %v1403_v49 = vsel %vm1397_vm4, %v9565_v62, %v9585_v32  ;;  %v1427_v10 = vsel %vm1397_vm4, %v9585_v32, %v9548_v7  ;;  %v1705_v23 = vmul.f32 %v6486_v38, %v1663_v40  ;;  %v6843_v4 = vpop.permute.xlu1 %2574  ;;  %v9589_v7 = vld [vmem:[#allocation177_spill] sm:$0xff] }
 0x34a   :  { %v6833_v31 = vmul.f32 %v9577_v51, %v1401_v39  ;;  %v6836_v0 = vmul.f32 %v6266_v1, %v1426_v46  ;;  %v1706_v37 = vmul.f32 %v6497_v28, %v1655_v52  ;;  %v1911_v62 = vsel %vm1893_vm6, %v9587_v25, %v9586_v30  ;;  %9588 = vst [vmem:[#allocation22_spill] sm:$0xff] %v6843_v4  ;;  %v9590_v32 = vld [vmem:[#allocation217_spill] sm:$0xff] }
 0x34b   :  { %v6846_v53 = vmul.f32 %v9577_v51, %v1402_v16  ;;  %v1521_v40 = vmul.f32 %v9589_v7, %v1457_v12  ;;  %v1522_v39 = vmul.f32 %v9589_v7, %v6631_v11  ;;  %v1903_v46 = vsel %vm1893_vm6, %v9586_v30, %v9590_v32  ;;  %2258 = vperm.xlu1 %3625, %v6561_v13   ;;  %v3988_v11 = vld [vmem:[%s8667_s3 + $0x20] ss:$8 sm:$0xf] }
 0x34c   :  { %v6857_v52 = vmul.f32 %v6266_v1, %v1427_v10  ;;  %v6860_v4 = vmul.f32 %v9577_v51, %v1403_v49  ;;  %v6864_v16 = vrot.slane %v6644_v43, %v9435_v2  ;;  %v6870_v12 = vrot.slane %v3988_v11, %v5497_v24  ;;  %v3989_v13 = vld [vmem:[%s8668_s4 + $0x30] sm:$0xff]  ;;  %v6875_v10 = vpop.permute.xlu0 %2117  ;;  %v9595_v49 = vld [vmem:[#allocation181_spill] sm:$0xff]  ;;  %v9596_v1 = vld [vmem:[#allocation176_spill] sm:$0xff] }
 0x34d   :  { %2598 = vperm.xlu0 %3627, %v3989_v13   ;;  %9594 = vst [vmem:[#allocation122_spill] sm:$0xff] %v6875_v10  ;;  %v1769_v30 = vmul.f32 %v9595_v49, %v1705_v23  ;;  %v1953_v51 = vmul.f32 %v6516_v55, %v1911_v62  ;;  %v2159_v43 = vsel %vm2141_vm7, %v5949_v57, %v5988_v9  ;;  %v6896_v10 = vpop.permute.xlu1 %2578 }
 0x34e   :  { %9591 = vst [vmem:[#allocation26_spill] sm:$0xff] %v6860_v4  ;;  %9592 = vst [vmem:[#allocation130_spill] sm:$0xff] %v6864_v16  ;;  %v2151_v24 = vsel %vm2141_vm7, %v5988_v9, %v6018_v5  ;;  %v6888_v4 = vmul.f32 %v9596_v1, %v1453_v41  ;;  %v6892_v13 = vmul.f32 %v9596_v1, %v6616_v6  ;;  %v9600_v41 = vld [vmem:[#allocation225_spill] sm:$0xff] }
 0x34f   :  { %9593 = vst [vmem:[#allocation120_spill] sm:$0xff] %v6870_v12  ;;  %v1770_v23 = vmul.f32 %v9595_v49, %v1706_v37  ;;  %v1954_v62 = vmul.f32 %v6529_v42, %v1903_v46  ;;  %v6900_v57 = vmul.f32 %v9596_v1, %v6723_v36  ;;  %v1553_v25 = vadd.f32 %v1521_v40, %v5978_v29 }
 0x350   :  { %9597 = vst [vmem:[#allocation132_spill] sm:$0xff] %v6888_v4  ;;  %9598 = vst [vmem:[#allocation21_spill] sm:$0xff] %v6892_v13  ;;  %v1554_v9 = vadd.f32 %v1522_v39, %v5919_v19  ;;  %v2017_v4 = vmul.f32 %v9600_v41, %v1953_v51  ;;  %2349 = vrot.lane.b32.xlu1 %v9429_v3, %s4049_s1  ;;  %v2201_v37 = vmul.f32 %v6864_v16, %v2159_v43  ;;  %v6913_v36 = vpop.permute.xlu0 %2254  ;;  %v9604_v43 = vld [vmem:[#allocation179_spill] sm:$0xff]  ;;  %v9645_v13 = vld [vmem:[#allocation194_spill] sm:$0xff] }
 0x351   :  { %9599 = vst [vmem:[#allocation135_spill] sm:$0xff] %v6900_v57  ;;  %v2018_v6 = vmul.f32 %v9600_v41, %v1954_v62  ;;  %v2202_v46 = vmul.f32 %v6648_v48, %v2151_v24  ;;  %2371 = vrot.lane.b32.xlu0 %v9408_v54, %s4049_s1  ;;  %9601 = vst [vmem:[#allocation125_spill] sm:$0xff] %v6913_v36  ;;  %3626 = vset.pattern.permute.xlu1 %v9490_v44  ;;  %v9634_v36 = vld [vmem:[#allocation200_spill] sm:$0xff]  ;;  %v9644_v57 = vld [vmem:[#allocation141_spill] sm:$0xff] }
 0x352   :  { %v1523_v19 = vmul.f32 %v9589_v7, %v6720_v17  ;;  %v1801_v29 = vadd.f32 %v1769_v30, %v1553_v25  ;;  %v2407_v3 = vsel %vm2389_vm8, %v6598_v15, %v6663_v21  ;;  %v2399_v51 = vsel %vm2389_vm8, %v6663_v21, %v6729_v18  ;;  %v6931_v17 = vpop.permute.xlu1 %1591 }
 0x353   :  { %v1802_v40 = vadd.f32 %v1770_v23, %v1554_v9  ;;  %v6927_v54 = vrot.slane %v3988_v11, %v9435_v2  ;;  %v2265_v44 = vmul.f32 %v6628_v45, %v2201_v37  ;;  %v2266_v39 = vmul.f32 %v6628_v45, %v2202_v46  ;;  %9602 = vst [vmem:[#allocation24_spill] sm:$0xff] %v6931_v17 }
 0x354   :  { %v1524_v25 = vmul.f32 %v9589_v7, %v1460_v22  ;;  %v6936_v30 = vmul.f32 %v9596_v1, %v6782_v34  ;;  %v1525_v24 = vmul.f32 %v9604_v43, %v1461_v35  ;;  %v1528_v21 = vmul.f32 %v9604_v43, %v1464_v47  ;;  %2381 = vrot.lane.b32.xlu1 %v9450_v61, %s4049_s1  ;;  %v3990_v22 = vld [vmem:[%s8668_s4 + $0x38] sm:$0xff]  ;;  %v9605_v61 = vld [vmem:[#allocation190_spill] sm:$0xff] }
 0x355   :  { %v2049_v11 = vadd.f32 %v2017_v4, %v1801_v29  ;;  %v2050_v23 = vadd.f32 %v2018_v6, %v1802_v40  ;;  %v2449_v62 = vmul.f32 %v6927_v54, %v2407_v3  ;;  %v2450_v9 = vmul.f32 %v6870_v12, %v2399_v51  ;;  %2602 = vperm.xlu0 %3627, %v3990_v22   ;;  %v6958_v4 = vpop.permute.xlu0 %2482  ;;  %v9609_v3 = vld [vmem:[#allocation75_spill] sm:$0xff] }
 0x356   :  { %9603 = vst [vmem:[#allocation129_spill] sm:$0xff] %v6936_v30  ;;  %v1526_v1 = vmul.f32 %v9604_v43, %v6657_v33  ;;  %v1527_v47 = vmul.f32 %v9604_v43, %v6735_v63  ;;  %v6952_v35 = vadd.f32 %v1523_v19, %v5921_v27  ;;  %v1647_v34 = vsel %vm1645_vm5, %v9583_v20, %v9605_v61  ;;  %v6962_v33 = vpop.permute.xlu1 %1623  ;;  %v9607_v63 = vld [vmem:[#allocation189_spill] sm:$0xff]  ;;  %v9608_v27 = vld [vmem:[#allocation63_spill] sm:$0xff]  ;;  %v9610_v20 = vld [vmem:[#allocation68_spill] sm:$0xff] }
 0x357   :  { %v2297_v7 = vadd.f32 %v2265_v44, %v2049_v11  ;;  %v2298_v6 = vadd.f32 %v2266_v39, %v2050_v23  ;;  %v2513_v37 = vmul.f32 %v6958_v4, %v2449_v62  ;;  %v2514_v46 = vmul.f32 %v6958_v4, %v2450_v9  ;;  %9606 = vst [vmem:[#allocation240_spill] sm:$0xff] %v6962_v33  ;;  %v3991_v44 = vld [vmem:[%s8668_s4 + $0x20] sm:$0xff]  ;;  %v9614_v23 = vld [vmem:[#allocation127_spill] sm:$0xff]  ;;  %v9615_v9 = vld [vmem:[#allocation72_spill] sm:$0xff] }
 0x358   :  { %v1533_v29 = vmul.f32 %v9607_v63, %v6836_v0  ;;  %v6967_v19 = vadd.f32 %v1524_v25, %v9608_v27  ;;  %v6970_v51 = vadd.f32 %v1525_v24, %v9609_v3  ;;  %v6973_v40 = vadd.f32 %v1528_v21, %v9610_v20  ;;  %2590 = vperm.xlu1 %3626, %v3991_v44   ;;  %v9612_v21 = vld [vmem:[#allocation184_spill] sm:$0xff]  ;;  %v9616_v27 = vld [vmem:[#allocation62_spill] sm:$0xff]  ;;  %v9646_v33 = vld [vmem:[#allocation209_spill] sm:$0xff] }
 0x359   :  { %v1534_v39 = vmul.f32 %v9607_v63, %v6686_v50  ;;  %v1671_v0 = vsel %vm1645_vm5, %v9605_v61, %v9580_v14  ;;  %v2545_v25 = vadd.f32 %v2513_v37, %v2297_v7  ;;  %v2546_v43 = vadd.f32 %v2514_v46, %v2298_v6  ;;  %v6996_v3 = vpop.permute.xlu0 %2490  ;;  %v9623_v37 = vld [vmem:[#allocation71_spill] sm:$0xff]  ;;  %v9624_v46 = vld [vmem:[#allocation92_spill] sm:$0xff]  ;;  %v9625_v44 = vld [vmem:[#allocation162_spill] sm:$0xff] }
 0x35a   :  { %v9611_v24 = vmov 2   ;;  %v6987_v11 = vmul.f32 %v9612_v21, %v6821_v26  ;;  %v1707_v62 = vmul.f32 %v9614_v23, %v1647_v34  ;;  %v6991_v22 = vadd.f32 %v1526_v1, %v9615_v9  ;;  %9617 = vst [vmem:[#allocation236_spill] sm:$0xff] %v6996_v3  ;;  %v7006_v26 = vpop.permute.xlu1 %1762  ;;  %v9628_v9 = vld [vmem:[#allocation191_spill] sm:$0xff] }
 0x35b   :  { %3628 = vset.pattern.permute.xlu0 %v9611_v24  ;;  %v6994_v50 = vadd.f32 %v1527_v47, %v9616_v27  ;;  %v7000_v14 = vmul.f32 %v9612_v21, %v6666_v56  ;;  %v7004_v61 = vmul.f32 %v9612_v21, %v6732_v8  ;;  %9620 = vst [vmem:[#allocation33_spill] sm:$0xff] %v7006_v26  ;;  %v9622_v8 = vld [vmem:[#allocation128_spill] sm:$0xff] }
 0x35c   :  { %9613 = vst [vmem:[#allocation237_spill] sm:$0xff] %v6987_v11  ;;  %v7009_v34 = vadd.f32 %v6896_v10, %v2545_v25  ;;  %v7012_v1 = vadd.f32 %v6896_v10, %v2546_v43  ;;  %v7016_v47 = vmul.f32 %v9612_v21, %v6833_v31  ;;  %v1535_v56 = vmul.f32 %v9607_v63, %v6751_v60  ;;  %v9627_v21 = vld [vmem:[#allocation193_spill] sm:$0xff] }
 0x35d   :  { %9618 = vst [vmem:[#allocation241_spill] sm:$0xff] %v7000_v14  ;;  %9619 = vst [vmem:[#allocation137_spill] sm:$0xff] %v7004_v61  ;;  %v1536_v7 = vmul.f32 %v9607_v63, %v6846_v53  ;;  %v1708_v6 = vmul.f32 %v9622_v8, %v1671_v0  ;;  %1859 = vrot.lane.b32.xlu1 %v9623_v37, %s4045_s13  ;;  %v7026_v20 = vadd.f32 %v1533_v29, %v9624_v46  ;;  %v9629_v63 = vld [vmem:[#allocation195_spill] sm:$0xff]  ;;  %v9630_v0 = vld [vmem:[#allocation197_spill] sm:$0xff]  ;;  %v7046_v27 = vpop.permute.xlu0 %2494 }
 0x35e   :  { %9621 = vst [vmem:[#allocation15_spill] sm:$0xff] %v7016_v47  ;;  %v7029_v25 = vadd.f32 %v1534_v39, %v9625_v44  ;;  %v3525_v31 = vmul.f32 -1.442695, %v7009_v34  ;;  %v3526_v43 = vmul.f32 -1.442695, %v7012_v1  ;;  %v1771_v60 = vmul.f32 %v9595_v49, %v1707_v62  ;;  %9631 = vst [vmem:[#allocation149_spill] sm:$0xff] %v7046_v27  ;;  %v7060_v26 = vpop.permute.xlu1 %1853 }
 0x35f   :  { %v1662_v53 = vsel %vm1645_vm5, %v9628_v9, %v9627_v21  ;;  %v1654_v29 = vsel %vm1645_vm5, %v9627_v21, %v9629_v63  ;;  %v1646_v39 = vsel %vm1645_vm5, %v9629_v63, %v9630_v0  ;;  %v1670_v62 = vsel %vm1645_vm5, %v9630_v0, %v9628_v9  ;;  %v9632_v46 = vld [vmem:[#allocation198_spill] sm:$0xff]  ;;  %v9633_v44 = vld [vmem:[#allocation196_spill] sm:$0xff]  ;;  %9635 = vst [vmem:[#allocation131_spill] sm:$0xff] %v7060_v26  ;;  %v9639_v61 = vld [vmem:[#allocation207_spill] sm:$0xff] }
 0x360   :  { %9626 = vst [vmem:[#allocation133_spill] sm:$0xff] %v7029_v25  ;;  %v1910_v2 = vsel %vm1893_vm6, %v9633_v44, %v9632_v46  ;;  %v1902_v21 = vsel %vm1893_vm6, %v9632_v46, %v9634_v36  ;;  %3765 = vpow2.f32 %v3525_v31  ;;  %v1772_v63 = vmul.f32 %v9595_v49, %v1708_v6  ;;  %v9636_v27 = vld [vmem:[#allocation202_spill] sm:$0xff]  ;;  %v9638_v6 = vld [vmem:[#allocation192_spill] sm:$0xff] }
 0x361   :  { %v1894_v9 = vsel %vm1893_vm6, %v9634_v36, %v9636_v27  ;;  %v1918_v0 = vsel %vm1893_vm6, %v9636_v27, %v9633_v44  ;;  %v9637_v47 = vld [vmem:[#allocation74_spill] sm:$0xff]  ;;  %3767 = vpow2.f32 %v3526_v43  ;;  %v1701_v46 = vmul.f32 %v6486_v38, %v1662_v53  ;;  %v9640_v44 = vld [vmem:[#allocation89_spill] sm:$0xff]  ;;  %v7086_v43 = vpop.permute.xlu0 %2363  ;;  %v9643_v53 = vld [vmem:[#allocation140_spill] sm:$0xff] }
 0x362   :  { %1891 = vrot.lane.b32.xlu1 %v9637_v47, %s4045_s13  ;;  %v1702_v31 = vmul.f32 %v6497_v28, %v1654_v29  ;;  %v1703_v49 = vmul.f32 %v9614_v23, %v1646_v39  ;;  %v1664_v36 = vsel %vm1645_vm5, %v9639_v61, %v9638_v6  ;;  %v1704_v14 = vmul.f32 %v9622_v8, %v1670_v62  ;;  %v7098_v62 = vpop.permute.xlu1 %1885 }
 0x363   :  { %v1949_v11 = vmul.f32 %v6516_v55, %v1910_v2  ;;  %v1950_v27 = vmul.f32 %v6529_v42, %v1902_v21  ;;  %v7084_v30 = vadd.f32 %v1535_v56, %v9640_v44  ;;  %9642 = vst [vmem:[#allocation136_spill] sm:$0xff] %v7086_v43  ;;  %v1951_v29 = vmul.f32 %v9643_v53, %v1894_v9  ;;  %v9651_v43 = vld [vmem:[#allocation180_spill] sm:$0xff] }
 0x364   :  { %v1952_v39 = vmul.f32 %v9644_v57, %v1918_v0  ;;  %v1672_v3 = vsel %vm1645_vm5, %v9645_v13, %v9639_v61  ;;  %v1656_v2 = vsel %vm1645_vm5, %v9638_v6, %v9646_v33  ;;  %9647 = vst [vmem:[#allocation138_spill] sm:$0xff] %v7098_v62  ;;  %v7101_v56 = vadd.f32 %v1771_v60, %v6952_v35  ;;  %v9648_v0 = vld [vmem:[#allocation101_spill] sm:$0xff]  ;;  %v9650_v61 = vld [vmem:[#allocation55_spill] sm:$0xff] }
 0x365   :  { %9641 = vst [vmem:[#allocation244_spill] sm:$0xff] %v7084_v30  ;;  %v1709_v21 = vmul.f32 %v6486_v38, %v1664_v36  ;;  %v1648_v9 = vsel %vm1645_vm5, %v9646_v33, %v9645_v13  ;;  %v7109_v44 = vadd.f32 %v1536_v7, %v9648_v0  ;;  %v7114_v6 = vadd.f32 %v1772_v63, %v6967_v19  ;;  %v9656_v33 = vld [vmem:[#allocation187_spill] sm:$0xff]  ;;  %v7133_v63 = vpop.permute.xlu0 %2498 }
 0x366   :  { %2105 = vrot.lane.b32.xlu1 %v9650_v61, %s4047_s18  ;;  %v7117_v62 = vmul.f32 %v9651_v43, %v1701_v46  ;;  %v7120_v35 = vmul.f32 %v9651_v43, %v1702_v31  ;;  %v7123_v60 = vmul.f32 %v9651_v43, %v1703_v49  ;;  %v7126_v13 = vmul.f32 %v9651_v43, %v1704_v14  ;;  %v7145_v43 = vpop.permute.xlu1 %2083 }
 0x367   :  { %9649 = vst [vmem:[#allocation134_spill] sm:$0xff] %v7109_v44  ;;  %v7129_v7 = vmul.f32 %v9656_v33, %v1949_v11  ;;  %v1712_v36 = vmul.f32 %v9622_v8, %v1672_v3  ;;  %v1710_v19 = vmul.f32 %v6497_v28, %v1656_v2  ;;  %9658 = vst [vmem:[#allocation39_spill] sm:$0xff] %v7133_v63  ;;  %v9663_v11 = vld [vmem:[#allocation204_spill] sm:$0xff]  ;;  %v9665_v2 = vld [vmem:[#allocation182_spill] sm:$0xff] }
 0x368   :  { %9652 = vst [vmem:[#allocation5_spill] sm:$0xff] %v7117_v62  ;;  %9653 = vst [vmem:[#allocation151_spill] sm:$0xff] %v7120_v35  ;;  %v7136_v46 = vmul.f32 %v9656_v33, %v1950_v27  ;;  %v7139_v31 = vmul.f32 %v9656_v33, %v1951_v29  ;;  %v7142_v49 = vmul.f32 %v9656_v33, %v1952_v39  ;;  %v9666_v63 = vld [vmem:[#allocation214_spill] sm:$0xff]  ;;  %v9668_v29 = vld [vmem:[#allocation219_spill] sm:$0xff] }
 0x369   :  { %9654 = vst [vmem:[#allocation142_spill] sm:$0xff] %v7123_v60  ;;  %9655 = vst [vmem:[#allocation243_spill] sm:$0xff] %v7126_v13  ;;  %v1711_v14 = vmul.f32 %v9614_v23, %v1648_v9  ;;  %v7149_v3 = vmul.f32 %v9663_v11, %v6857_v52  ;;  %v1773_v0 = vmul.f32 %v9665_v2, %v1709_v21  ;;  %v9669_v9 = vld [vmem:[#allocation58_spill] sm:$0xff] }
 0x36a   :  { %9657 = vst [vmem:[#allocation147_spill] sm:$0xff] %v7129_v7  ;;  %9659 = vst [vmem:[#allocation245_spill] sm:$0xff] %v7136_v46  ;;  %v9667_v7 = vld [vmem:[#allocation212_spill] sm:$0xff]  ;;  %v1895_v39 = vsel %vm1893_vm6, %v9590_v32, %v9668_v29  ;;  %2137 = vrot.lane.b32.xlu1 %v9669_v9, %s4047_s18  ;;  %v3766_v33 = vpop.eup %3765  ;;  %v9670_v46 = vld [vmem:[#allocation117_spill] sm:$0xff]  ;;  %v7168_v21 = vmul.f32 %v9663_v11, %v6748_v58  ;;  %v1774_v58 = vmul.f32 %v9665_v2, %v1710_v19  ;;  %v7189_v17 = vpop.permute.xlu1 %2099 }
 0x36b   :  { %9660 = vst [vmem:[#allocation152_spill] sm:$0xff] %v7139_v31  ;;  %9661 = vst [vmem:[#allocation144_spill] sm:$0xff] %v7142_v49  ;;  %v2150_v27 = vsel %vm2141_vm7, %v9667_v7, %v9666_v63  ;;  %v7164_v52 = vmul.f32 %v9663_v11, %v9670_v46  ;;  %v9673_v49 = vld [vmem:[#allocation216_spill] sm:$0xff]  ;;  %v3768_v13 = vpop.eup %3767  ;;  %v9675_v60 = vld [vmem:[#allocation26_spill] sm:$0xff]  ;;  %v1776_v46 = vmul.f32 %v9665_v2, %v1712_v36 }
 0x36c   :  { %9662 = vst [vmem:[#allocation153_spill] sm:$0xff] %v7145_v43  ;;  %9664 = vst [vmem:[#allocation139_spill] sm:$0xff] %v7149_v3  ;;  %v2142_v31 = vsel %vm2141_vm7, %v9666_v63, %v9673_v49  ;;  %v9674_v3 = vld [vmem:[#allocation213_spill] sm:$0xff]  ;;  %v7180_v35 = vmul.f32 %v9663_v11, %v9675_v60  ;;  %v1775_v62 = vmul.f32 %v9665_v2, %v1711_v14  ;;  %v9679_v60 = vld [vmem:[#allocation155_spill] sm:$0xff] }
 0x36d   :  { %9671 = vst [vmem:[#allocation35_spill] sm:$0xff] %v7164_v52  ;;  %9672 = vst [vmem:[#allocation154_spill] sm:$0xff] %v7168_v21  ;;  %v1919_v32 = vsel %vm1893_vm6, %v9668_v29, %v9674_v3  ;;  %v7184_v21 = vpop.permute.xlu0 %1611  ;;  %v2737_v52 = vadd.f32 1.0, %v3766_v33  ;;  %v2198_v63 = vmul.f32 %v6648_v48, %v2150_v27  ;;  %v1955_v43 = vmul.f32 %v9643_v53, %v1895_v39  ;;  %v9680_v19 = vld [vmem:[#allocation41_spill] sm:$0xff]  ;;  %v9681_v2 = vld [vmem:[#allocation203_spill] sm:$0xff] }
 0x36e   :  { %9676 = vst [vmem:[#allocation146_spill] sm:$0xff] %v7180_v35  ;;  %9677 = vst [vmem:[#allocation157_spill] sm:$0xff] %v7184_v21  ;;  %v2738_v3 = vadd.f32 1.0, %v3768_v13  ;;  %v7192_v29 = vadd.f32 %v1773_v0, %v6970_v51  ;;  %v2199_v11 = vmul.f32 %v9679_v60, %v2142_v31  ;;  %v1956_v36 = vmul.f32 %v9644_v57, %v1919_v32  ;;  %v9682_v27 = vld [vmem:[#allocation242_spill] sm:$0xff]  ;;  %v9684_v33 = vld [vmem:[#allocation17_spill] sm:$0xff] }
 0x36f   :  { %9678 = vst [vmem:[#allocation148_spill] sm:$0xff] %v7189_v17  ;;  %2351 = vrot.lane.b32.xlu1 %v9680_v19, %s4049_s1  ;;  %3769 = vrcp.f32 %v2737_v52  ;;  %v2019_v14 = vmul.f32 %v9600_v41, %v1955_v43  ;;  %v1665_v39 = vsel %vm1645_vm5, %v9682_v27, %v9681_v2  ;;  %v9683_v13 = vld [vmem:[#allocation206_spill] sm:$0xff]  ;;  %v7208_v31 = vadd.f32 %v1776_v46, %v6973_v40  ;;  %v9685_v52 = vld [vmem:[#allocation228_spill] sm:$0xff]  ;;  %v9686_v43 = vld [vmem:[#allocation9_spill] sm:$0xff] }
 0x370   :  { %v1673_v51 = vsel %vm1645_vm5, %v9683_v13, %v9682_v27  ;;  %3771 = vrcp.f32 %v2738_v3  ;;  %v2020_v0 = vmul.f32 %v9600_v41, %v1956_v36  ;;  %v1542_v32 = vmul.f32 %v9685_v52, %v9684_v33  ;;  %v9687_v19 = vld [vmem:[#allocation208_spill] sm:$0xff]  ;;  %v9689_v40 = vld [vmem:[#allocation201_spill] sm:$0xff]  ;;  %v9691_v41 = vld [vmem:[#allocation239_spill] sm:$0xff]  ;;  %v7230_v27 = vpop.permute.xlu1 %2131 }
 0x371   :  { %v1912_v35 = vsel %vm1893_vm6, %v9687_v19, %v9686_v43  ;;  %v7217_v21 = vpop.permute.xlu0 %1643  ;;  %v7220_v17 = vadd.f32 %v1774_v58, %v6991_v22  ;;  %v7223_v3 = vadd.f32 %v1775_v62, %v6994_v50  ;;  %v7226_v46 = vmul.f32 %v9689_v40, %v2198_v63  ;;  %9692 = vst [vmem:[#allocation158_spill] sm:$0xff] %v7230_v27  ;;  %v9693_v44 = vld [vmem:[#allocation210_spill] sm:$0xff]  ;;  %v9695_v62 = vld [vmem:[#allocation43_spill] sm:$0xff] }
 0x372   :  { %9688 = vst [vmem:[#allocation156_spill] sm:$0xff] %v7217_v21  ;;  %v1543_v36 = vmul.f32 %v9685_v52, %v9691_v41  ;;  %v1713_v33 = vmul.f32 %v6486_v38, %v1665_v39  ;;  %v1716_v26 = vmul.f32 %v9622_v8, %v1673_v51  ;;  %v1904_v22 = vsel %vm1893_vm6, %v9686_v43, %v9693_v44  ;;  %v9694_v58 = vld [vmem:[#allocation70_spill] sm:$0xff]  ;;  %v9697_v41 = vld [vmem:[#allocation25_spill] sm:$0xff]  ;;  %v9698_v21 = vld [vmem:[#allocation8_spill] sm:$0xff] }
 0x373   :  { %9690 = vst [vmem:[#allocation143_spill] sm:$0xff] %v7226_v46  ;;  %v2143_v50 = vsel %vm2141_vm7, %v6018_v5, %v9694_v58  ;;  %2383 = vrot.lane.b32.xlu1 %v9695_v62, %s4049_s1  ;;  %v7245_v63 = vmul.f32 %v9689_v40, %v2199_v11  ;;  %v2051_v39 = vadd.f32 %v2019_v14, %v7101_v56  ;;  %v9699_v62 = vld [vmem:[#allocation186_spill] sm:$0xff]  ;;  %v9705_v27 = vld [vmem:[#allocation199_spill] sm:$0xff] }
 0x374   :  { %v1957_v51 = vmul.f32 %v6516_v55, %v1912_v35  ;;  %v2167_v43 = vsel %vm2141_vm7, %v9694_v58, %v9697_v41  ;;  %v2052_v46 = vadd.f32 %v2020_v0, %v7114_v6  ;;  %v1657_v5 = vsel %vm1645_vm5, %v9681_v2, %v9698_v21  ;;  %v9701_v35 = vld [vmem:[#allocation30_spill] sm:$0xff]  ;;  %v2330_v2 = vpop.permute.xlu1 %2329  ;;  %v9703_v0 = vld [vmem:[#allocation52_spill] sm:$0xff] }
 0x375   :  { %9696 = vst [vmem:[#allocation159_spill] sm:$0xff] %v7245_v63  ;;  %v2391_v11 = vsel %vm2389_vm8, %v6729_v18, %v9699_v62  ;;  %v7262_v56 = vpop.permute.xlu0 %1857  ;;  %v7265_v14 = vadd.f32 %v1542_v32, %v9701_v35  ;;  %v1958_v63 = vmul.f32 %v6529_v42, %v1904_v22  ;;  %v2203_v58 = vmul.f32 %v9679_v60, %v2143_v50  ;;  %v9708_v22 = vld [vmem:[#allocation173_spill] sm:$0xff]  ;;  %v9710_v35 = vld [vmem:[#allocation178_spill] sm:$0xff]  ;;  %v9716_v42 = vld [vmem:[#allocation51_spill] sm:$0xff] }
 0x376   :  { %9700 = vst [vmem:[#allocation161_spill] sm:$0xff] %v7262_v56  ;;  %v2415_v6 = vsel %vm2389_vm8, %v9699_v62, %v6598_v15  ;;  %v7274_v41 = vadd.f32 %v1543_v36, %v9703_v0  ;;  %v7277_v18 = vmul.f32 %v9705_v27, %v1713_v33  ;;  %v7280_v56 = vmul.f32 %v9705_v27, %v1716_v26  ;;  %v3992_v15 = vld [vmem:[%s8668_s4 + $0x28] sm:$0xff]  ;;  %v9709_v33 = vld [vmem:[#allocation235_spill] sm:$0xff] }
 0x377   :  { %9702 = vst [vmem:[#allocation160_spill] sm:$0xff] %v7265_v14  ;;  %v1649_v32 = vsel %vm1645_vm5, %v9698_v21, %v9683_v13  ;;  %v2204_v50 = vmul.f32 %v9708_v22, %v2167_v43  ;;  %2594 = vperm.xlu1 %3626, %v3992_v15   ;;  %v7291_v36 = vmul.f32 %v6497_v28, %v1657_v5  ;;  %v9712_v13 = vld [vmem:[#allocation19_spill] sm:$0xff]  ;;  %v9713_v43 = vld [vmem:[#allocation230_spill] sm:$0xff] }
 0x378   :  { %9704 = vst [vmem:[#allocation164_spill] sm:$0xff] %v7274_v41  ;;  %9706 = vst [vmem:[#allocation163_spill] sm:$0xff] %v7277_v18  ;;  %v2021_v62 = vmul.f32 %v9709_v33, %v1957_v51  ;;  %v2267_v26 = vmul.f32 %v6628_v45, %v2203_v58  ;;  %v2451_v0 = vmul.f32 %v9710_v35, %v2391_v11  ;;  %v9711_v18 = vld [vmem:[#allocation20_spill] sm:$0xff]  ;;  %v9714_v41 = vld [vmem:[#allocation205_spill] sm:$0xff]  ;;  %v2346_v30 = vpop.permute.xlu1 %2345 }
 0x379   :  { %9707 = vst [vmem:[#allocation166_spill] sm:$0xff] %v7280_v56  ;;  %v3770_v56 = vpop.eup %3769  ;;  %v1896_v21 = vsel %vm1893_vm6, %v9693_v44, %v9711_v18  ;;  %v2160_v15 = vsel %vm2141_vm7, %v9713_v43, %v9712_v13  ;;  %v2268_v5 = vmul.f32 %v6628_v45, %v2204_v50  ;;  %v2452_v14 = vmul.f32 %v9714_v41, %v2415_v6  ;;  %v7306_v51 = vpop.permute.xlu0 %1889 }
 0x37a   :  { %9715 = vst [vmem:[#allocation165_spill] sm:$0xff] %v7306_v51  ;;  %v3772_v58 = vpop.eup %3771  ;;  %v2022_v11 = vmul.f32 %v9709_v33, %v1958_v63  ;;  %v2152_v55 = vsel %vm2141_vm7, %v9712_v13, %v9716_v42  ;;  %v2515_v44 = vmul.f32 %v6958_v4, %v2451_v0  ;;  %v7315_v25 = vmul.f32 %v3770_v56, %v7009_v34  ;;  %v9719_v13 = vld [vmem:[#allocation23_spill] sm:$0xff]  ;;  %v9777_v51 = vld [vmem:[#allocation138_spill] sm:$0xff] }
 0x37b   :  { %v1920_v45 = vsel %vm1893_vm6, %v9711_v18, %v9687_v19  ;;  %v2516_v6 = vmul.f32 %v6958_v4, %v2452_v14  ;;  %v2408_v63 = vsel %vm2389_vm8, %v2330_v2, %v2346_v30  ;;  %2107 = vrot.lane.b32.xlu1 %v9623_v37, %s4047_s18  ;;  %v7327_v50 = vmul.f32 %v3772_v58, %v7012_v1  ;;  %v9720_v14 = vld [vmem:[#allocation232_spill] sm:$0xff] }
 0x37c   :  { %9717 = vst [vmem:[#allocation91_spill] sm:$0xff] %v7315_v25  ;;  %v1959_v0 = vmul.f32 %v9643_v53, %v1896_v21  ;;  %v2205_v34 = vmul.f32 %v6864_v16, %v2160_v15  ;;  %v2299_v56 = vadd.f32 %v2267_v26, %v2051_v39  ;;  %v2400_v19 = vsel %vm2389_vm8, %v2346_v30, %v9719_v13 }
 0x37d   :  { %9718 = vst [vmem:[#allocation169_spill] sm:$0xff] %v7327_v50  ;;  %3629 = vset.pattern.permute.xlu1 %v9611_v24  ;;  %v2206_v4 = vmul.f32 %v6648_v48, %v2152_v55  ;;  %v2144_v18 = vsel %vm2141_vm7, %v9716_v42, %v9720_v14  ;;  %v2300_v1 = vadd.f32 %v2268_v5, %v2052_v46  ;;  %v7340_v58 = vpop.permute.xlu0 %2103  ;;  %v2378_v24 = vpop.permute.xlu1 %2377 }
 0x37e   :  { %9721 = vst [vmem:[#allocation170_spill] sm:$0xff] %v7340_v58  ;;  %v2864_v21 = vadd.f32 %v7327_v50, %v7315_v25  ;;  %v1960_v39 = vmul.f32 %v9644_v57, %v1920_v45  ;;  %v2168_v30 = vsel %vm2141_vm7, %v9720_v14, %v9713_v43  ;;  %v2453_v55 = vmul.f32 %v6927_v54, %v2408_v63  ;;  %v9722_v45 = vld [vmem:[#allocation221_spill] sm:$0xff] }
 0x37f   :  { %v2547_v26 = vadd.f32 %v2515_v44, %v2299_v56  ;;  %v2454_v15 = vmul.f32 %v6870_v12, %v2400_v19  ;;  %v2392_v42 = vsel %vm2389_vm8, %v9719_v13, %v2378_v24  ;;  %2139 = vrot.lane.b32.xlu1 %v9637_v47, %s4047_s18  ;;  %v2548_v46 = vadd.f32 %v2516_v6, %v2300_v1  ;;  %v9724_v6 = vld [vmem:[#allocation79_spill] sm:$0xff]  ;;  %v9753_v25 = vld [vmem:[#allocation29_spill] sm:$0xff] }
 0x380   :  { %2865 = vadd.xlane.f32.xlu0 %v2864_v21  ;;  %v7357_v5 = vmul.f32 %v9614_v23, %v1649_v32  ;;  %v2269_v43 = vmul.f32 %v9722_v45, %v2205_v34  ;;  %v2207_v63 = vmul.f32 %v9679_v60, %v2144_v18  ;;  %v2416_v44 = vsel %vm2389_vm8, %v2378_v24, %v2330_v2  ;;  %v9726_v24 = vld [vmem:[#allocation145_spill] sm:$0xff] }
 0x381   :  { %v2053_v56 = vadd.f32 %v2021_v62, %v7192_v29  ;;  %v2023_v19 = vmul.f32 %v9709_v33, %v1959_v0  ;;  %v2270_v13 = vmul.f32 %v9722_v45, %v2206_v4  ;;  %v2208_v14 = vmul.f32 %v9708_v22, %v2168_v30  ;;  %v7367_v21 = vpop.permute.xlu0 %2135  ;;  %v7372_v18 = vpop.permute.xlu1 %2582  ;;  %v9725_v4 = vld [vmem:[#allocation60_spill] sm:$0xff] }
 0x382   :  { %9723 = vst [vmem:[#allocation171_spill] sm:$0xff] %v7367_v21  ;;  %v2024_v32 = vmul.f32 %v9709_v33, %v1960_v39  ;;  %v2517_v1 = vmul.f32 %v9724_v6, %v2453_v55  ;;  %v2455_v34 = vmul.f32 %v9710_v35, %v2392_v42  ;;  %v7375_v2 = vadd.f32 %v6896_v10, %v2547_v26 }
 0x383   :  { %v2054_v29 = vadd.f32 %v2022_v11, %v7220_v17  ;;  %v2518_v62 = vmul.f32 %v9724_v6, %v2454_v15  ;;  %v2456_v0 = vmul.f32 %v9714_v41, %v2416_v44  ;;  %2353 = vrot.lane.b32.xlu1 %v9650_v61, %s4049_s1  ;;  %v7383_v33 = vadd.f32 %v6896_v10, %v2548_v46  ;;  %v9727_v61 = vld [vmem:[#allocation65_spill] sm:$0xff]  ;;  %v9730_v44 = vld [vmem:[#allocation48_spill] sm:$0xff] }
 0x384   :  { %v2158_v39 = vsel %vm2141_vm7, %v9725_v4, %v9667_v7  ;;  %v2166_v17 = vsel %vm2141_vm7, %v9673_v49, %v9725_v4  ;;  %v2301_v11 = vadd.f32 %v2269_v43, %v2053_v56  ;;  %v2271_v30 = vmul.f32 %v9722_v45, %v2207_v63  ;;  %v9734_v4 = vld [vmem:[#allocation220_spill] sm:$0xff] }
 0x385   :  { %v2055_v55 = vadd.f32 %v2023_v19, %v7223_v3  ;;  %v1428_v10 = vsel %vm1397_vm4, %v9727_v61, %v9726_v24  ;;  %v2302_v26 = vadd.f32 %v2270_v13, %v2054_v29  ;;  %v2272_v15 = vmul.f32 %v9722_v45, %v2208_v14  ;;  %v7400_v42 = vpop.permute.xlu0 %2333  ;;  %v7404_v43 = vpop.permute.xlu1 %1395  ;;  %v9729_v3 = vld [vmem:[#allocation16_spill] sm:$0xff] }
 0x386   :  { %9728 = vst [vmem:[#allocation172_spill] sm:$0xff] %v7400_v42  ;;  %v2056_v7 = vadd.f32 %v2024_v32, %v7208_v31  ;;  %v2549_v46 = vadd.f32 %v2517_v1, %v2301_v11  ;;  %v2519_v49 = vmul.f32 %v9724_v6, %v2455_v34  ;;  %v3527_v63 = vmul.f32 -1.442695, %v7375_v2  ;;  %v9731_v45 = vld [vmem:[#allocation28_spill] sm:$0xff]  ;;  %v9732_v32 = vld [vmem:[#allocation167_spill] sm:$0xff] }
 0x387   :  { %v2398_v56 = vsel %vm2389_vm8, %v9730_v44, %v9729_v3  ;;  %v2550_v19 = vadd.f32 %v2518_v62, %v2302_v26  ;;  %v2520_v13 = vmul.f32 %v9724_v6, %v2456_v0  ;;  %2385 = vrot.lane.b32.xlu1 %v9669_v9, %s4049_s1  ;;  %v3528_v31 = vmul.f32 -1.442695, %v7383_v33  ;;  %v9733_v34 = vld [vmem:[#allocation99_spill] sm:$0xff]  ;;  %v9735_v6 = vld [vmem:[#allocation82_spill] sm:$0xff]  ;;  %v9737_v24 = vld [vmem:[#allocation80_spill] sm:$0xff] }
 0x388   :  { %v2390_v14 = vsel %vm2389_vm8, %v9729_v3, %v9731_v45  ;;  %v1404_v1 = vsel %vm1397_vm4, %v9732_v32, %v9727_v61  ;;  %v1477_v29 = vmul.f32 %v9733_v34, %v1428_v10  ;;  %v2303_v62 = vadd.f32 %v2271_v30, %v2055_v55  ;;  %v9736_v0 = vld [vmem:[#allocation218_spill] sm:$0xff] }
 0x389   :  { %v1658_v9 = vsel %vm1645_vm5, %v9735_v6, %v9734_v4  ;;  %v1666_v11 = vsel %vm1645_vm5, %v9736_v0, %v9735_v6  ;;  %v1650_v26 = vsel %vm1645_vm5, %v9734_v4, %v9737_v24  ;;  %v2304_v3 = vadd.f32 %v2272_v15, %v2056_v7  ;;  %v7436_v61 = vpop.permute.xlu0 %2365  ;;  %v7442_v10 = vpop.permute.xlu1 %1609  ;;  %v9739_v4 = vld [vmem:[#allocation61_spill] sm:$0xff] }
 0x38a   :  { %9738 = vst [vmem:[#allocation185_spill] sm:$0xff] %v7436_v61  ;;  %v1674_v30 = vsel %vm1645_vm5, %v9737_v24, %v9736_v0  ;;  %v2551_v55 = vadd.f32 %v2519_v49, %v2303_v62  ;;  %v7445_v32 = vadd.f32 %v7372_v18, %v2549_v46  ;;  %3773 = vpow2.f32 %v3527_v63  ;;  %v9740_v62 = vld [vmem:[#allocation98_spill] sm:$0xff]  ;;  %v9763_v61 = vld [vmem:[#allocation244_spill] sm:$0xff] }
 0x38b   :  { %v2197_v6 = vmul.f32 %v6864_v16, %v2158_v39  ;;  %v2552_v50 = vadd.f32 %v2520_v13, %v2304_v3  ;;  %2339 = vrot.lane.b32.xlu1 %v9739_v4, %s4049_s1  ;;  %v7451_v15 = vadd.f32 %v7372_v18, %v2550_v19  ;;  %3775 = vpow2.f32 %v3528_v31 }
 0x38c   :  { %v2200_v7 = vmul.f32 %v9708_v22, %v2166_v17  ;;  %v2446_v49 = vmul.f32 %v6870_v12, %v2398_v56  ;;  %v1480_v0 = vmul.f32 %v9740_v62, %v1404_v1  ;;  %v1717_v46 = vmul.f32 %v6486_v38, %v1666_v11 }
 0x38d   :  { %v2447_v63 = vmul.f32 %v9710_v35, %v2390_v14  ;;  %v1718_v39 = vmul.f32 %v6497_v28, %v1658_v9  ;;  %v1719_v13 = vmul.f32 %v9614_v23, %v1650_v26  ;;  %v1720_v24 = vmul.f32 %v9622_v8, %v1674_v30  ;;  %v7461_v3 = vpop.permute.xlu0 %2502  ;;  %v7468_v56 = vpop.permute.xlu1 %1641  ;;  %v9746_v26 = vld [vmem:[#allocation224_spill] sm:$0xff] }
 0x38e   :  { %9741 = vst [vmem:[#allocation183_spill] sm:$0xff] %v7461_v3  ;;  %v7465_v19 = vmul.f32 %v9705_v27, %v7291_v36  ;;  %v1541_v17 = vmul.f32 %v9685_v52, %v1477_v29  ;;  %v3529_v31 = vmul.f32 -1.442695, %v7445_v32  ;;  %v7472_v14 = vadd.f32 %v7372_v18, %v2551_v55  ;;  %v9757_v3 = vld [vmem:[#allocation234_spill] sm:$0xff] }
 0x38f   :  { %v7476_v1 = vmul.f32 %v9705_v27, %v7357_v5  ;;  %v7479_v9 = vmul.f32 %v9689_v40, %v2197_v6  ;;  %2355 = vrot.lane.b32.xlu1 %v9623_v37, %s4049_s1  ;;  %v3530_v36 = vmul.f32 -1.442695, %v7451_v15  ;;  %v7485_v29 = vadd.f32 %v7372_v18, %v2552_v50  ;;  %v9748_v5 = vld [vmem:[#allocation211_spill] sm:$0xff] }
 0x390   :  { %9742 = vst [vmem:[#allocation174_spill] sm:$0xff] %v7465_v19  ;;  %v7488_v11 = vmul.f32 %v9689_v40, %v2200_v7  ;;  %v7491_v30 = vmul.f32 %v9746_v26, %v2446_v49  ;;  %v1544_v27 = vmul.f32 %v9685_v52, %v1480_v0  ;;  %v1781_v55 = vmul.f32 %v9748_v5, %v1717_v46  ;;  %v9751_v40 = vld [vmem:[#allocation14_spill] sm:$0xff]  ;;  %v9778_v19 = vld [vmem:[#allocation11_spill] sm:$0xff] }
 0x391   :  { %9743 = vst [vmem:[#allocation188_spill] sm:$0xff] %v7476_v1  ;;  %9744 = vst [vmem:[#allocation175_spill] sm:$0xff] %v7479_v9  ;;  %v7496_v6 = vmul.f32 %v9746_v26, %v2447_v63  ;;  %v1782_v37 = vmul.f32 %v9748_v5, %v1718_v39  ;;  %v1783_v4 = vmul.f32 %v9748_v5, %v1719_v13  ;;  %v7501_v18 = vpop.permute.xlu0 %1843  ;;  %v9752_v49 = vld [vmem:[#allocation38_spill] sm:$0xff]  ;;  %v7510_v0 = vpop.permute.xlu1 %1855  ;;  %3777 = vpow2.f32 %v3529_v31  ;;  %v9755_v13 = vld [vmem:[#allocation96_spill] sm:$0xff] }
 0x392   :  { %9745 = vst [vmem:[#allocation215_spill] sm:$0xff] %v7488_v11  ;;  %9747 = vst [vmem:[#allocation177_spill] sm:$0xff] %v7491_v30  ;;  %v1784_v50 = vmul.f32 %v9748_v5, %v1720_v24  ;;  %v7504_v7 = vadd.f32 %v1541_v17, %v9751_v40  ;;  %v1905_v52 = vsel %vm1893_vm6, %v9753_v25, %v9752_v49  ;;  %v3531_v46 = vmul.f32 -1.442695, %v7472_v14  ;;  %v9754_v63 = vld [vmem:[#allocation90_spill] sm:$0xff]  ;;  %v9756_v31 = vld [vmem:[#allocation32_spill] sm:$0xff] }
 0x393   :  { %9749 = vst [vmem:[#allocation217_spill] sm:$0xff] %v7496_v6  ;;  %9750 = vst [vmem:[#allocation181_spill] sm:$0xff] %v7501_v18  ;;  %v1913_v39 = vsel %vm1893_vm6, %v9754_v63, %v9753_v25  ;;  %v1897_v24 = vsel %vm1893_vm6, %v9752_v49, %v9755_v13  ;;  %2387 = vrot.lane.b32.xlu1 %v9637_v47, %s4049_s1  ;;  %3779 = vpow2.f32 %v3530_v36  ;;  %v3532_v17 = vmul.f32 -1.442695, %v7485_v29  ;;  %v9758_v18 = vld [vmem:[#allocation13_spill] sm:$0xff]  ;;  %v9760_v25 = vld [vmem:[#allocation123_spill] sm:$0xff] }
 0x394   :  { %v3774_v5 = vpop.eup %3773  ;;  %v7525_v40 = vadd.f32 %v1544_v27, %v9756_v31  ;;  %v7529_v21 = vmul.f32 %v9758_v18, %v9757_v3  ;;  %v7533_v30 = vmul.f32 %v9758_v18, %v9760_v25  ;;  %v7536_v49 = vadd.f32 %v1781_v55, %v7026_v20  ;;  %v9762_v47 = vld [vmem:[#allocation133_spill] sm:$0xff]  ;;  %v9764_v27 = vld [vmem:[#allocation134_spill] sm:$0xff]  ;;  %v9767_v55 = vld [vmem:[#allocation107_spill] sm:$0xff] }
 0x395   :  { %v3776_v42 = vpop.eup %3775  ;;  %v7539_v36 = vadd.f32 %v1782_v37, %v9762_v47  ;;  %v7542_v58 = vadd.f32 %v1783_v4, %v9763_v61  ;;  %v7545_v31 = vadd.f32 %v1784_v50, %v9764_v27  ;;  %v1921_v3 = vsel %vm1893_vm6, %v9755_v13, %v9754_v63  ;;  %v7551_v25 = vpop.permute.xlu0 %1875  ;;  %v9768_v61 = vld [vmem:[#allocation88_spill] sm:$0xff]  ;;  %v9769_v4 = vld [vmem:[#allocation131_spill] sm:$0xff]  ;;  %v9770_v27 = vld [vmem:[#allocation85_spill] sm:$0xff] }
 0x396   :  { %9759 = vst [vmem:[#allocation176_spill] sm:$0xff] %v7529_v21  ;;  %9761 = vst [vmem:[#allocation225_spill] sm:$0xff] %v7533_v30  ;;  %v9766_v30 = vld [vmem:[#allocation112_spill] sm:$0xff]  ;;  %v1962_v21 = vmul.f32 %v9767_v55, %v1905_v52  ;;  %v1963_v37 = vmul.f32 %v9643_v53, %v1897_v24  ;;  %v7556_v47 = vpop.permute.xlu1 %1887  ;;  %3781 = vpow2.f32 %v3531_v46  ;;  %v1906_v50 = vsel %vm1893_vm6, %v9769_v4, %v9768_v61  ;;  %v9772_v9 = vld [vmem:[#allocation77_spill] sm:$0xff] }
 0x397   :  { %9765 = vst [vmem:[#allocation179_spill] sm:$0xff] %v7551_v25  ;;  %v1961_v20 = vmul.f32 %v9766_v30, %v1913_v39  ;;  %v1914_v63 = vsel %vm1893_vm6, %v9770_v27, %v9769_v4  ;;  %v2739_v13 = vadd.f32 1.0, %v3774_v5  ;;  %3783 = vpow2.f32 %v3532_v17  ;;  %v9771_v52 = vld [vmem:[#allocation36_spill] sm:$0xff]  ;;  %v9774_v17 = vld [vmem:[#allocation18_spill] sm:$0xff] }
 0x398   :  { %v1964_v39 = vmul.f32 %v9644_v57, %v1921_v3  ;;  %v2406_v24 = vsel %vm2389_vm8, %v9771_v52, %v9730_v44  ;;  %v2414_v46 = vsel %vm2389_vm8, %v9731_v45, %v9771_v52  ;;  %v2740_v25 = vadd.f32 1.0, %v3776_v42  ;;  %v9773_v6 = vld [vmem:[#allocation24_spill] sm:$0xff] }
 0x399   :  { %v1667_v4 = vsel %vm1645_vm5, %v9773_v6, %v9772_v9  ;;  %v1675_v5 = vsel %vm1645_vm5, %v9774_v17, %v9773_v6  ;;  %v9775_v3 = vld [vmem:[#allocation240_spill] sm:$0xff]  ;;  %v7591_v45 = vpop.permute.xlu0 %2089  ;;  %v1965_v52 = vmul.f32 %v9766_v30, %v1914_v63  ;;  %v1966_v11 = vmul.f32 %v9767_v55, %v1906_v50 }
 0x39a   :  { %v1651_v44 = vsel %vm1645_vm5, %v9775_v3, %v9774_v17  ;;  %v1659_v42 = vsel %vm1645_vm5, %v9772_v9, %v9775_v3  ;;  %9776 = vst [vmem:[#allocation190_spill] sm:$0xff] %v7591_v45  ;;  %v1898_v6 = vsel %vm1893_vm6, %v9768_v61, %v9777_v51  ;;  %v1922_v17 = vsel %vm1893_vm6, %v9777_v51, %v9770_v27  ;;  %v7603_v1 = vpop.permute.xlu1 %2085 }
 0x39b   :  { %v7606_v9 = vmul.f32 %v9778_v19, %v1961_v20  ;;  %v7609_v3 = vmul.f32 %v9778_v19, %v1962_v21  ;;  %v2445_v50 = vmul.f32 %v6927_v54, %v2406_v24  ;;  %3785 = vrcp.f32 %v2739_v13  ;;  %v3778_v63 = vpop.eup %3777 }
 0x39c   :  { %v2448_v45 = vmul.f32 %v9714_v41, %v2414_v46  ;;  %v1721_v61 = vmul.f32 %v6486_v38, %v1667_v4  ;;  %v1724_v35 = vmul.f32 %v9622_v8, %v1675_v5  ;;  %3787 = vrcp.f32 %v2740_v25  ;;  %v9784_v46 = vld [vmem:[#allocation40_spill] sm:$0xff] }
 0x39d   :  { %9779 = vst [vmem:[#allocation189_spill] sm:$0xff] %v7606_v9  ;;  %9780 = vst [vmem:[#allocation63_spill] sm:$0xff] %v7609_v3  ;;  %v3780_v51 = vpop.eup %3779  ;;  %v1722_v27 = vmul.f32 %v6497_v28, %v1659_v42  ;;  %v1723_v20 = vmul.f32 %v9614_v23, %v1651_v44  ;;  %v1967_v9 = vmul.f32 %v9643_v53, %v1898_v6  ;;  %v7619_v3 = vpop.permute.xlu0 %2121  ;;  %v9786_v42 = vld [vmem:[#allocation93_spill] sm:$0xff]  ;;  %v9787_v6 = vld [vmem:[#allocation148_spill] sm:$0xff] }
 0x39e   :  { %v1968_v21 = vmul.f32 %v9644_v57, %v1922_v17  ;;  %9781 = vst [vmem:[#allocation75_spill] sm:$0xff] %v7619_v3  ;;  %v7622_v13 = vmul.f32 %v9778_v19, %v1963_v37  ;;  %v7625_v24 = vmul.f32 %v9778_v19, %v1964_v39  ;;  %v2029_v4 = vmul.f32 %v9784_v46, %v1965_v52  ;;  %v7629_v5 = vpop.permute.xlu1 %2101  ;;  %v9788_v37 = vld [vmem:[#allocation153_spill] sm:$0xff] }
 0x39f   :  { %v2030_v25 = vmul.f32 %v9784_v46, %v1966_v11  ;;  %v7632_v44 = vmul.f32 %v9746_v26, %v2445_v50  ;;  %v2153_v17 = vsel %vm2141_vm7, %v9787_v6, %v9786_v42  ;;  %v2161_v19 = vsel %vm2141_vm7, %v9788_v37, %v9787_v6  ;;  %v9789_v11 = vld [vmem:[#allocation45_spill] sm:$0xff] }
 0x3a0   :  { %9782 = vst [vmem:[#allocation68_spill] sm:$0xff] %v7622_v13  ;;  %9783 = vst [vmem:[#allocation184_spill] sm:$0xff] %v7625_v24  ;;  %v2741_v39 = vadd.f32 1.0, %v3778_v63  ;;  %v3782_v3 = vpop.eup %3781  ;;  %v7643_v52 = vmul.f32 %v9746_v26, %v2448_v45  ;;  %v7646_v24 = vmul.f32 %v9789_v11, %v1721_v61  ;;  %v7649_v50 = vmul.f32 %v9789_v11, %v1724_v35 }
 0x3a1   :  { %9785 = vst [vmem:[#allocation127_spill] sm:$0xff] %v7632_v44  ;;  %v2742_v13 = vadd.f32 1.0, %v3780_v51  ;;  %v3784_v44 = vpop.eup %3783  ;;  %v7652_v41 = vmul.f32 %v9789_v11, %v1722_v27  ;;  %v7655_v12 = vmul.f32 %v9789_v11, %v1723_v20  ;;  %v2031_v63 = vmul.f32 %v9784_v46, %v1967_v9  ;;  %v7659_v26 = vpop.permute.xlu0 %2335  ;;  %v9793_v20 = vld [vmem:[#allocation231_spill] sm:$0xff] }
 0x3a2   :  { %v2032_v6 = vmul.f32 %v9784_v46, %v1968_v21  ;;  %9792 = vst [vmem:[#allocation128_spill] sm:$0xff] %v7659_v26  ;;  %v7662_v45 = vadd.f32 %v2029_v4, %v7536_v49  ;;  %v7665_v35 = vadd.f32 %v2030_v25, %v7539_v36  ;;  %v2209_v61 = vmul.f32 %v6864_v16, %v2161_v19  ;;  %v7669_v27 = vpop.permute.xlu1 %2133  ;;  %v9794_v21 = vld [vmem:[#allocation102_spill] sm:$0xff] }
 0x3a3   :  { %9790 = vst [vmem:[#allocation72_spill] sm:$0xff] %v7652_v41  ;;  %9791 = vst [vmem:[#allocation62_spill] sm:$0xff] %v7655_v12  ;;  %v2210_v51 = vmul.f32 %v6648_v48, %v2153_v17  ;;  %v1660_v9 = vsel %vm1645_vm5, %v7442_v10, %v9793_v20  ;;  %v1668_v49 = vsel %vm1645_vm5, %v9794_v21, %v7442_v10  ;;  %3789 = vrcp.f32 %v2741_v39 }
 0x3a4   :  { %v2743_v46 = vadd.f32 1.0, %v3782_v3  ;;  %v1652_v36 = vsel %vm1645_vm5, %v9793_v20, %v7468_v56  ;;  %v1676_v4 = vsel %vm1645_vm5, %v7468_v56, %v9794_v21  ;;  %3791 = vrcp.f32 %v2742_v13  ;;  %v9795_v3 = vld [vmem:[#allocation158_spill] sm:$0xff] }
 0x3a5   :  { %v2744_v25 = vadd.f32 1.0, %v3784_v44  ;;  %v3786_v17 = vpop.eup %3785  ;;  %v7688_v19 = vadd.f32 %v2031_v63, %v7542_v58  ;;  %v7691_v10 = vadd.f32 %v2032_v6, %v7545_v31  ;;  %v2145_v39 = vsel %vm2141_vm7, %v9786_v42, %v9795_v3  ;;  %v7701_v56 = vpop.permute.xlu0 %2367  ;;  %v9797_v44 = vld [vmem:[#allocation126_spill] sm:$0xff]  ;;  %v9798_v58 = vld [vmem:[#allocation168_spill] sm:$0xff] }
 0x3a6   :  { %v2169_v11 = vsel %vm2141_vm7, %v9795_v3, %v9788_v37  ;;  %9796 = vst [vmem:[#allocation71_spill] sm:$0xff] %v7701_v56  ;;  %v3788_v13 = vpop.eup %3787  ;;  %v7704_v20 = vmul.f32 %v9797_v44, %v2209_v61  ;;  %v1405_v31 = vsel %vm1397_vm4, %v9798_v58, %v7404_v43  ;;  %v9799_v63 = vld [vmem:[#allocation150_spill] sm:$0xff]  ;;  %v1725_v6 = vmul.f32 %v6486_v38, %v1668_v49  ;;  %v7715_v21 = vpop.permute.xlu1 %2331 }
 0x3a7   :  { %v1429_v42 = vsel %vm1397_vm4, %v7404_v43, %v9799_v63  ;;  %v1726_v37 = vmul.f32 %v6497_v28, %v1660_v9  ;;  %v1727_v3 = vmul.f32 %v9614_v23, %v1652_v36  ;;  %v1728_v61 = vmul.f32 %v9622_v8, %v1676_v4  ;;  %v9800_v43 = vld [vmem:[#allocation111_spill] sm:$0xff]  ;;  %v9801_v9 = vld [vmem:[#allocation229_spill] sm:$0xff] }
 0x3a8   :  { %3793 = vrcp.f32 %v2743_v46  ;;  %v7721_v26 = vmul.f32 %v9797_v44, %v2210_v51  ;;  %v2211_v58 = vmul.f32 %v9679_v60, %v2145_v39  ;;  %v2212_v56 = vmul.f32 %v9708_v22, %v2169_v11  ;;  %v9805_v11 = vld [vmem:[#allocation222_spill] sm:$0xff] }
 0x3a9   :  { %3795 = vrcp.f32 %v2744_v25  ;;  %v1907_v49 = vsel %vm1893_vm6, %v7510_v0, %v9800_v43  ;;  %v1915_v36 = vsel %vm1893_vm6, %v9801_v9, %v7510_v0  ;;  %v7733_v4 = vpop.permute.xlu0 %2506  ;;  %v7736_v51 = vmul.f32 %v3786_v17, %v7375_v2 }
 0x3aa   :  { %9802 = vst [vmem:[#allocation92_spill] sm:$0xff] %v7733_v4  ;;  %v7739_v46 = vmul.f32 %v3788_v13, %v7383_v33  ;;  %v1481_v25 = vmul.f32 %v9733_v34, %v1429_v42  ;;  %v1484_v39 = vmul.f32 %v9740_v62, %v1405_v31  ;;  %v1789_v63 = vmul.f32 %v9805_v11, %v1725_v6  ;;  %v2348_v0 = vpop.permute.xlu1 %2347  ;;  %v9806_v13 = vld [vmem:[#allocation122_spill] sm:$0xff] }
 0x3ab   :  { %9803 = vst [vmem:[#allocation162_spill] sm:$0xff] %v7736_v51  ;;  %v1899_v12 = vsel %vm1893_vm6, %v9800_v43, %v7556_v47  ;;  %v1790_v4 = vmul.f32 %v9805_v11, %v1726_v37  ;;  %v1791_v2 = vmul.f32 %v9805_v11, %v1727_v3  ;;  %v1792_v17 = vmul.f32 %v9805_v11, %v1728_v61  ;;  %v9815_v11 = vld [vmem:[#allocation164_spill] sm:$0xff] }
 0x3ac   :  { %9804 = vst [vmem:[#allocation193_spill] sm:$0xff] %v7739_v46  ;;  %v1923_v33 = vsel %vm1893_vm6, %v7556_v47, %v9801_v9  ;;  %v1969_v34 = vmul.f32 %v9766_v30, %v1915_v36  ;;  %v1970_v62 = vmul.f32 %v9767_v55, %v1907_v49  ;;  %v2154_v31 = vsel %vm2141_vm7, %v7629_v5, %v9806_v13  ;;  %v9813_v36 = vld [vmem:[#allocation160_spill] sm:$0xff] }
 0x3ad   :  { %v2162_v42 = vsel %vm2141_vm7, %v7603_v1, %v7629_v5  ;;  %v3790_v6 = vpop.eup %3789  ;;  %v7766_v37 = vmul.f32 %v9797_v44, %v2211_v58  ;;  %v7769_v47 = vmul.f32 %v9797_v44, %v2212_v56  ;;  %v1971_v3 = vmul.f32 %v9643_v53, %v1899_v12  ;;  %v991_v44 = vpop.permute.xlu0 %990 }
 0x3ae   :  { %v7774_v61 = vadd.f32 %v7739_v46, %v7736_v51  ;;  %v3792_v43 = vpop.eup %3791  ;;  %v7777_v49 = vmul.f32 %v9758_v18, %v1481_v25  ;;  %v7780_v9 = vmul.f32 %v9758_v18, %v1484_v39  ;;  %v7783_v5 = vadd.f32 %v1789_v63, %v7504_v7  ;;  %v2380_v56 = vpop.permute.xlu1 %2379  ;;  %v9817_v39 = vld [vmem:[#allocation50_spill] sm:$0xff] }
 0x3af   :  { %9807 = vst [vmem:[#allocation191_spill] sm:$0xff] %v7766_v37  ;;  %9808 = vst [vmem:[#allocation195_spill] sm:$0xff] %v7769_v47  ;;  %v1972_v58 = vmul.f32 %v9644_v57, %v1923_v33  ;;  %v7787_v12 = vadd.f32 %v1790_v4, %v9813_v36  ;;  %v7790_v46 = vadd.f32 %v1791_v2, %v9815_v11  ;;  %v9823_v36 = vld [vmem:[#allocation42_spill] sm:$0xff] }
 0x3b0   :  { %9809 = vst [vmem:[#allocation197_spill] sm:$0xff] %v7774_v61  ;;  %9810 = vst [vmem:[#allocation198_spill] sm:$0xff] %v7777_v49  ;;  %v2213_v51 = vmul.f32 %v6864_v16, %v2162_v42  ;;  %v2214_v25 = vmul.f32 %v6648_v48, %v2154_v31  ;;  %v7795_v18 = vadd.f32 %v1792_v17, %v7525_v40  ;;  %v9824_v11 = vld [vmem:[#allocation6_spill] sm:$0xff]  ;;  %v9878_v16 = vld [vmem:[#allocation15_spill] sm:$0xff] }
 0x3b1   :  { %9811 = vst [vmem:[#allocation196_spill] sm:$0xff] %v7780_v9  ;;  %9812 = vst [vmem:[#allocation200_spill] sm:$0xff] %v7783_v5  ;;  %v7798_v7 = vmul.f32 %v9817_v39, %v1969_v34  ;;  %v7801_v63 = vmul.f32 %v9817_v39, %v1970_v62  ;;  %v2146_v4 = vsel %vm2141_vm7, %v9806_v13, %v7669_v27  ;;  %v9822_v13 = vld [vmem:[#allocation46_spill] sm:$0xff]  ;;  %v1003_v49 = vpop.permute.xlu0 %1002 }
 0x3b2   :  { %9814 = vst [vmem:[#allocation202_spill] sm:$0xff] %v7787_v12  ;;  %9816 = vst [vmem:[#allocation74_spill] sm:$0xff] %v7795_v18  ;;  %v3794_v2 = vpop.eup %3793  ;;  %v7808_v33 = vmul.f32 %v9817_v39, %v1971_v3  ;;  %v2170_v40 = vsel %vm2141_vm7, %v7669_v27, %v7603_v1  ;;  %v7815_v17 = vmul.f32 %v3790_v6, %v7445_v32  ;;  %v7826_v61 = vpop.permute.xlu1 %2586  ;;  %v9826_v1 = vld [vmem:[#allocation119_spill] sm:$0xff]  ;;  %v9827_v6 = vld [vmem:[#allocation54_spill] sm:$0xff] }
 0x3b3   :  { %9818 = vst [vmem:[#allocation192_spill] sm:$0xff] %v7801_v63  ;;  %v7818_v34 = vmul.f32 %v3792_v43, %v7451_v15  ;;  %v3796_v62 = vpop.eup %3795  ;;  %v7821_v31 = vmul.f32 %v9817_v39, %v1972_v58  ;;  %v1021_v42 = vmul.f32 %v991_v44, %v9822_v13  ;;  %v1022_v3 = vmul.f32 %v991_v44, %v9823_v36  ;;  %v9828_v39 = vld [vmem:[#allocation12_spill] sm:$0xff]  ;;  %v9829_v13 = vld [vmem:[#allocation69_spill] sm:$0xff]  ;;  %v9838_v12 = vld [vmem:[#allocation47_spill] sm:$0xff] }
 0x3b4   :  { %9819 = vst [vmem:[#allocation207_spill] sm:$0xff] %v7808_v33  ;;  %9820 = vst [vmem:[#allocation89_spill] sm:$0xff] %v7815_v17  ;;  %v1023_v9 = vmul.f32 %v991_v44, %v9824_v11  ;;  %v2277_v27 = vmul.f32 %v9826_v1, %v2213_v51  ;;  %v2278_v32 = vmul.f32 %v9826_v1, %v2214_v25  ;;  %v9831_v11 = vld [vmem:[#allocation136_spill] sm:$0xff]  ;;  %v9866_v18 = vld [vmem:[#allocation241_spill] sm:$0xff] }
 0x3b5   :  { %9821 = vst [vmem:[#allocation141_spill] sm:$0xff] %v7818_v34  ;;  %9825 = vst [vmem:[#allocation194_spill] sm:$0xff] %v7826_v61  ;;  %v2215_v15 = vmul.f32 %v9679_v60, %v2146_v4  ;;  %v1024_v43 = vmul.f32 %v991_v44, %v9827_v6  ;;  %v2216_v58 = vmul.f32 %v9708_v22, %v2170_v40  ;;  %v9834_v4 = vld [vmem:[#allocation57_spill] sm:$0xff]  ;;  %v9835_v6 = vld [vmem:[#allocation44_spill] sm:$0xff] }
 0x3b6   :  { %v1033_v33 = vmul.f32 %v1003_v49, %v9828_v39  ;;  %v1034_v63 = vmul.f32 %v1003_v49, %v9829_v13  ;;  %v7836_v36 = vmul.f32 %v3794_v2, %v7472_v14  ;;  %v2401_v47 = vsel %vm2389_vm8, %v2348_v0, %v9831_v11  ;;  %v9836_v2 = vld [vmem:[#allocation7_spill] sm:$0xff]  ;;  %v1596_v48 = vpop.permute.xlu1 %1595  ;;  %v9865_v22 = vld [vmem:[#allocation237_spill] sm:$0xff]  ;;  %v9896_v61 = vld [vmem:[#allocation104_spill] sm:$0xff] }
 0x3b7   :  { %v2409_v51 = vsel %vm2389_vm8, %v7715_v21, %v2348_v0  ;;  %v7846_v44 = vadd.f32 %v7818_v34, %v7815_v17  ;;  %v7849_v25 = vmul.f32 %v3796_v62, %v7485_v29  ;;  %v1053_v40 = vadd.f32 %v1021_v42, %v9834_v4  ;;  %v9837_v13 = vld [vmem:[#allocation67_spill] sm:$0xff]  ;;  %v9839_v17 = vld [vmem:[#allocation76_spill] sm:$0xff]  ;;  %v9840_v42 = vld [vmem:[#allocation78_spill] sm:$0xff] }
 0x3b8   :  { %9830 = vst [vmem:[#allocation209_spill] sm:$0xff] %v7836_v36  ;;  %v1054_v14 = vadd.f32 %v1022_v3, %v9835_v6  ;;  %v1055_v39 = vadd.f32 %v1023_v9, %v9836_v2  ;;  %v1035_v60 = vmul.f32 %v1003_v49, %v9837_v13  ;;  %v7856_v37 = vadd.f32 %v2277_v27, %v7662_v45  ;;  %v9841_v3 = vld [vmem:[#allocation66_spill] sm:$0xff]  ;;  %v9842_v27 = vld [vmem:[#allocation120_spill] sm:$0xff] }
 0x3b9   :  { %9832 = vst [vmem:[#allocation101_spill] sm:$0xff] %v7846_v44  ;;  %9833 = vst [vmem:[#allocation55_spill] sm:$0xff] %v7849_v25  ;;  %v2279_v0 = vmul.f32 %v9826_v1, %v2215_v15  ;;  %v1056_v34 = vadd.f32 %v1024_v43, %v9838_v12  ;;  %v1036_v44 = vmul.f32 %v1003_v49, %v9839_v17  ;;  %v9843_v12 = vld [vmem:[#allocation10_spill] sm:$0xff] }
 0x3ba   :  { %v2280_v29 = vmul.f32 %v9826_v1, %v2216_v58  ;;  %v2393_v62 = vsel %vm2389_vm8, %v9831_v11, %v2380_v56  ;;  %v1065_v9 = vadd.f32 %v1033_v33, %v9840_v42  ;;  %v1066_v4 = vadd.f32 %v1034_v63, %v9841_v3  ;;  %v9844_v1 = vld [vmem:[#allocation53_spill] sm:$0xff]  ;;  %v9845_v58 = vld [vmem:[#allocation56_spill] sm:$0xff]  ;;  %v1011_v63 = vpop.permute.xlu0 %1010  ;;  %v1628_v13 = vpop.permute.xlu1 %1627  ;;  %v9848_v42 = vld [vmem:[#allocation59_spill] sm:$0xff] }
 0x3bb   :  { %v7868_v6 = vadd.f32 %v2278_v32, %v7665_v35  ;;  %v2457_v45 = vmul.f32 %v6927_v54, %v2409_v51  ;;  %v2458_v15 = vmul.f32 %v9842_v27, %v2401_v47  ;;  %v2417_v49 = vsel %vm2389_vm8, %v2380_v56, %v7715_v21  ;;  %v9846_v33 = vld [vmem:[#allocation73_spill] sm:$0xff]  ;;  %v9847_v35 = vld [vmem:[#allocation178_spill] sm:$0xff]  ;;  %v9849_v3 = vld [vmem:[#allocation84_spill] sm:$0xff] }
 0x3bc   :  { %v1301_v17 = vadd.f32 %v9843_v12, %v1053_v40  ;;  %v1302_v43 = vadd.f32 %v9844_v1, %v1054_v14  ;;  %v1303_v11 = vadd.f32 %v9845_v58, %v1055_v39  ;;  %v1067_v2 = vadd.f32 %v1035_v60, %v9846_v33  ;;  %v9851_v40 = vld [vmem:[#allocation81_spill] sm:$0xff]  ;;  %v9852_v14 = vld [vmem:[#allocation27_spill] sm:$0xff]  ;;  %v9853_v12 = vld [vmem:[#allocation236_spill] sm:$0xff] }
 0x3bd   :  { %v2459_v32 = vmul.f32 %v9847_v35, %v2393_v62  ;;  %v1304_v51 = vadd.f32 %v9848_v42, %v1056_v34  ;;  %v1068_v47 = vadd.f32 %v1036_v44, %v9849_v3  ;;  %v7884_v41 = vadd.f32 %v7849_v25, %v7836_v36  ;;  %v9855_v44 = vld [vmem:[#allocation205_spill] sm:$0xff]  ;;  %v9856_v58 = vld [vmem:[#allocation94_spill] sm:$0xff]  ;;  %v9857_v42 = vld [vmem:[#allocation132_spill] sm:$0xff] }
 0x3be   :  { %v7887_v21 = vadd.f32 %v2279_v0, %v7688_v19  ;;  %v7890_v56 = vadd.f32 %v2280_v29, %v7691_v10  ;;  %v1313_v60 = vadd.f32 %v9851_v40, %v1065_v9  ;;  %v1314_v39 = vadd.f32 %v9852_v14, %v1066_v4  ;;  %v9858_v0 = vld [vmem:[#allocation21_spill] sm:$0xff]  ;;  %v9859_v10 = vld [vmem:[#allocation135_spill] sm:$0xff]  ;;  %v9860_v25 = vld [vmem:[#allocation86_spill] sm:$0xff]  ;;  %v1842_v40 = vpop.permute.xlu1 %1841 }
 0x3bf   :  { %9850 = vst [vmem:[#allocation180_spill] sm:$0xff] %v7884_v41  ;;  %v7895_v62 = vmul.f32 %v9853_v12, %v2457_v45  ;;  %v7898_v34 = vmul.f32 %v9853_v12, %v2458_v15  ;;  %v2460_v1 = vmul.f32 %v9855_v44, %v2417_v49  ;;  %v1041_v33 = vmul.f32 %v1011_v63, %v9856_v58  ;;  %v9862_v45 = vld [vmem:[#allocation129_spill] sm:$0xff]  ;;  %v9863_v15 = vld [vmem:[#allocation87_spill] sm:$0xff]  ;;  %v9864_v41 = vld [vmem:[#allocation64_spill] sm:$0xff] }
 0x3c0   :  { %v1549_v19 = vadd.f32 %v9857_v42, %v1301_v17  ;;  %v1550_v3 = vadd.f32 %v9858_v0, %v1302_v43  ;;  %v1551_v29 = vadd.f32 %v9859_v10, %v1303_v11  ;;  %v1315_v9 = vadd.f32 %v9860_v25, %v1067_v2  ;;  %v9867_v42 = vld [vmem:[#allocation157_spill] sm:$0xff]  ;;  %v9868_v11 = vld [vmem:[#allocation226_spill] sm:$0xff] }
 0x3c1   :  { %9854 = vst [vmem:[#allocation187_spill] sm:$0xff] %v7898_v34  ;;  %v7907_v4 = vmul.f32 %v9853_v12, %v2459_v32  ;;  %v1552_v14 = vadd.f32 %v9862_v45, %v1304_v51  ;;  %v1316_v36 = vadd.f32 %v9863_v15, %v1068_v47  ;;  %v1044_v49 = vmul.f32 %v1011_v63, %v9864_v41  ;;  %v9870_v32 = vld [vmem:[#allocation156_spill] sm:$0xff]  ;;  %v9871_v47 = vld [vmem:[#allocation227_spill] sm:$0xff]  ;;  %v9875_v45 = vld [vmem:[#allocation142_spill] sm:$0xff] }
 0x3c2   :  { %v1561_v58 = vadd.f32 %v9865_v22, %v1313_v60  ;;  %v1562_v17 = vadd.f32 %v9866_v18, %v1314_v39  ;;  %v1669_v43 = vsel %vm1645_vm5, %v1596_v48, %v9867_v42  ;;  %v1042_v25 = vmul.f32 %v1011_v63, %v9868_v11  ;;  %v9872_v41 = vld [vmem:[#allocation100_spill] sm:$0xff]  ;;  %v9873_v22 = vld [vmem:[#allocation5_spill] sm:$0xff]  ;;  %v9874_v18 = vld [vmem:[#allocation151_spill] sm:$0xff] }
 0x3c3   :  { %9861 = vst [vmem:[#allocation204_spill] sm:$0xff] %v7907_v4  ;;  %v7919_v2 = vmul.f32 %v9853_v12, %v2460_v1  ;;  %v1677_v51 = vsel %vm1645_vm5, %v9870_v32, %v1596_v48  ;;  %v1043_v0 = vmul.f32 %v1011_v63, %v9871_v47  ;;  %v1073_v10 = vadd.f32 %v1041_v33, %v9872_v41  ;;  %v9876_v11 = vld [vmem:[#allocation137_spill] sm:$0xff]  ;;  %v1874_v12 = vpop.permute.xlu1 %1873  ;;  %v9877_v1 = vld [vmem:[#allocation243_spill] sm:$0xff]  ;;  %v1019_v33 = vpop.permute.xlu0 %1018 }
 0x3c4   :  { %v7927_v60 = vadd.f32 %v9873_v22, %v1549_v19  ;;  %v7930_v39 = vadd.f32 %v9874_v18, %v1550_v3  ;;  %v1799_v15 = vadd.f32 %v9875_v45, %v1551_v29  ;;  %v1563_v4 = vadd.f32 %v9876_v11, %v1315_v9  ;;  %v9879_v63 = vld [vmem:[#allocation103_spill] sm:$0xff]  ;;  %v9881_v22 = vld [vmem:[#allocation174_spill] sm:$0xff]  ;;  %v9883_v45 = vld [vmem:[#allocation97_spill] sm:$0xff] }
 0x3c5   :  { %9869 = vst [vmem:[#allocation182_spill] sm:$0xff] %v7919_v2  ;;  %v1800_v2 = vadd.f32 %v9877_v1, %v1552_v14  ;;  %v1564_v5 = vadd.f32 %v9878_v16, %v1316_v36  ;;  %v1729_v48 = vmul.f32 %v6486_v38, %v1669_v43  ;;  %v1076_v47 = vadd.f32 %v1044_v49, %v9879_v63  ;;  %v9880_v41 = vld [vmem:[#allocation163_spill] sm:$0xff]  ;;  %v9884_v14 = vld [vmem:[#allocation109_spill] sm:$0xff]  ;;  %v9885_v36 = vld [vmem:[#allocation188_spill] sm:$0xff] }
 0x3c6   :  { %v7939_v19 = vadd.f32 %v9880_v41, %v1561_v58  ;;  %v7942_v3 = vadd.f32 %v9881_v22, %v1562_v17  ;;  %v1732_v29 = vmul.f32 %v9622_v8, %v1677_v51  ;;  %v9882_v18 = vld [vmem:[#allocation95_spill] sm:$0xff]  ;;  %v1075_v11 = vadd.f32 %v1043_v0, %v9883_v45  ;;  %v9888_v8 = vld [vmem:[#allocation108_spill] sm:$0xff]  ;;  %v9892_v22 = vld [vmem:[#allocation114_spill] sm:$0xff] }
 0x3c7   :  { %v1074_v9 = vadd.f32 %v1042_v25, %v9882_v18  ;;  %v1321_v1 = vadd.f32 %v9884_v14, %v1073_v10  ;;  %v1653_v38 = vsel %vm1645_vm5, %v1628_v13, %v9870_v32  ;;  %v1661_v16 = vsel %vm1645_vm5, %v9867_v42, %v1628_v13  ;;  %v9887_v58 = vld [vmem:[#allocation115_spill] sm:$0xff]  ;;  %v9889_v25 = vld [vmem:[#allocation165_spill] sm:$0xff]  ;;  %v7962_v0 = vpop.permute.xlu1 %2087 }
 0x3c8   :  { %v7955_v49 = vadd.f32 %v9885_v36, %v1563_v4  ;;  %v1049_v17 = vmul.f32 %v1019_v33, %v9887_v58  ;;  %v1050_v43 = vmul.f32 %v1019_v33, %v9888_v8  ;;  %v1900_v51 = vsel %vm1893_vm6, %v1874_v12, %v9889_v25  ;;  %v9890_v10 = vld [vmem:[#allocation49_spill] sm:$0xff]  ;;  %v9893_v4 = vld [vmem:[#allocation166_spill] sm:$0xff]  ;;  %v9898_v34 = vld [vmem:[#allocation83_spill] sm:$0xff] }
 0x3c9   :  { %v1324_v63 = vadd.f32 %v9890_v10, %v1076_v47  ;;  %v9891_v32 = vld [vmem:[#allocation113_spill] sm:$0xff]  ;;  %v1052_v18 = vmul.f32 %v1019_v33, %v9892_v22  ;;  %v1975_v13 = vmul.f32 %v9643_v53, %v1900_v51  ;;  %v7969_v42 = vadd.f32 %v9893_v4, %v1564_v5  ;;  %v9897_v10 = vld [vmem:[#allocation139_spill] sm:$0xff]  ;;  %v9899_v22 = vld [vmem:[#allocation106_spill] sm:$0xff] }
 0x3ca   :  { %9886 = vst [vmem:[#allocation214_spill] sm:$0xff] %v7955_v49  ;;  %v1051_v41 = vmul.f32 %v1019_v33, %v9891_v32  ;;  %v9894_v45 = vld [vmem:[#allocation105_spill] sm:$0xff]  ;;  %v1730_v36 = vmul.f32 %v6497_v28, %v1661_v16  ;;  %v1731_v58 = vmul.f32 %v9614_v23, %v1653_v38  ;;  %v1323_v47 = vadd.f32 %v9896_v61, %v1075_v11  ;;  %v9900_v53 = vld [vmem:[#allocation110_spill] sm:$0xff] }
 0x3cb   :  { %v1322_v14 = vadd.f32 %v9894_v45, %v1074_v9  ;;  %v9895_v8 = vld [vmem:[#allocation33_spill] sm:$0xff]  ;;  %v1569_v32 = vadd.f32 %v9897_v10, %v1321_v1  ;;  %v2039_v33 = vmul.f32 %v9898_v34, %v1975_v13  ;;  %v1081_v51 = vadd.f32 %v1049_v17, %v9899_v22  ;;  %v7988_v23 = vpop.permute.xlu1 %2119  ;;  %v9903_v11 = vld [vmem:[#allocation238_spill] sm:$0xff]  ;;  %v9912_v22 = vld [vmem:[#allocation124_spill] sm:$0xff] }
 0x3cc   :  { %v7975_v49 = vmul.f32 %v9895_v8, %v1729_v48  ;;  %v1082_v5 = vadd.f32 %v1050_v43, %v9900_v53  ;;  %v9901_v4 = vld [vmem:[#allocation161_spill] sm:$0xff]  ;;  %v1924_v28 = vsel %vm1893_vm6, %v9889_v25, %v1842_v40  ;;  %v9902_v48 = vld [vmem:[#allocation146_spill] sm:$0xff]  ;;  %v1083_v1 = vadd.f32 %v1051_v41, %v9903_v11  ;;  %v9907_v43 = vld [vmem:[#allocation35_spill] sm:$0xff] }
 0x3cd   :  { %v1916_v9 = vsel %vm1893_vm6, %v1842_v40, %v9901_v4  ;;  %v1572_v61 = vadd.f32 %v9902_v48, %v1324_v63  ;;  %v9904_v38 = vld [vmem:[#allocation34_spill] sm:$0xff]  ;;  %v7994_v17 = vadd.f32 %v2039_v33, %v7790_v46  ;;  %v7997_v53 = vmul.f32 %v9895_v8, %v1732_v29  ;;  %v9909_v29 = vld [vmem:[#allocation37_spill] sm:$0xff]  ;;  %v9911_v33 = vld [vmem:[#allocation144_spill] sm:$0xff] }
 0x3ce   :  { %v1084_v16 = vadd.f32 %v1052_v18, %v9904_v38  ;;  %v8000_v13 = vadd.f32 %v9907_v43, %v1322_v14  ;;  %v8003_v45 = vmul.f32 %v9895_v8, %v1730_v36  ;;  %v8006_v40 = vmul.f32 %v9895_v8, %v1731_v58  ;;  %v9908_v25 = vld [vmem:[#allocation154_spill] sm:$0xff]  ;;  %v9910_v58 = vld [vmem:[#allocation152_spill] sm:$0xff]  ;;  %v9915_v11 = vld [vmem:[#allocation159_spill] sm:$0xff] }
 0x3cf   :  { %9905 = vst [vmem:[#allocation212_spill] sm:$0xff] %v7994_v17  ;;  %9906 = vst [vmem:[#allocation219_spill] sm:$0xff] %v7997_v53  ;;  %v8009_v63 = vadd.f32 %v9908_v25, %v1323_v47  ;;  %v1973_v41 = vmul.f32 %v9766_v30, %v1916_v9  ;;  %v1976_v46 = vmul.f32 %v9644_v57, %v1924_v28  ;;  %v8020_v36 = vpop.permute.xlu1 %2258  ;;  %v9913_v9 = vld [vmem:[#allocation116_spill] sm:$0xff]  ;;  %v9917_v43 = vld [vmem:[#allocation147_spill] sm:$0xff] }
 0x3d0   :  { %v1817_v18 = vadd.f32 %v7646_v24, %v1569_v32  ;;  %v8015_v10 = vadd.f32 %v9909_v29, %v1081_v51  ;;  %v1908_v14 = vsel %vm1893_vm6, %v9901_v4, %v1874_v12  ;;  %v2047_v8 = vadd.f32 %v9910_v58, %v1799_v15  ;;  %v9914_v24 = vld [vmem:[#allocation121_spill] sm:$0xff]  ;;  %v9916_v12 = vld [vmem:[#allocation215_spill] sm:$0xff] }
 0x3d1   :  { %v2048_v47 = vadd.f32 %v9911_v33, %v1800_v2  ;;  %v8025_v48 = vadd.f32 %v9912_v22, %v1082_v5  ;;  %v8028_v28 = vadd.f32 %v9913_v9, %v1083_v1  ;;  %v8031_v32 = vadd.f32 %v9914_v24, %v1084_v16  ;;  %v9918_v2 = vld [vmem:[#allocation245_spill] sm:$0xff]  ;;  %v9920_v33 = vld [vmem:[#allocation175_spill] sm:$0xff] }
 0x3d2   :  { %v1820_v51 = vadd.f32 %v7649_v50, %v1572_v61  ;;  %v2295_v38 = vadd.f32 %v9915_v11, %v2047_v8  ;;  %v2045_v15 = vadd.f32 %v9917_v43, %v7927_v60  ;;  %v2046_v25 = vadd.f32 %v9918_v2, %v7930_v39  ;;  %v9919_v61 = vld [vmem:[#allocation217_spill] sm:$0xff]  ;;  %v9925_v11 = vld [vmem:[#allocation22_spill] sm:$0xff] }
 0x3d3   :  { %v2296_v4 = vadd.f32 %v9916_v12, %v2048_v47  ;;  %v2037_v5 = vmul.f32 %v9898_v34, %v1973_v41  ;;  %v8042_v1 = vmul.f32 %v9898_v34, %v1976_v46  ;;  %v1974_v16 = vmul.f32 %v9767_v55, %v1908_v14  ;;  %v2350_v50 = vpop.permute.xlu1 %2349  ;;  %v9921_v47 = vld [vmem:[#allocation143_spill] sm:$0xff]  ;;  %v9922_v41 = vld [vmem:[#allocation170_spill] sm:$0xff]  ;;  %v9923_v14 = vld [vmem:[#allocation185_spill] sm:$0xff] }
 0x3d4   :  { %v8046_v29 = vadd.f32 %v7798_v7, %v1817_v18  ;;  %v2543_v58 = vadd.f32 %v9919_v61, %v2295_v38  ;;  %v2293_v60 = vadd.f32 %v9920_v33, %v2045_v15  ;;  %v2294_v22 = vadd.f32 %v9921_v47, %v2046_v25  ;;  %v9924_v18 = vld [vmem:[#allocation172_spill] sm:$0xff]  ;;  %v9926_v38 = vld [vmem:[#allocation127_spill] sm:$0xff]  ;;  %v9928_v15 = vld [vmem:[#allocation189_spill] sm:$0xff] }
 0x3d5   :  { %v2544_v8 = vadd.f32 %v7643_v52, %v2296_v4  ;;  %v8053_v39 = vadd.f32 %v7821_v31, %v1820_v51  ;;  %v2163_v46 = vsel %vm2141_vm7, %v7962_v0, %v9922_v41  ;;  %v2402_v7 = vsel %vm2389_vm8, %v2350_v50, %v9923_v14  ;;  %v9927_v4 = vld [vmem:[#allocation177_spill] sm:$0xff]  ;;  %v9929_v25 = vld [vmem:[#allocation63_spill] sm:$0xff] }
 0x3d6   :  { %v2410_v52 = vsel %vm2389_vm8, %v9924_v18, %v2350_v50  ;;  %v2462_v24 = vmul.f32 %v9842_v27, %v2402_v7  ;;  %v8068_v31 = vadd.f32 %v9925_v11, %v2543_v58  ;;  %v2541_v12 = vadd.f32 %v9926_v38, %v2293_v60  ;;  %v9930_v61 = vld [vmem:[#allocation149_spill] sm:$0xff] }
 0x3d7   :  { %v2461_v9 = vmul.f32 %v6927_v54, %v2410_v52  ;;  %v8071_v51 = vadd.f32 %v9925_v11, %v2544_v8  ;;  %v2542_v43 = vadd.f32 %v9927_v4, %v2294_v22  ;;  %v2057_v2 = vadd.f32 %v9928_v15, %v7939_v19  ;;  %v2382_v7 = vpop.permute.xlu1 %2381 }
 0x3d8   :  { %v2058_v50 = vadd.f32 %v9929_v25, %v7942_v3  ;;  %v2526_v47 = vmul.f32 %v9930_v61, %v2462_v24  ;;  %v3523_v58 = vmul.f32 -1.442695, %v8068_v31  ;;  %v2394_v60 = vsel %vm2389_vm8, %v9923_v14, %v2382_v7 }
 0x3d9   :  { %v2525_v33 = vmul.f32 %v9930_v61, %v2461_v9  ;;  %v3524_v8 = vmul.f32 -1.442695, %v8071_v51  ;;  %v2418_v19 = vsel %vm2389_vm8, %v2382_v7, %v9924_v18  ;;  %v8090_v22 = vadd.f32 %v9925_v11, %v2541_v12 }
 0x3da   :  { %v8093_v3 = vadd.f32 %v9925_v11, %v2542_v43  ;;  %v2558_v9 = vadd.f32 %v2526_v47, %v7868_v6  ;;  %v2463_v24 = vmul.f32 %v9847_v35, %v2394_v60  ;;  %v2464_v38 = vmul.f32 %v9855_v44, %v2418_v19 }
 0x3db   :  { %v2557_v52 = vadd.f32 %v2525_v33, %v7856_v37  ;;  %3797 = vpow2.f32 %v3523_v58  ;;  %v3521_v14 = vmul.f32 -1.442695, %v8090_v22  ;;  %v2305_v18 = vadd.f32 %v7704_v20, %v2057_v2  ;;  %v2591_v43 = vpop.permute.xlu1 %2590  ;;  %v9931_v20 = vld [vmem:[#allocation187_spill] sm:$0xff]  ;;  %v9933_v58 = vld [vmem:[#allocation194_spill] sm:$0xff] }
 0x3dc   :  { %v3522_v4 = vmul.f32 -1.442695, %v8093_v3  ;;  %v2527_v12 = vmul.f32 %v9930_v61, %v2463_v24  ;;  %v2528_v11 = vmul.f32 %v9930_v61, %v2464_v38  ;;  %3799 = vpow2.f32 %v3524_v8  ;;  %v9932_v61 = vld [vmem:[#allocation171_spill] sm:$0xff]  ;;  %v9937_v24 = vld [vmem:[#allocation214_spill] sm:$0xff]  ;;  %v9938_v38 = vld [vmem:[#allocation68_spill] sm:$0xff] }
 0x3dd   :  { %v2306_v37 = vadd.f32 %v7721_v26, %v2058_v50  ;;  %v8105_v6 = vadd.f32 %v2591_v43, %v2557_v52  ;;  %v8107_v15 = vadd.f32 %v2591_v43, %v2558_v9  ;;  %3801 = vpow2.f32 %v3521_v14 }
 0x3de   :  { %v2553_v25 = vadd.f32 %v7895_v62, %v2305_v18  ;;  %v2559_v33 = vadd.f32 %v2527_v12, %v7887_v21  ;;  %v2560_v47 = vadd.f32 %v2528_v11, %v7890_v56  ;;  %3803 = vpow2.f32 %v3522_v4  ;;  %v9934_v62 = vld [vmem:[#allocation200_spill] sm:$0xff]  ;;  %v9939_v4 = vld [vmem:[#allocation130_spill] sm:$0xff] }
 0x3df   :  { %v2554_v2 = vadd.f32 %v9931_v20, %v2306_v37  ;;  %v2171_v7 = vsel %vm2141_vm7, %v9932_v61, %v7962_v0  ;;  %v3537_v26 = vmul.f32 -1.442695, %v8105_v6  ;;  %v3538_v50 = vmul.f32 -1.442695, %v8107_v15  ;;  %v8129_v19 = vpop.permute.xlu1 %1859  ;;  %v9940_v11 = vld [vmem:[#allocation74_spill] sm:$0xff]  ;;  %v9942_v37 = vld [vmem:[#allocation173_spill] sm:$0xff] }
 0x3e0   :  { %v8120_v8 = vadd.f32 %v9933_v58, %v2553_v25  ;;  %v8123_v60 = vadd.f32 %v2037_v5, %v9934_v62  ;;  %v8125_v21 = vadd.f32 %v2591_v43, %v2559_v33  ;;  %v8127_v56 = vadd.f32 %v2591_v43, %v2560_v47  ;;  %v9944_v20 = vld [vmem:[#allocation184_spill] sm:$0xff]  ;;  %v9947_v62 = vld [vmem:[#allocation62_spill] sm:$0xff] }
 0x3e1   :  { %v8132_v52 = vadd.f32 %v9933_v58, %v2554_v2  ;;  %v2038_v0 = vmul.f32 %v9898_v34, %v1974_v16  ;;  %3805 = vpow2.f32 %v3537_v26  ;;  %v2059_v14 = vadd.f32 %v9938_v38, %v9937_v24  ;;  %v9949_v38 = vld [vmem:[#allocation31_spill] sm:$0xff] }
 0x3e2   :  { %9935 = vst [vmem:[#allocation58_spill] sm:$0xff] %v8125_v21  ;;  %9936 = vst [vmem:[#allocation117_spill] sm:$0xff] %v8127_v56  ;;  %v3533_v9 = vmul.f32 -1.442695, %v8120_v8  ;;  %v2217_v5 = vmul.f32 %v9939_v4, %v2163_v46  ;;  %3807 = vpow2.f32 %v3538_v50  ;;  %v3539_v18 = vmul.f32 -1.442695, %v8125_v21 }
 0x3e3   :  { %v3540_v12 = vmul.f32 -1.442695, %v8127_v56  ;;  %v8143_v43 = vadd.f32 %v8042_v1, %v9940_v11  ;;  %v2155_v34 = vsel %vm2141_vm7, %v9922_v41, %v7988_v23  ;;  %v3534_v16 = vmul.f32 -1.442695, %v8132_v52  ;;  %v9943_v46 = vld [vmem:[#allocation72_spill] sm:$0xff]  ;;  %v8157_v1 = vpop.permute.xlu1 %1891  ;;  %v9945_v41 = vld [vmem:[#allocation202_spill] sm:$0xff] }
 0x3e4   :  { %3809 = vpow2.f32 %v3533_v9  ;;  %v2220_v25 = vmul.f32 %v9942_v37, %v2171_v7  ;;  %v1818_v33 = vadd.f32 %v9943_v46, %v8000_v13  ;;  %v2147_v47 = vsel %vm2141_vm7, %v7988_v23, %v9932_v61  ;;  %v9948_v9 = vld [vmem:[#allocation191_spill] sm:$0xff]  ;;  %v9950_v46 = vld [vmem:[#allocation118_spill] sm:$0xff] }
 0x3e5   :  { %9941 = vst [vmem:[#allocation216_spill] sm:$0xff] %v8143_v43  ;;  %v2060_v2 = vadd.f32 %v9944_v20, %v7969_v42  ;;  %v3798_v26 = vpop.eup %3797  ;;  %v8162_v50 = vadd.f32 %v2038_v0, %v9945_v41  ;;  %v1819_v7 = vadd.f32 %v9947_v62, %v8009_v63  ;;  %3811 = vpow2.f32 %v3539_v18  ;;  %v9951_v56 = vld [vmem:[#allocation155_spill] sm:$0xff] }
 0x3e6   :  { %v2307_v13 = vadd.f32 %v9948_v9, %v2059_v14  ;;  %v3800_v24 = vpop.eup %3799  ;;  %v2281_v11 = vmul.f32 %v9949_v38, %v2217_v5  ;;  %v2218_v23 = vmul.f32 %v9950_v46, %v2155_v34  ;;  %3813 = vpow2.f32 %v3540_v12  ;;  %v9952_v20 = vld [vmem:[#allocation179_spill] sm:$0xff]  ;;  %v9954_v12 = vld [vmem:[#allocation192_spill] sm:$0xff] }
 0x3e7   :  { %9946 = vst [vmem:[#allocation213_spill] sm:$0xff] %v8162_v50  ;;  %v2735_v61 = vadd.f32 1.0, %v3798_v26  ;;  %v3802_v53 = vpop.eup %3801  ;;  %v2219_v42 = vmul.f32 %v9951_v56, %v2147_v47  ;;  %v1909_v0 = vsel %vm1893_vm6, %v8129_v19, %v9952_v20  ;;  %v2736_v41 = vadd.f32 1.0, %v3800_v24  ;;  %v2106_v5 = vpop.permute.xlu1 %2105  ;;  %v9953_v62 = vld [vmem:[#allocation195_spill] sm:$0xff]  ;;  %v9955_v47 = vld [vmem:[#allocation204_spill] sm:$0xff]  ;;  %v9957_v50 = vld [vmem:[#allocation198_spill] sm:$0xff] }
 0x3e8   :  { %3815 = vpow2.f32 %v3534_v16  ;;  %v3804_v63 = vpop.eup %3803  ;;  %v2284_v14 = vmul.f32 %v9949_v38, %v2220_v25  ;;  %v2733_v18 = vadd.f32 1.0, %v3802_v53  ;;  %v2308_v34 = vadd.f32 %v9953_v62, %v2060_v2  ;;  %v9956_v43 = vld [vmem:[#allocation207_spill] sm:$0xff]  ;;  %v9958_v2 = vld [vmem:[#allocation176_spill] sm:$0xff] }
 0x3e9   :  { %3817 = vrcp.f32 %v2735_v61  ;;  %v2066_v26 = vadd.f32 %v9954_v12, %v1818_v33  ;;  %v2734_v9 = vadd.f32 1.0, %v3804_v63  ;;  %v2555_v21 = vadd.f32 %v9955_v47, %v2307_v13 }
 0x3ea   :  { %3819 = vrcp.f32 %v2736_v41  ;;  %v2067_v17 = vadd.f32 %v9956_v43, %v1819_v7  ;;  %v1577_v24 = vadd.f32 %v9957_v50, %v8015_v10  ;;  %v1978_v16 = vmul.f32 %v9767_v55, %v1909_v0  ;;  %v9959_v7 = vld [vmem:[#allocation225_spill] sm:$0xff]  ;;  %v9960_v55 = vld [vmem:[#allocation182_spill] sm:$0xff] }
 0x3eb   :  { %3821 = vrcp.f32 %v2733_v18  ;;  %v3806_v25 = vpop.eup %3805  ;;  %v2282_v53 = vmul.f32 %v9949_v38, %v2218_v23  ;;  %v2283_v61 = vmul.f32 %v9949_v38, %v2219_v42  ;;  %v1578_v33 = vadd.f32 %v9958_v2, %v8025_v48  ;;  %v8191_v50 = vpop.permute.xlu1 %2137  ;;  %v9961_v48 = vld [vmem:[#allocation181_spill] sm:$0xff] }
 0x3ec   :  { %3823 = vrcp.f32 %v2734_v9  ;;  %v3808_v41 = vpop.eup %3807  ;;  %v8187_v13 = vadd.f32 %v2281_v11, %v8046_v29  ;;  %v2749_v43 = vadd.f32 1.0, %v3806_v25  ;;  %v1579_v10 = vadd.f32 %v9959_v7, %v8028_v28  ;;  %v9962_v28 = vld [vmem:[#allocation233_spill] sm:$0xff]  ;;  %v9964_v25 = vld [vmem:[#allocation71_spill] sm:$0xff]  ;;  %v9966_v7 = vld [vmem:[#allocation190_spill] sm:$0xff] }
 0x3ed   :  { %v2556_v0 = vadd.f32 %v9960_v55, %v2308_v34  ;;  %v8195_v23 = vadd.f32 %v2284_v14, %v8053_v39  ;;  %v2750_v38 = vadd.f32 1.0, %v3808_v41  ;;  %v1917_v42 = vsel %vm1893_vm6, %v9961_v48, %v8129_v19  ;;  %v9967_v55 = vld [vmem:[#allocation128_spill] sm:$0xff] }
 0x3ee   :  { %v3810_v63 = vpop.eup %3809  ;;  %v8202_v29 = vadd.f32 %v9933_v58, %v2555_v21  ;;  %v8205_v11 = vadd.f32 %v7975_v49, %v1577_v24  ;;  %v2042_v18 = vmul.f32 %v9962_v28, %v1978_v16  ;;  %v1901_v39 = vsel %vm1893_vm6, %v9952_v20, %v8157_v1 }
 0x3ef   :  { %v2745_v14 = vadd.f32 1.0, %v3810_v63  ;;  %v3812_v62 = vpop.eup %3811  ;;  %v2314_v34 = vadd.f32 %v2282_v53, %v2066_v26  ;;  %v8212_v12 = vadd.f32 %v2283_v61, %v2067_v17  ;;  %3825 = vrcp.f32 %v2749_v43  ;;  %v2352_v20 = vpop.permute.xlu1 %2351  ;;  %v9963_v26 = vld [vmem:[#allocation140_spill] sm:$0xff]  ;;  %v9965_v61 = vld [vmem:[#allocation75_spill] sm:$0xff] }
 0x3f0   :  { %v1826_v19 = vadd.f32 %v8003_v45, %v1578_v33  ;;  %v3814_v21 = vpop.eup %3813  ;;  %v8216_v9 = vmul.f32 %v9766_v30, %v1917_v42  ;;  %v8219_v49 = vadd.f32 %v8006_v40, %v1579_v10  ;;  %v8222_v47 = vadd.f32 %v9933_v58, %v2556_v0  ;;  %v8229_v53 = vpop.permute.xlu0 %2091 }
 0x3f1   :  { %3827 = vrcp.f32 %v2745_v14  ;;  %v1979_v17 = vmul.f32 %v9963_v26, %v1901_v39  ;;  %v3535_v16 = vmul.f32 -1.442695, %v8202_v29  ;;  %v2403_v45 = vsel %vm2389_vm8, %v2352_v20, %v9964_v25 }
 0x3f2   :  { %v3816_v24 = vpop.eup %3815  ;;  %3829 = vrcp.f32 %v2750_v38  ;;  %v8231_v40 = vadd.f32 %v2042_v18, %v1826_v19  ;;  %v2156_v58 = vsel %vm2141_vm7, %v2106_v5, %v9965_v61  ;;  %v3536_v33 = vmul.f32 -1.442695, %v8222_v47 }
 0x3f3   :  { %v3818_v30 = vpop.eup %3817  ;;  %v2746_v2 = vadd.f32 1.0, %v3816_v24  ;;  %v2164_v10 = vsel %vm2141_vm7, %v9966_v7, %v2106_v5  ;;  %3831 = vpow2.f32 %v3535_v16  ;;  %v2411_v0 = vsel %vm2389_vm8, %v9967_v55, %v2352_v20  ;;  %v9968_v24 = vld [vmem:[#allocation39_spill] sm:$0xff] }
 0x3f4   :  { %v3820_v41 = vpop.eup %3819  ;;  %v8238_v43 = vmul.f32 %v3818_v30, %v8068_v31  ;;  %v2465_v42 = vmul.f32 %v6927_v54, %v2411_v0  ;;  %v2466_v18 = vmul.f32 %v9842_v27, %v2403_v45  ;;  %v2384_v31 = vpop.permute.xlu1 %2383  ;;  %v2751_v16 = vadd.f32 1.0, %v3812_v62 }
 0x3f5   :  { %v3822_v63 = vpop.eup %3821  ;;  %v8247_v38 = vmul.f32 %v3820_v41, %v8071_v51  ;;  %3833 = vrcp.f32 %v2746_v2  ;;  %v2395_v5 = vsel %vm2389_vm8, %v9964_v25, %v2384_v31  ;;  %v2419_v51 = vsel %vm2389_vm8, %v2384_v31, %v9967_v55  ;;  %v2124_v2 = vpop.permute.xlu0 %2123 }
 0x3f6   :  { %v3824_v39 = vpop.eup %3823  ;;  %v8252_v14 = vmul.f32 %v3822_v63, %v8090_v22  ;;  %3835 = vpow2.f32 %v3536_v33  ;;  %v2529_v26 = vmul.f32 %v9968_v24, %v2465_v42  ;;  %v2530_v22 = vmul.f32 %v9968_v24, %v2466_v18 }
 0x3f7   :  { %v3096_v19 = vadd.f32 %v8247_v38, %v8238_v43  ;;  %v8263_v20 = vmul.f32 %v3824_v39, %v8093_v3  ;;  %v2148_v25 = vsel %vm2141_vm7, %v9965_v61, %v8191_v50  ;;  %v2467_v45 = vmul.f32 %v9847_v35, %v2395_v5 }
 0x3f8   :  { %v2468_v30 = vmul.f32 %v9855_v44, %v2419_v51  ;;  %v2752_v33 = vadd.f32 1.0, %v3814_v21  ;;  %v2561_v41 = vadd.f32 %v2529_v26, %v8187_v13  ;;  %v2562_v55 = vadd.f32 %v2530_v22, %v2314_v34  ;;  %v2595_v0 = vpop.permute.xlu1 %2594 }
 0x3f9   :  { %3097 = vadd.xlane.f32.xlu0 %v3096_v19  ;;  %v2861_v3 = vadd.f32 %v8263_v20, %v8252_v14  ;;  %v3826_v62 = vpop.eup %3825  ;;  %v2043_v63 = vmul.f32 %v9962_v28, %v1979_v17  ;;  %v2221_v42 = vmul.f32 %v9939_v4, %v2164_v10  ;;  %v2531_v61 = vmul.f32 %v9968_v24, %v2467_v45  ;;  %v9969_v19 = vld [vmem:[#allocation101_spill] sm:$0xff]  ;;  %v2338_v45 = vpop.permute.xlu0 %2337 }
 0x3fa   :  { %v2532_v18 = vmul.f32 %v9968_v24, %v2468_v30  ;;  %v2222_v21 = vmul.f32 %v9950_v46, %v2156_v58  ;;  %v2172_v13 = vsel %vm2141_vm7, %v8191_v50, %v9966_v7  ;;  %v8285_v34 = vadd.f32 %v2595_v0, %v2561_v41  ;;  %v9970_v30 = vld [vmem:[#allocation197_spill] sm:$0xff] }
 0x3fb   :  { %v3828_v31 = vpop.eup %3827  ;;  %2862 = vadd.xlane.f32.xlu1 %v2861_v3  ;;  %v8287_v39 = vadd.f32 %v2595_v0, %v2562_v55  ;;  %3837 = vrcp.f32 %v2751_v16  ;;  %v2223_v10 = vmul.f32 %v9951_v56, %v2148_v25  ;;  %v2563_v5 = vadd.f32 %v2531_v61, %v8212_v12 }
 0x3fc   :  { %v3830_v17 = vpop.eup %3829  ;;  %v2564_v51 = vadd.f32 %v2532_v18, %v8195_v23  ;;  %3839 = vrcp.f32 %v2752_v33  ;;  %v3541_v58 = vmul.f32 -1.442695, %v8285_v34  ;;  %v2108_v50 = vpop.permute.xlu1 %2107  ;;  %v8296_v7 = vmul.f32 %v3826_v62, %v8105_v6 }
 0x3fd   :  { %2868 = vadd.xlane.f32.xlu0 %v9969_v19  ;;  %v3542_v24 = vmul.f32 -1.442695, %v8287_v39  ;;  %v3832_v26 = vpop.eup %3831  ;;  %v8299_v22 = vmul.f32 %v3828_v31, %v8120_v8  ;;  %v8301_v16 = vadd.f32 %v2595_v0, %v2563_v5  ;;  %v2157_v23 = vsel %vm2141_vm7, %v2108_v50, %v2124_v2 }
 0x3fe   :  { %v8303_v12 = vadd.f32 %v2595_v0, %v2564_v51  ;;  %v2747_v33 = vadd.f32 1.0, %v3832_v26  ;;  %3841 = vpow2.f32 %v3541_v58  ;;  %v2226_v6 = vmul.f32 %v9950_v46, %v2157_v23  ;;  %v9972_v51 = vld [vmem:[#allocation180_spill] sm:$0xff] }
 0x3ff   :  { %v3834_v25 = vpop.eup %3833  ;;  %3100 = vadd.xlane.f32.xlu1 %v9970_v30  ;;  %v8310_v3 = vmul.f32 %v3830_v17, %v8107_v15  ;;  %3843 = vpow2.f32 %v3542_v24  ;;  %v3543_v55 = vmul.f32 -1.442695, %v8301_v16  ;;  %v2224_v62 = vmul.f32 %v9942_v37, %v2172_v13  ;;  %v9971_v17 = vld [vmem:[#allocation125_spill] sm:$0xff] }
 0x400   :  { %v3836_v8 = vpop.eup %3835  ;;  %v8313_v41 = vmul.f32 %v3834_v25, %v8132_v52  ;;  %v3544_v0 = vmul.f32 -1.442695, %v8303_v12  ;;  %3845 = vrcp.f32 %v2747_v33  ;;  %v2290_v18 = vmul.f32 %v8020_v36, %v2226_v6  ;;  %v2140_v31 = vpop.permute.xlu1 %2139  ;;  %v9973_v25 = vld [vmem:[#allocation196_spill] sm:$0xff] }
 0x401   :  { %v2748_v61 = vadd.f32 1.0, %v3836_v8  ;;  %v2041_v15 = vmul.f32 %v9962_v28, %v8216_v9  ;;  %3847 = vpow2.f32 %v3543_v55  ;;  %v2149_v52 = vsel %vm2141_vm7, %v2124_v2, %v2140_v31  ;;  %v2370_v2 = vpop.permute.xlu0 %2369  ;;  %v9974_v55 = vld [vmem:[#allocation213_spill] sm:$0xff] }
 0x402   :  { %v2870_v46 = vadd.f32 %v8313_v41, %v8299_v22  ;;  %v2285_v5 = vmul.f32 %v9971_v17, %v2221_v42  ;;  %v8328_v13 = vadd.f32 %v2290_v18, %v8231_v40  ;;  %v2227_v19 = vmul.f32 %v9951_v56, %v2149_v52  ;;  %v9977_v52 = vld [vmem:[#allocation58_spill] sm:$0xff] }
 0x403   :  { %3103 = vadd.xlane.f32.xlu1 %v9972_v51  ;;  %3849 = vrcp.f32 %v2748_v61  ;;  %v2286_v58 = vmul.f32 %v9971_v17, %v2222_v21  ;;  %v2287_v9 = vmul.f32 %v9971_v17, %v2223_v10  ;;  %v2873_v24 = vadd.f32 %v8310_v3, %v8296_v7 }
 0x404   :  { %2871 = vadd.xlane.f32.xlu0 %v2870_v46  ;;  %3851 = vpow2.f32 %v3544_v0  ;;  %v1925_v42 = vsel %vm1893_vm6, %v8157_v1, %v9961_v48  ;;  %v2075_v40 = vadd.f32 %v2043_v63, %v8219_v49  ;;  %v2288_v26 = vmul.f32 %v9971_v17, %v2224_v62  ;;  %v2354_v21 = vpop.permute.xlu1 %2353  ;;  %v9975_v62 = vld [vmem:[#allocation212_spill] sm:$0xff]  ;;  %v9978_v17 = vld [vmem:[#allocation183_spill] sm:$0xff] }
 0x405   :  { %v2291_v56 = vmul.f32 %v8020_v36, %v2227_v19  ;;  %v3838_v23 = vpop.eup %3837  ;;  %v8343_v10 = vadd.f32 %v2041_v15, %v8205_v11  ;;  %v8347_v30 = vadd.f32 %v9973_v25, %v8031_v32  ;;  %v2404_v33 = vsel %vm2389_vm8, %v2354_v21, %v2370_v2  ;;  %v9976_v15 = vld [vmem:[#allocation216_spill] sm:$0xff] }
 0x406   :  { %v2412_v1 = vsel %vm2389_vm8, %v2338_v45, %v2354_v21  ;;  %v3840_v48 = vpop.eup %3839  ;;  %v2165_v49 = vsel %vm2141_vm7, %v8229_v53, %v2108_v50  ;;  %v2470_v6 = vmul.f32 %v9842_v27, %v2404_v33  ;;  %v1980_v32 = vmul.f32 %v9644_v57, %v1925_v42 }
 0x407   :  { %v8356_v63 = vadd.f32 %v2291_v56, %v2075_v40  ;;  %v2469_v11 = vmul.f32 %v6927_v54, %v2412_v1  ;;  %v2317_v8 = vadd.f32 %v2285_v5, %v8123_v60  ;;  %v2318_v0 = vadd.f32 %v2286_v58, %v9974_v55 }
 0x408   :  { %v2319_v61 = vadd.f32 %v2287_v9, %v9975_v62  ;;  %2874 = vadd.xlane.f32.xlu0 %v2873_v24  ;;  %v3842_v18 = vpop.eup %3841  ;;  %v2320_v46 = vadd.f32 %v2288_v26, %v9976_v15  ;;  %v8366_v50 = vmul.f32 %v3838_v23, %v9977_v52  ;;  %v2534_v19 = vmul.f32 %v9978_v17, %v2470_v6  ;;  %v2386_v40 = vpop.permute.xlu1 %2385 }
 0x409   :  { %v2533_v51 = vmul.f32 %v9978_v17, %v2469_v11  ;;  %v3844_v56 = vpop.eup %3843  ;;  %v2753_v57 = vadd.f32 1.0, %v3842_v18  ;;  %v2225_v60 = vmul.f32 %v9939_v4, %v2165_v49  ;;  %v2396_v5 = vsel %vm2389_vm8, %v2370_v2, %v2386_v40  ;;  %v2599_v24 = vpop.permute.xlu0 %2598 }
 0x40a   :  { %v2420_v58 = vsel %vm2389_vm8, %v2386_v40, %v2338_v45  ;;  %v3846_v9 = vpop.eup %3845  ;;  %v2754_v42 = vadd.f32 1.0, %v3844_v56  ;;  %v2566_v21 = vadd.f32 %v2534_v19, %v2318_v0  ;;  %v2471_v23 = vmul.f32 %v9847_v35, %v2396_v5 }
 0x40b   :  { %v2565_v26 = vadd.f32 %v2533_v51, %v2317_v8  ;;  %v3848_v25 = vpop.eup %3847  ;;  %v8377_v33 = vmul.f32 %v3846_v9, %v8202_v29  ;;  %3853 = vrcp.f32 %v2753_v57  ;;  %v2173_v4 = vsel %vm2141_vm7, %v2140_v31, %v8229_v53  ;;  %v9979_v29 = vld [vmem:[#allocation117_spill] sm:$0xff] }
 0x40c   :  { %v2472_v2 = vmul.f32 %v9855_v44, %v2420_v58  ;;  %v2755_v45 = vadd.f32 1.0, %v3848_v25  ;;  %3855 = vrcp.f32 %v2754_v42  ;;  %v2535_v49 = vmul.f32 %v9978_v17, %v2471_v23  ;;  %v2340_v11 = vpop.permute.xlu1 %2339 }
 0x40d   :  { %v3850_v1 = vpop.eup %3849  ;;  %v8384_v6 = vadd.f32 %v2599_v24, %v2565_v26  ;;  %v8390_v0 = vmul.f32 %v3840_v48, %v9979_v29  ;;  %v8393_v53 = vadd.f32 %v2599_v24, %v2566_v21  ;;  %v2228_v51 = vmul.f32 %v9942_v37, %v2173_v4  ;;  %v2372_v40 = vpop.permute.xlu0 %2371  ;;  %v9981_v21 = vld [vmem:[#allocation92_spill] sm:$0xff] }
 0x40e   :  { %v3852_v8 = vpop.eup %3851  ;;  %v8387_v55 = vmul.f32 %v3850_v1, %v8222_v47  ;;  %v2536_v62 = vmul.f32 %v9978_v17, %v2472_v2  ;;  %3857 = vrcp.f32 %v2755_v45  ;;  %v2567_v18 = vadd.f32 %v2535_v49, %v2319_v61 }
 0x40f   :  { %v2756_v31 = vadd.f32 1.0, %v3852_v8  ;;  %v3545_v15 = vmul.f32 -1.442695, %v8384_v6  ;;  %v3546_v47 = vmul.f32 -1.442695, %v8393_v53  ;;  %v2044_v48 = vmul.f32 %v9962_v28, %v1980_v32 }
 0x410   :  { %v3105_v52 = vadd.f32 %v8387_v55, %v8377_v33  ;;  %v2568_v19 = vadd.f32 %v2536_v62, %v2320_v46  ;;  %v2289_v17 = vmul.f32 %v8020_v36, %v2225_v60  ;;  %v2356_v56 = vpop.permute.xlu1 %2355  ;;  %v8402_v57 = vadd.f32 %v2599_v24, %v2567_v18  ;;  %v9980_v60 = vld [vmem:[#allocation219_spill] sm:$0xff] }
 0x411   :  { %3859 = vrcp.f32 %v2756_v31  ;;  %v3108_v61 = vadd.f32 %v8390_v0, %v8366_v50  ;;  %v2405_v5 = vsel %vm2389_vm8, %v2356_v56, %v2372_v40  ;;  %v2413_v37 = vsel %vm2389_vm8, %v2340_v11, %v2356_v56  ;;  %v2603_v8 = vpop.permute.xlu0 %2602 }
 0x412   :  { %3106 = vadd.xlane.f32.xlu1 %v3105_v52  ;;  %3861 = vpow2.f32 %v3545_v15  ;;  %v2473_v46 = vmul.f32 %v6927_v54, %v2413_v37  ;;  %v2474_v28 = vmul.f32 %v9842_v27, %v2405_v5  ;;  %v8412_v32 = vadd.f32 %v2599_v24, %v2568_v19 }
 0x413   :  { %3863 = vpow2.f32 %v3546_v47  ;;  %v1828_v58 = vadd.f32 %v9980_v60, %v8347_v30  ;;  %v2292_v9 = vmul.f32 %v8020_v36, %v2228_v51  ;;  %v3547_v42 = vmul.f32 -1.442695, %v8402_v57 }
 0x414   :  { %v2321_v26 = vadd.f32 %v2289_v17, %v8343_v10  ;;  %v2537_v23 = vmul.f32 %v9981_v21, %v2473_v46  ;;  %v2538_v25 = vmul.f32 %v9981_v21, %v2474_v28  ;;  %v2388_v4 = vpop.permute.xlu1 %2387  ;;  %v3548_v54 = vmul.f32 -1.442695, %v8412_v32 }
 0x415   :  { %v3854_v27 = vpop.eup %3853  ;;  %v2076_v2 = vadd.f32 %v2044_v48, %v1828_v58  ;;  %v2397_v24 = vsel %vm2389_vm8, %v2372_v40, %v2388_v4  ;;  %v2421_v36 = vsel %vm2389_vm8, %v2388_v4, %v2340_v11  ;;  %3865 = vpow2.f32 %v3547_v42 }
 0x416   :  { %3109 = vadd.xlane.f32.xlu1 %v3108_v61  ;;  %v3856_v30 = vpop.eup %3855  ;;  %v2569_v1 = vadd.f32 %v2537_v23, %v2321_v26  ;;  %v2570_v10 = vadd.f32 %v2538_v25, %v8328_v13  ;;  %v2475_v45 = vmul.f32 %v9847_v35, %v2397_v24  ;;  %v2476_v49 = vmul.f32 %v9855_v44, %v2421_v36 }
 0x417   :  { %v2324_v29 = vadd.f32 %v2292_v9, %v2076_v2  ;;  %v8430_v62 = vmul.f32 %v3854_v27, %v8285_v34  ;;  %v8433_v31 = vmul.f32 %v3856_v30, %v8287_v39  ;;  %3867 = vpow2.f32 %v3548_v54 }
 0x418   :  { %v3858_v59 = vpop.eup %3857  ;;  %v2539_v11 = vmul.f32 %v9981_v21, %v2475_v45  ;;  %v2540_v18 = vmul.f32 %v9981_v21, %v2476_v49  ;;  %v2633_v15 = vadd.f32 %v2603_v8, %v2569_v1  ;;  %v2634_v13 = vadd.f32 %v2603_v8, %v2570_v10 }
 0x419   :  { %v2876_v35 = vadd.f32 %v8433_v31, %v8430_v62  ;;  %v8440_v44 = vmul.f32 %v3858_v59, %v8301_v16 }
 0x41a   :  { %v2571_v34 = vadd.f32 %v2539_v11, %v8356_v63  ;;  %v2572_v51 = vadd.f32 %v2540_v18, %v2324_v29  ;;  %v3549_v39 = vmul.f32 -1.442695, %v2633_v15  ;;  %v3550_v19 = vmul.f32 -1.442695, %v2634_v13 }
 0x41b   :  { %v3860_v52 = vpop.eup %3859  ;;  %2877 = vadd.xlane.f32.xlu0 %v2876_v35 }
 0x41c   :  { %v3862_v47 = vpop.eup %3861  ;;  %v8444_v40 = vmul.f32 %v3860_v52, %v8303_v12  ;;  %3869 = vpow2.f32 %v3549_v39  ;;  %v2635_v56 = vadd.f32 %v2603_v8, %v2571_v34  ;;  %v2636_v61 = vadd.f32 %v2603_v8, %v2572_v51  ;;  %v2866_v52 = vpop.xlane.xlu0 %2865 }
 0x41d   :  { %v3864_v48 = vpop.eup %3863  ;;  %v2757_v17 = vadd.f32 1.0, %v3862_v47  ;;  %3871 = vpow2.f32 %v3550_v19 }
 0x41e   :  { %v3111_v16 = vadd.f32 %v8444_v40, %v8440_v44  ;;  %v2758_v5 = vadd.f32 1.0, %v3864_v48  ;;  %v3551_v63 = vmul.f32 -1.442695, %v2635_v56  ;;  %v3552_v37 = vmul.f32 -1.442695, %v2636_v61 }
 0x41f   :  { %3873 = vrcp.f32 %v2757_v17  ;;  %v3866_v46 = vpop.eup %3865 }
 0x420   :  { %3112 = vadd.xlane.f32.xlu1 %v3111_v16  ;;  %3875 = vrcp.f32 %v2758_v5  ;;  %v2759_v28 = vadd.f32 1.0, %v3866_v46  ;;  %v2886_v16 = vmul.f32 0.00390625, %v2866_v52 }
 0x421   :  { %3877 = vpow2.f32 %v3551_v63  ;;  %v3868_v12 = vpop.eup %3867 }
 0x422   :  { %3879 = vpow2.f32 %v3552_v37  ;;  %v2760_v60 = vadd.f32 1.0, %v3868_v12  ;;  %v2895_v37 = vld [vmem:[%s8669_s5 + $0x10] sm:$0xff] }
 0x423   :  { %3881 = vrcp.f32 %v2759_v28 }
 0x424   :  { %3883 = vrcp.f32 %v2760_v60 }
 0x426   :  { %v3870_v58 = vpop.eup %3869 }
 0x427   :  { %v3872_v9 = vpop.eup %3871  ;;  %v2761_v42 = vadd.f32 1.0, %v3870_v58 }
 0x428   :  { %v2762_v21 = vadd.f32 1.0, %v3872_v9 }
 0x429   :  { %v3874_v26 = vpop.eup %3873  ;;  %3885 = vrcp.f32 %v2761_v42 }
 0x42a   :  { %v3876_v23 = vpop.eup %3875  ;;  %v8449_v25 = vmul.f32 %v3874_v26, %v8384_v6  ;;  %3887 = vrcp.f32 %v2762_v21  ;;  %v2896_v26 = vld [vmem:[%s8669_s5 + $0x18] sm:$0xff] }
 0x42b   :  { %v3878_v4 = vpop.eup %3877  ;;  %v8452_v54 = vmul.f32 %v3876_v23, %v8393_v53 }
 0x42c   :  { %v3880_v27 = vpop.eup %3879  ;;  %v2763_v2 = vadd.f32 1.0, %v3878_v4 }
 0x42d   :  { %v3882_v24 = vpop.eup %3881  ;;  %v2879_v36 = vadd.f32 %v8452_v54, %v8449_v25  ;;  %v2764_v30 = vadd.f32 1.0, %v3880_v27  ;;  %v2897_v27 = vld [vmem:[%s8669_s5 + $0x20] sm:$0xff] }
 0x42e   :  { %v8457_v1 = vmul.f32 %v3882_v24, %v8402_v57  ;;  %3889 = vrcp.f32 %v2763_v2  ;;  %v3884_v10 = vpop.eup %3883 }
 0x42f   :  { %2880 = vadd.xlane.f32.xlu0 %v2879_v36  ;;  %3891 = vrcp.f32 %v2764_v30  ;;  %v8460_v6 = vmul.f32 %v3884_v10, %v8412_v32 }
 0x431   :  { %v3114_v53 = vadd.f32 %v8460_v6, %v8457_v1 }
 0x433   :  { %v3886_v45 = vpop.eup %3885  ;;  %3115 = vadd.xlane.f32.xlu1 %v3114_v53 }
 0x434   :  { %v3888_v49 = vpop.eup %3887  ;;  %v8464_v8 = vmul.f32 %v3886_v45, %v2633_v15 }
 0x435   :  { %v8466_v29 = vmul.f32 %v3888_v49, %v2634_v13 }
 0x437   :  { %v2882_v57 = vadd.f32 %v8466_v29, %v8464_v8 }
 0x438   :  { %v3890_v59 = vpop.eup %3889 }
 0x439   :  { %v3892_v11 = vpop.eup %3891  ;;  %v8470_v18 = vmul.f32 %v3890_v59, %v2635_v56  ;;  %2883 = vadd.xlane.f32.xlu0 %v2882_v57  ;;  %v2893_v56 = vld [vmem:[%s8669_s5] sm:$0xff]  ;;  %v2898_v57 = vld [vmem:[%s8669_s5 + $0x28] sm:$0xff] }
 0x43a   :  { %v8472_v32 = vmul.f32 %v3892_v11, %v2636_v61  ;;  %v2894_v61 = vld [vmem:[%s8669_s5 + $0x8] sm:$0xff] }
 0x43b   :  { %v2902_v58 = vmul.f32 %v2894_v61, %v2886_v16 }
 0x43c   :  { %v3117_v35 = vadd.f32 %v8472_v32, %v8470_v18 }
 0x43d   :  { %v2911_v45 = vsel %vm2909_vm9, %v2902_v58, 0.0 }
 0x43e   :  { %3118 = vadd.xlane.f32.xlu1 %v3117_v35 }
 0x486   :  { %v3098_v15 = vpop.xlane.xlu0 %3097 }
 0x487   :  { %v3120_v9 = vmul.f32 0.00390625, %v3098_v15 }
 0x488   :  { %v2863_v34 = vpop.xlane.xlu1 %2862 }
 0x489   :  { %v2885_v17 = vmul.f32 0.00390625, %v2863_v34  ;;  %v3128_v49 = vmul.f32 %v3120_v9, %v2893_v56 }
 0x48a   :  { %v2869_v13 = vpop.xlane.xlu0 %2868 }
 0x48b   :  { %v2887_v5 = vmul.f32 0.00390625, %v2869_v13  ;;  %v2901_v12 = vmul.f32 %v2893_v56, %v2885_v17  ;;  %v2899_v13 = vld [vmem:[%s8669_s5 + $0x30] sm:$0xff]  ;;  %v3136_v16 = vsel %vm2909_vm9, %v3128_v49, 0.0 }
 0x48c   :  { %v3101_v51 = vpop.xlane.xlu1 %3100 }
 0x48d   :  { %v3121_v63 = vmul.f32 0.00390625, %v3101_v51  ;;  %v2903_v21 = vmul.f32 %v2895_v37, %v2887_v5  ;;  %v2910_v36 = vsel %vm2909_vm9, %v2901_v12, 0.0 }
 0x48e   :  { %v2912_v15 = vadd.f32 %v2911_v45, %v2910_v36 }
 0x48f   :  { %v3129_v4 = vmul.f32 %v3121_v63, %v2894_v61  ;;  %v2913_v11 = vsel %vm2909_vm9, %v2903_v21, 0.0  ;;  %v2900_v21 = vld [vmem:[%s8669_s5 + $0x38] sm:$0xff] }
 0x490   :  { %v3104_v39 = vpop.xlane.xlu1 %3103  ;;  %v2914_v56 = vadd.f32 %v2913_v11, %v2912_v15 }
 0x491   :  { %v2872_v19 = vpop.xlane.xlu0 %2871  ;;  %v3122_v42 = vmul.f32 0.00390625, %v3104_v39  ;;  %v3137_v51 = vsel %vm2909_vm9, %v3129_v4, 0.0 }
 0x492   :  { %v2888_v60 = vmul.f32 0.00390625, %v2872_v19 }
 0x493   :  { %v3130_v59 = vmul.f32 %v3122_v42, %v2895_v37 }
 0x494   :  { %v2904_v30 = vmul.f32 %v2896_v26, %v2888_v60 }
 0x495   :  { %v2875_v48 = vpop.xlane.xlu0 %2874  ;;  %v3139_v61 = vsel %vm2909_vm9, %v3130_v59, 0.0 }
 0x496   :  { %v2889_v23 = vmul.f32 0.00390625, %v2875_v48  ;;  %v2915_v19 = vsel %vm2909_vm9, %v2904_v30, 0.0 }
 0x497   :  { %v2916_v12 = vadd.f32 %v2915_v19, %v2914_v56 }
 0x498   :  { %v2905_v35 = vmul.f32 %v2897_v27, %v2889_v23 }
 0x49a   :  { %v2917_v5 = vsel %vm2909_vm9, %v2905_v35, 0.0 }
 0x49f   :  { %v3107_v47 = vpop.xlane.xlu1 %3106 }
 0x4a0   :  { %v3123_v10 = vmul.f32 0.00390625, %v3107_v47 }
 0x4a2   :  { %v3131_v47 = vmul.f32 %v3123_v10, %v2896_v26  ;;  %v2918_v26 = vadd.f32 %v2917_v5, %v2916_v12 }
 0x4a3   :  { %v3110_v46 = vpop.xlane.xlu1 %3109 }
 0x4a4   :  { %v3124_v52 = vmul.f32 0.00390625, %v3110_v46  ;;  %v3141_v60 = vsel %vm2909_vm9, %v3131_v47, 0.0 }
 0x4a6   :  { %v3132_v63 = vmul.f32 %v3124_v52, %v2897_v27 }
 0x4a8   :  { %v2878_v28 = vpop.xlane.xlu0 %2877  ;;  %v3143_v4 = vsel %vm2909_vm9, %v3132_v63, 0.0  ;;  %v2931_v63 = vld [vmem:[%s8670_s6] sm:$0x1]  ;;  %s4009_s6 = scalar_lea.vmem %s3460_s25, 1024 }
 0x4a9   :  { %v2890_v53 = vmul.f32 0.00390625, %v2878_v28  ;;  %v3138_v28 = vadd.f32 %v3137_v51, %v3136_v16  ;;  %p4010_p0 = scmp.ne.s32.totalorder %s3460_s25, %s4009_s6  ;;  %p4015_p2 = scmp.lt.s32.totalorder %s4009_s6, %s4009_s6 }
 0x4ab   :  { %v2906_v48 = vmul.f32 %v2898_v57, %v2890_v53  ;;  %v3140_v42 = vadd.f32 %v3139_v61, %v3138_v28  ;;  %p4016_p3 = por %p4015_p2, %p4014_p1 }
 0x4ad   :  { %v3113_v2 = vpop.xlane.xlu1 %3112  ;;  %v2919_v58 = vsel %vm2909_vm9, %v2906_v48, 0.0  ;;  %v3142_v36 = vadd.f32 %v3141_v60, %v3140_v42  ;;  %p4017_p4 = pnand %p4016_p3, %p4010_p0 }
 0x4ae   :  { %v3125_v17 = vmul.f32 0.00390625, %v3113_v2  ;;  %v2920_v30 = vadd.f32 %v2919_v58, %v2918_v26 }
 0x4af   :  { %v3144_v45 = vadd.f32 %v3143_v4, %v3142_v36  ;;  %v2940_v36 = vld [vmem:[%s8671_s7] sm:$0xff] }
 0x4b0   :  { %v3133_v9 = vmul.f32 %v3125_v17, %v2898_v57 }
 0x4b2   :  { %v3145_v10 = vsel %vm2909_vm9, %v3133_v9, 0.0 }
 0x4b3   :  { %v3146_v52 = vadd.f32 %v3145_v10, %v3144_v45 }
 0x4bc   :  { %v2881_v24 = vpop.xlane.xlu0 %2880 }
 0x4bd   :  { %v2891_v34 = vmul.f32 0.00390625, %v2881_v24 }
 0x4bf   :  { %v2907_v37 = vmul.f32 %v2899_v13, %v2891_v34 }
 0x4c0   :  { %v3116_v39 = vpop.xlane.xlu1 %3115 }
 0x4c1   :  { %v3126_v46 = vmul.f32 0.00390625, %v3116_v39  ;;  %v2921_v27 = vsel %vm2909_vm9, %v2907_v37, 0.0 }
 0x4c2   :  { %v2922_v49 = vadd.f32 %v2921_v27, %v2920_v30  ;;  %v9982_v30 = vld [vmem:[#allocation223_spill] sm:$0xff] }
 0x4c3   :  { %v3134_v2 = vmul.f32 %v3126_v46, %v2899_v13 }
 0x4c5   :  { %v3147_v57 = vsel %vm2909_vm9, %v3134_v2, 0.0 }
 0x4c6   :  { %v2884_v23 = vpop.xlane.xlu0 %2883  ;;  %v3148_v51 = vadd.f32 %v3147_v57, %v3146_v52  ;;  %v2943_v52 = vld [vmem:[%s8671_s7 + $0x18] sm:$0xff] }
 0x4c7   :  { %v2892_v24 = vmul.f32 0.00390625, %v2884_v23 }
 0x4c9   :  { %v2908_v53 = vmul.f32 %v2900_v21, %v2892_v24  ;;  %v2941_v24 = vld [vmem:[%s8671_s7 + $0x8] sm:$0xff] }
 0x4cb   :  { %v3119_v59 = vpop.xlane.xlu1 %3118  ;;  %v2923_v11 = vsel %vm2909_vm9, %v2908_v53, 0.0 }
 0x4cc   :  { %v3127_v35 = vmul.f32 0.00390625, %v3119_v59  ;;  %v2924_v34 = vadd.f32 %v2923_v11, %v2922_v49 }
 0x4ce   :  { %v3135_v15 = vmul.f32 %v3127_v35, %v2900_v21  ;;  %v2925_v39 = vrot.slane %v2924_v34, 4 }
 0x4d0   :  { %v3149_v13 = vsel %vm2909_vm9, %v3135_v15, 0.0  ;;  %v2926_v19 = vadd.f32 %v2925_v39, %v2924_v34  ;;  %v2942_v34 = vld [vmem:[%s8671_s7 + $0x10] sm:$0xff] }
 0x4d1   :  { %v3150_v47 = vadd.f32 %v3149_v13, %v3148_v51 }
 0x4d2   :  { %v2927_v48 = vrot.slane %v2926_v19, 2 }
 0x4d3   :  { %v3151_v17 = vrot.slane %v3150_v47, 4 }
 0x4d4   :  { %v2928_v16 = vadd.f32 %v2927_v48, %v2926_v19 }
 0x4d5   :  { %v3152_v56 = vadd.f32 %v3151_v17, %v3150_v47 }
 0x4d6   :  { %v2929_v61 = vrot.slane %v2928_v16, 1 }
 0x4d7   :  { %v3153_v5 = vrot.slane %v3152_v56, 2 }
 0x4d8   :  { %v2930_v37 = vadd.f32 %v2929_v61, %v2928_v16  ;;  %v2945_v61 = vld [vmem:[%s8671_s7 + $0x28] sm:$0xff] }
 0x4d9   :  { %v3154_v46 = vadd.f32 %v3153_v5, %v3152_v56  ;;  %v2944_v5 = vld [vmem:[%s8671_s7 + $0x20] sm:$0xff] }
 0x4da   :  { %v2932_v28 = vadd.f32 %v2931_v63, %v2930_v37 }
 0x4db   :  { %v3155_v12 = vrot.slane %v3154_v46, 1 }
 0x4dc   :  { %v3553_v60 = vmul.f32 -1.442695, %v2932_v28 }
 0x4dd   :  { %v3156_v58 = vadd.f32 %v3155_v12, %v3154_v46 }
 0x4de   :  { %3893 = vpow2.f32 %v3553_v60 }
 0x4df   :  { %v3157_v9 = vadd.f32 %v3156_v58, %v2931_v63 }
 0x4e1   :  { %v3562_v42 = vmul.f32 -1.442695, %v3157_v9 }
 0x4e3   :  { %3895 = vpow2.f32 %v3562_v42  ;;  %v2947_v42 = vld [vmem:[%s8671_s7 + $0x38] sm:$0xff] }
 0x4e8   :  { %v3894_v26 = vpop.eup %3893 }
 0x4e9   :  { %v2936_v21 = vadd.f32 1.0, %v3894_v26  ;;  %v2946_v26 = vld [vmem:[%s8671_s7 + $0x30] sm:$0xff] }
 0x4eb   :  { %3897 = vrcp.f32 %v2936_v21 }
 0x4ed   :  { %v3896_v23 = vpop.eup %3895 }
 0x4ee   :  { %v3161_v4 = vadd.f32 1.0, %v3896_v23 }
 0x4f0   :  { %3899 = vrcp.f32 %v3161_v4 }
 0x4f5   :  { %v3898_v27 = vpop.eup %3897 }
 0x4f6   :  { %v2939_v2 = vmul.f32 %v3898_v27, %v2932_v28 }
 0x4f8   :  { %v2951_v10 = vrot.slane %v2939_v2, %v9982_v30 }
 0x4fa   :  { %v3900_v53 = vpop.eup %3899  ;;  %v2953_v49 = vmul.f32 %v2951_v10, %v2941_v24  ;;  %v2952_v59 = vmul.f32 %v2951_v10, %v2940_v36  ;;  %v2955_v19 = vmul.f32 %v2951_v10, %v2943_v52  ;;  %v2954_v47 = vmul.f32 %v2951_v10, %v2942_v34 }
 0x4fb   :  { %v3164_v45 = vmul.f32 %v3900_v53, %v3157_v9  ;;  %v2957_v46 = vmul.f32 %v2951_v10, %v2945_v61  ;;  %v2956_v28 = vmul.f32 %v2951_v10, %v2944_v5  ;;  %v2959_v4 = vmul.f32 %v2951_v10, %v2947_v42 }
 0x4fc   :  { %v2963_v11 = vsel %vm2909_vm9, %v2953_v49, 0.0  ;;  %v2960_v35 = vsel %vm2909_vm9, %v2952_v59, 0.0  ;;  %v2969_v48 = vsel %vm2909_vm9, %v2955_v19, 0.0  ;;  %v2966_v17 = vsel %vm2909_vm9, %v2954_v47, 0.0 }
 0x4fd   :  { %v3168_v57 = vrot.slane %v3164_v45, %v9982_v30  ;;  %2964 = vadd.xlane.f32.xlu1 %v2963_v11  ;;  %2961 = vadd.xlane.f32.xlu0 %v2960_v35  ;;  %v2975_v12 = vsel %vm2909_vm9, %v2957_v46, 0.0  ;;  %v2972_v60 = vsel %vm2909_vm9, %v2956_v28, 0.0  ;;  %v2958_v27 = vmul.f32 %v2951_v10, %v2946_v26  ;;  %v3993_v10 = vld [vmem:[%s8668_s4 + $0x8] sm:$0xff]  ;;  %v3994_v35 = vld [vmem:[%s8668_s4] sm:$0xff] }
 0x4fe   :  { %v2981_v2 = vsel %vm2909_vm9, %v2959_v4, 0.0 }
 0x4ff   :  { %v3170_v15 = vmul.f32 %v3168_v57, %v2941_v24  ;;  %v3169_v51 = vmul.f32 %v3168_v57, %v2940_v36  ;;  %v3172_v16 = vmul.f32 %v3168_v57, %v2943_v52  ;;  %v3171_v56 = vmul.f32 %v3168_v57, %v2942_v34 }
 0x500   :  { %v3174_v58 = vmul.f32 %v3168_v57, %v2945_v61  ;;  %v3173_v9 = vmul.f32 %v3168_v57, %v2944_v5  ;;  %v2978_v24 = vsel %vm2909_vm9, %v2958_v27, 0.0  ;;  %v3176_v36 = vmul.f32 %v3168_v57, %v2947_v42  ;;  %v3996_v61 = vld [vmem:[%s8668_s4 + $0x10] sm:$0xff] }
 0x501   :  { %v3180_v39 = vsel %vm2909_vm9, %v3170_v15, 0.0  ;;  %v3177_v13 = vsel %vm2909_vm9, %v3169_v51, 0.0  ;;  %v3186_v63 = vsel %vm2909_vm9, %v3172_v16, 0.0  ;;  %v3183_v37 = vsel %vm2909_vm9, %v3171_v56, 0.0  ;;  %v3995_v16 = vld [vmem:[%s8668_s4 + $0x18] sm:$0xff] }
 0x502   :  { %3181 = vadd.xlane.f32.xlu1 %v3180_v39  ;;  %3178 = vadd.xlane.f32.xlu0 %v3177_v13  ;;  %v3192_v21 = vsel %vm2909_vm9, %v3174_v58, 0.0  ;;  %v3189_v23 = vsel %vm2909_vm9, %v3173_v9, 0.0  ;;  %v3175_v30 = vmul.f32 %v3168_v57, %v2946_v26  ;;  %v3198_v53 = vsel %vm2909_vm9, %v3176_v36, 0.0 }
 0x504   :  { %v3195_v45 = vsel %vm2909_vm9, %v3175_v30, 0.0 }
 0x506   :  { %2970 = vadd.xlane.f32.xlu1 %v2969_v48  ;;  %2967 = vadd.xlane.f32.xlu0 %v2966_v17 }
 0x50a   :  { %3187 = vadd.xlane.f32.xlu1 %v3186_v63  ;;  %3184 = vadd.xlane.f32.xlu0 %v3183_v37 }
 0x50e   :  { %2976 = vadd.xlane.f32.xlu1 %v2975_v12  ;;  %2973 = vadd.xlane.f32.xlu0 %v2972_v60 }
 0x512   :  { %3193 = vadd.xlane.f32.xlu1 %v3192_v21  ;;  %3190 = vadd.xlane.f32.xlu0 %v3189_v23  ;;  %v3997_v23 = vld [vmem:[%s8668_s4 + $0x28] sm:$0xff] }
 0x516   :  { %2982 = vadd.xlane.f32.xlu1 %v2981_v2  ;;  %2979 = vadd.xlane.f32.xlu0 %v2978_v24 }
 0x51a   :  { %3199 = vadd.xlane.f32.xlu1 %v3198_v53  ;;  %3196 = vadd.xlane.f32.xlu0 %v3195_v45 }
 0x58a   :  { %v2965_v49 = vpop.xlane.xlu1 %2964  ;;  %v2962_v59 = vpop.xlane.xlu0 %2961 }
 0x58b   :  { %v2985_v11 = vadd.f32 %v3993_v10, %v2965_v49  ;;  %v2984_v57 = vadd.f32 %v3994_v35, %v2962_v59 }
 0x58d   :  { %v3555_v52 = vmul.f32 -1.442695, %v2985_v11  ;;  %v3554_v34 = vmul.f32 -1.442695, %v2984_v57  ;;  %v3998_v11 = vld [vmem:[%s8668_s4 + $0x20] sm:$0xff] }
 0x58f   :  { %v3182_v15 = vpop.xlane.xlu1 %3181  ;;  %v3179_v51 = vpop.xlane.xlu0 %3178  ;;  %3901 = vpow2.f32 %v3555_v52 }
 0x590   :  { %v3202_v39 = vadd.f32 %v3993_v10, %v3182_v15  ;;  %v3201_v13 = vadd.f32 %v3994_v35, %v3179_v51  ;;  %3903 = vpow2.f32 %v3554_v34 }
 0x592   :  { %v3564_v19 = vmul.f32 -1.442695, %v3202_v39  ;;  %v3563_v47 = vmul.f32 -1.442695, %v3201_v13 }
 0x593   :  { %v2971_v48 = vpop.xlane.xlu1 %2970  ;;  %v2968_v17 = vpop.xlane.xlu0 %2967 }
 0x594   :  { %3905 = vpow2.f32 %v3564_v19  ;;  %v2987_v56 = vadd.f32 %v3995_v16, %v2971_v48  ;;  %v2986_v5 = vadd.f32 %v3996_v61, %v2968_v17  ;;  %v3999_v19 = vld [vmem:[%s8668_s4 + $0x38] sm:$0xff] }
 0x595   :  { %3907 = vpow2.f32 %v3563_v47 }
 0x596   :  { %v3557_v63 = vmul.f32 -1.442695, %v2987_v56  ;;  %v3556_v37 = vmul.f32 -1.442695, %v2986_v5 }
 0x597   :  { %v3188_v46 = vpop.xlane.xlu1 %3187  ;;  %v3185_v28 = vpop.xlane.xlu0 %3184 }
 0x598   :  { %3909 = vpow2.f32 %v3556_v37  ;;  %v3203_v12 = vadd.f32 %v3996_v61, %v3185_v28  ;;  %v3204_v27 = vadd.f32 %v3995_v16, %v3188_v46  ;;  %v4000_v46 = vld [vmem:[%s8668_s4 + $0x30] sm:$0xff] }
 0x599   :  { %v3902_v60 = vpop.eup %3901  ;;  %3911 = vpow2.f32 %v3557_v63 }
 0x59a   :  { %v3904_v58 = vpop.eup %3903  ;;  %v3017_v9 = vadd.f32 1.0, %v3902_v60  ;;  %v3565_v2 = vmul.f32 -1.442695, %v3203_v12  ;;  %v3566_v10 = vmul.f32 -1.442695, %v3204_v27 }
 0x59b   :  { %v2977_v42 = vpop.xlane.xlu1 %2976  ;;  %v2974_v26 = vpop.xlane.xlu0 %2973  ;;  %v3016_v21 = vadd.f32 1.0, %v3904_v58 }
 0x59c   :  { %v2989_v4 = vadd.f32 %v3997_v23, %v2977_v42  ;;  %3913 = vrcp.f32 %v3017_v9  ;;  %v2988_v35 = vadd.f32 %v3998_v11, %v2974_v26 }
 0x59d   :  { %3915 = vrcp.f32 %v3016_v21 }
 0x59e   :  { %v3906_v24 = vpop.eup %3905  ;;  %v3559_v36 = vmul.f32 -1.442695, %v2989_v4  ;;  %v3558_v48 = vmul.f32 -1.442695, %v2988_v35 }
 0x59f   :  { %v3908_v30 = vpop.eup %3907  ;;  %v3194_v53 = vpop.xlane.xlu1 %3193  ;;  %v3234_v57 = vadd.f32 1.0, %v3906_v24 }
 0x5a0   :  { %v3191_v45 = vpop.xlane.xlu0 %3190  ;;  %v3233_v49 = vadd.f32 1.0, %v3908_v30  ;;  %3917 = vpow2.f32 %v3559_v36  ;;  %v3206_v59 = vadd.f32 %v3997_v23, %v3194_v53 }
 0x5a1   :  { %3919 = vpow2.f32 %v3565_v2  ;;  %v3205_v13 = vadd.f32 %v3998_v11, %v3191_v45 }
 0x5a2   :  { %3921 = vrcp.f32 %v3233_v49  ;;  %v3568_v52 = vmul.f32 -1.442695, %v3206_v59  ;;  %v3910_v34 = vpop.eup %3909 }
 0x5a3   :  { %v2983_v15 = vpop.xlane.xlu1 %2982  ;;  %v3912_v39 = vpop.eup %3911  ;;  %v3018_v17 = vadd.f32 1.0, %v3910_v34  ;;  %v3567_v37 = vmul.f32 -1.442695, %v3205_v13 }
 0x5a4   :  { %v2980_v51 = vpop.xlane.xlu0 %2979  ;;  %3923 = vpow2.f32 %v3568_v52  ;;  %v2991_v47 = vadd.f32 %v3999_v19, %v2983_v15  ;;  %v3019_v61 = vadd.f32 1.0, %v3912_v39 }
 0x5a5   :  { %3925 = vpow2.f32 %v3566_v10  ;;  %v2990_v28 = vadd.f32 %v4000_v46, %v2980_v51 }
 0x5a6   :  { %3927 = vrcp.f32 %v3234_v57  ;;  %v3561_v16 = vmul.f32 -1.442695, %v2991_v47  ;;  %v3914_v56 = vpop.eup %3913 }
 0x5a7   :  { %v3200_v5 = vpop.xlane.xlu1 %3199  ;;  %v3916_v63 = vpop.eup %3915  ;;  %3047 = vperm.xlu1 %3629, %v3914_v56   ;;  %v3560_v23 = vmul.f32 -1.442695, %v2990_v28 }
 0x5a8   :  { %3929 = vpow2.f32 %v3561_v16  ;;  %v3208_v12 = vadd.f32 %v3999_v19, %v3200_v5  ;;  %v3197_v60 = vpop.xlane.xlu0 %3196  ;;  %3042 = vperm.xlu0 %3628, %v3916_v63  }
 0x5a9   :  { %3931 = vpow2.f32 %v3558_v48  ;;  %v3207_v4 = vadd.f32 %v4000_v46, %v3197_v60  ;;  %v9983_v46 = vmov 0   ;;  %v3332_v60 = vld [vmem:[%s8673_s9 + $0x8] sm:$0xff] }
 0x5aa   :  { %v3918_v58 = vpop.eup %3917  ;;  %3933 = vrcp.f32 %v3018_v17  ;;  %v3570_v9 = vmul.f32 -1.442695, %v3208_v12 }
 0x5ab   :  { %v3920_v42 = vpop.eup %3919  ;;  %3935 = vrcp.f32 %v3019_v61  ;;  %v3021_v26 = vadd.f32 1.0, %v3918_v58  ;;  %v3569_v53 = vmul.f32 -1.442695, %v3207_v4  ;;  %v3331_v58 = vld [vmem:[%s8673_s9] sm:$0xff] }
 0x5ac   :  { %v3922_v21 = vpop.eup %3921  ;;  %3937 = vpow2.f32 %v3567_v37  ;;  %v3235_v2 = vadd.f32 1.0, %v3920_v42  ;;  %v9984_v42 = vld [vmem:[#allocation91_spill] sm:$0xff] }
 0x5ad   :  { %3939 = vrcp.f32 %v3021_v26  ;;  %3259 = vperm.xlu1 %3629, %v3922_v21   ;;  %v9985_v21 = vld [vmem:[#allocation169_spill] sm:$0xff] }
 0x5ae   :  { %v3924_v27 = vpop.eup %3923  ;;  %3941 = vpow2.f32 %v3570_v9 }
 0x5af   :  { %v3926_v24 = vpop.eup %3925  ;;  %v3238_v36 = vadd.f32 1.0, %v3924_v27  ;;  %3943 = vpow2.f32 %v3560_v23 }
 0x5b0   :  { %v3928_v30 = vpop.eup %3927  ;;  %v3236_v49 = vadd.f32 1.0, %v3926_v24 }
 0x5b1   :  { %3945 = vrcp.f32 %v3238_v36  ;;  %3264 = vperm.xlu1 %3629, %v3928_v30  }
 0x5b2   :  { %v3930_v45 = vpop.eup %3929  ;;  %3947 = vrcp.f32 %v3235_v2 }
 0x5b3   :  { %v3932_v59 = vpop.eup %3931  ;;  %v3023_v10 = vadd.f32 1.0, %v3930_v45  ;;  %3949 = vpow2.f32 %v3569_v53 }
 0x5b4   :  { %v3934_v11 = vpop.eup %3933  ;;  %v3020_v52 = vadd.f32 1.0, %v3932_v59  ;;  %v9986_v59 = vld [vmem:[#allocation162_spill] sm:$0xff] }
 0x5b5   :  { %v3936_v35 = vpop.eup %3935  ;;  %3951 = vrcp.f32 %v3023_v10  ;;  %3052 = vperm.xlu1 %3629, %v3934_v11   ;;  %v9987_v11 = vld [vmem:[#allocation193_spill] sm:$0xff] }
 0x5b6   :  { %v3938_v57 = vpop.eup %3937  ;;  %3953 = vrcp.f32 %v3236_v49 }
 0x5b7   :  { %v3940_v34 = vpop.eup %3939  ;;  %3955 = vrcp.f32 %v3020_v52  ;;  %v3237_v13 = vadd.f32 1.0, %v3938_v57 }
 0x5b8   :  { %v3942_v15 = vpop.eup %3941  ;;  %3067 = vperm.xlu0 %3628, %v3940_v34  }
 0x5b9   :  { %v3240_v51 = vadd.f32 1.0, %v3942_v15  ;;  %3057 = vperm.xlu1 %3629, %v3936_v35   ;;  %v3944_v39 = vpop.eup %3943 }
 0x5ba   :  { %v3022_v17 = vadd.f32 1.0, %v3944_v39 }
 0x5bb   :  { %v3946_v19 = vpop.eup %3945  ;;  %3957 = vrcp.f32 %v3240_v51  ;;  %v9989_v51 = vld [vmem:[#allocation141_spill] sm:$0xff] }
 0x5bc   :  { %v3948_v47 = vpop.eup %3947  ;;  %3284 = vperm.xlu0 %3628, %v3946_v19   ;;  %3959 = vrcp.f32 %v3237_v13 }
 0x5bd   :  { %3269 = vperm.xlu1 %3629, %v3948_v47   ;;  %v3950_v48 = vpop.eup %3949  ;;  %3961 = vrcp.f32 %v3022_v17 }
 0x5be   :  { %v3239_v61 = vadd.f32 1.0, %v3950_v48 }
 0x5bf   :  { %v3952_v16 = vpop.eup %3951 }
 0x5c0   :  { %v3954_v56 = vpop.eup %3953  ;;  %3077 = vperm.xlu0 %3628, %v3952_v16   ;;  %3963 = vrcp.f32 %v3239_v61  ;;  %v9990_v16 = vld [vmem:[#allocation209_spill] sm:$0xff]  ;;  %v9991_v61 = vld [vmem:[#allocation55_spill] sm:$0xff] }
 0x5c1   :  { %3274 = vperm.xlu1 %3629, %v3954_v56   ;;  %v3956_v5 = vpop.eup %3955 }
 0x5c5   :  { %v3958_v63 = vpop.eup %3957  ;;  %3062 = vperm.xlu1 %3629, %v3956_v5  }
 0x5c6   :  { %3294 = vperm.xlu0 %3628, %v3958_v63   ;;  %v3960_v37 = vpop.eup %3959 }
 0x5c7   :  { %v3962_v28 = vpop.eup %3961 }
 0x5c9   :  { %3279 = vperm.xlu1 %3629, %v3960_v37  }
 0x5ca   :  { %3631 = vset.pattern.permute.xlu0 %v9983_v46  ;;  %v3964_v12 = vpop.eup %3963 }
 0x5cb   :  { %3340 = vperm.xlu0 %3631, %v3332_v60  }
 0x5cd   :  { %3072 = vperm.xlu1 %3629, %v3962_v28  }
 0x5d1   :  { %3289 = vperm.xlu1 %3629, %v3964_v12  }
 0x5d5   :  { %3630 = vset.pattern.permute.xlu1 %v9983_v46 }
 0x5d6   :  { %3335 = vperm.xlu1 %3630, %v3331_v58  }
 0x626   :  { %v3048_v9 = vpop.permute.xlu1 %3047 }
 0x627   :  { %v3082_v26 = vmul.f32 %v3048_v9, %v9984_v42  ;;  %v3083_v23 = vmul.f32 %v3048_v9, %v9985_v21  ;;  %v3043_v4 = vpop.permute.xlu0 %3042 }
 0x628   :  { %v3080_v27 = vmul.f32 %v3043_v4, %v8252_v14  ;;  %v3081_v2 = vmul.f32 %v3043_v4, %v8263_v20  ;;  %v9988_v20 = vld [vmem:[#allocation89_spill] sm:$0xff] }
 0x62a   :  { %v3315_v24 = vpack.c.bf16 %v3082_v26, %v3080_v27  ;;  %v3316_v36 = vpack.c.bf16 %v3083_v23, %v3081_v2 }
 0x62c   :  { %v3260_v30 = vpop.permute.xlu1 %3259  ;;  %3352 = vmatprep.subr.bf16.mxu0 %v3316_v36 }
 0x62d   :  { %3353 = vmatpush1.bf16.msra.mxu0 %v3315_v24  ;;  %v3297_v45 = vmul.f32 %v3260_v30, %v8238_v43  ;;  %v3298_v49 = vmul.f32 %v3260_v30, %v8247_v38 }
 0x630   :  { %v3265_v53 = vpop.permute.xlu1 %3264 }
 0x631   :  { %v3299_v10 = vmul.f32 %v3265_v53, %v9986_v59  ;;  %v3300_v35 = vmul.f32 %v3265_v53, %v9987_v11  ;;  %v4001_v11 = vld [vmem:[%s8664_s0] sm:$0xff] }
 0x633   :  { %v3317_v57 = vpack.c.bf16 %v3299_v10, %v3297_v45  ;;  %v3318_v52 = vpack.c.bf16 %v3300_v35, %v3298_v49 }
 0x634   :  { %v3053_v34 = vpop.permute.xlu1 %3052 }
 0x635   :  { %3395 = vmatprep.subr.bf16.mxu1 %v3318_v52  ;;  %v3084_v15 = vmul.f32 %v3053_v34, %v9988_v20  ;;  %v3085_v39 = vmul.f32 %v3053_v34, %v9989_v51 }
 0x636   :  { %3396 = vmatpush1.bf16.msra.mxu1 %v3317_v57 }
 0x637   :  { %v3068_v47 = vpop.permute.xlu0 %3067 }
 0x638   :  { %v3058_v14 = vpop.permute.xlu1 %3057  ;;  %v3091_v60 = vmul.f32 %v3068_v47, %v8433_v31 }
 0x639   :  { %v3086_v13 = vmul.f32 %v3058_v14, %v8299_v22  ;;  %v3087_v43 = vmul.f32 %v3058_v14, %v8313_v41  ;;  %v3090_v41 = vmul.f32 %v3068_v47, %v8430_v62  ;;  %v4002_v14 = vld [vmem:[%s8664_s0 + $0x8] sm:$0xff] }
 0x63a   :  { %v4004_v47 = vld [vmem:[%s8664_s0 + $0x28] sm:$0xff] }
 0x63b   :  { %v3319_v19 = vpack.c.bf16 %v3086_v13, %v3084_v15  ;;  %v3320_v38 = vpack.c.bf16 %v3087_v43, %v3085_v39  ;;  %v3285_v46 = vpop.permute.xlu0 %3284  ;;  %v4003_v13 = vld [vmem:[%s8664_s0 + $0x20] sm:$0xff] }
 0x63c   :  { %v3270_v48 = vpop.permute.xlu1 %3269  ;;  %v3308_v23 = vmul.f32 %v3285_v46, %v8444_v40 }
 0x63d   :  { %3354 = vmatprep.subr.bf16.mxu0 %v3320_v38  ;;  %v3301_v56 = vmul.f32 %v3270_v48, %v9990_v16  ;;  %v3302_v5 = vmul.f32 %v3270_v48, %v9991_v61 }
 0x63e   :  { %3355 = vmatpush1.bf16.msra.mxu0 %v3319_v19 }
 0x63f   :  { %v3078_v21 = vpop.permute.xlu0 %3077 }
 0x640   :  { %v3275_v17 = vpop.permute.xlu1 %3274  ;;  %v3095_v2 = vmul.f32 %v3078_v21, %v8466_v29 }
 0x641   :  { %v3303_v63 = vmul.f32 %v3275_v17, %v8377_v33  ;;  %v3304_v37 = vmul.f32 %v3275_v17, %v8387_v55  ;;  %v3307_v55 = vmul.f32 %v3285_v46, %v8440_v44  ;;  %v4005_v17 = vld [vmem:[%s8664_s0 + $0x10] sm:$0xff] }
 0x642   :  { %v4007_v46 = vld [vmem:[%s8664_s0 + $0x30] sm:$0xff] }
 0x643   :  { %v3321_v28 = vpack.c.bf16 %v3303_v63, %v3301_v56  ;;  %v3322_v22 = vpack.c.bf16 %v3304_v37, %v3302_v5  ;;  %v4006_v5 = vld [vmem:[%s8664_s0 + $0x18] sm:$0xff] }
 0x644   :  { %v3063_v12 = vpop.permute.xlu1 %3062 }
 0x645   :  { %v3088_v58 = vmul.f32 %v3063_v12, %v8296_v7  ;;  %v3089_v9 = vmul.f32 %v3063_v12, %v8310_v3  ;;  %3397 = vmatprep.subr.bf16.mxu1 %v3322_v22  ;;  %v3094_v3 = vmul.f32 %v3078_v21, %v8464_v8  ;;  %v3295_v44 = vpop.permute.xlu0 %3294  ;;  %v4008_v22 = vld [vmem:[%s8664_s0 + $0x38] sm:$0xff] }
 0x646   :  { %3398 = vmatpush1.bf16.msra.mxu1 %v3321_v28  ;;  %v3312_v53 = vmul.f32 %v3295_v44, %v8472_v32 }
 0x647   :  { %v3323_v42 = vpack.c.bf16 %v3090_v41, %v3088_v58  ;;  %v3324_v26 = vpack.c.bf16 %v3091_v60, %v3089_v9 }
 0x648   :  { %v3280_v33 = vpop.permute.xlu1 %3279 }
 0x649   :  { %v3305_v4 = vmul.f32 %v3280_v33, %v8366_v50  ;;  %v3306_v62 = vmul.f32 %v3280_v33, %v8390_v0  ;;  %3356 = vmatprep.subr.bf16.mxu0 %v3324_v26  ;;  %v3311_v0 = vmul.f32 %v3295_v44, %v8470_v18 }
 0x64a   :  { %3357 = vmatpush1.bf16.msra.mxu0 %v3323_v42  ;;  %v3341_v32 = vpop.permute.xlu0 %3340 }
 0x64b   :  { %v3325_v31 = vpack.c.bf16 %v3307_v55, %v3305_v4  ;;  %v3326_v7 = vpack.c.bf16 %v3308_v23, %v3306_v62 }
 0x64c   :  { %v3073_v27 = vpop.permute.xlu1 %3072 }
 0x64d   :  { %v3092_v24 = vmul.f32 %v3073_v27, %v8449_v25  ;;  %v3093_v36 = vmul.f32 %v3073_v27, %v8452_v54  ;;  %3399 = vmatprep.subr.bf16.mxu1 %v3326_v7  ;;  %v3636_v25 = vld [vmem:[%s8672_s8] sm:$0xff]  }
 0x64e   :  { %3400 = vmatpush1.bf16.msra.mxu1 %v3325_v31 }
 0x64f   :  { %v3327_v40 = vpack.c.bf16 %v3094_v3, %v3092_v24  ;;  %v3328_v50 = vpack.c.bf16 %v3095_v2, %v3093_v36 }
 0x650   :  { %v3290_v30 = vpop.permute.xlu1 %3289 }
 0x651   :  { %v3309_v45 = vmul.f32 %v3290_v30, %v8457_v1  ;;  %v3310_v8 = vmul.f32 %v3290_v30, %v8460_v6  ;;  %3358 = vmatprep.subr.bf16.mxu0 %v3328_v50 }
 0x652   :  { %3359 = vmatpush1.bf16.msra.mxu0 %v3327_v40 }
 0x653   :  { %v3329_v54 = vpack.c.bf16 %v3311_v0, %v3309_v45  ;;  %v3330_v29 = vpack.c.bf16 %v3312_v53, %v3310_v8 }
 0x655   :  { %3401 = vmatprep.subr.bf16.mxu1 %v3330_v29  ;;  %3572 = vmatmul.mubr.msk.bf16.vlgmr.msra.gmra.mrb[16].mxu0 %vm3348_vm10, %v3636_v25  ;;  %v3336_v18 = vpop.permute.xlu1 %3335 }
 0x656   :  { %3402 = vmatpush1.bf16.msra.mxu1 %v3329_v54 }
 0x659   :  { %3573 = vmatmul.mubr.msk.bf16.vlgmr.msra.gmra.mrb[16].mxu1 %vm3348_vm10, %v3636_v25 }
 0x728   :  { %v3386_v49 = vpop.f32.mrb[16].mxu0 }
 0x729   :  { %v3388_v59 = vpop.f32.mrb[17].mxu0  ;;  %v3387_v1 = vadd.f32 %v3386_v49, %v3336_v18 }
 0x72a   :  { %v3390_v10 = vpop.f32.mrb[18].mxu0  ;;  %v3389_v6 = vadd.f32 %v3388_v59, %v3336_v18 }
 0x72b   :  { %v3438_v35 = vadd.f32 %v4001_v11, %v3387_v1  ;;  %v3392_v57 = vpop.f32.mrb[19].mxu0  ;;  %v3391_v52 = vadd.f32 %v3390_v10, %v3341_v32 }
 0x72c   :  { %v3429_v34 = vpop.f32.mrb[16].mxu1  ;;  %v3439_v20 = vadd.f32 %v4002_v14, %v3389_v6  ;;  %v3393_v15 = vadd.f32 %v3392_v57, %v3341_v32 }
 0x72d   :  { %v3431_v51 = vpop.f32.mrb[17].mxu1  ;;  %v3430_v39 = vadd.f32 %v3429_v34, %v3336_v18  ;;  %3446 = vst [vmem:[#allocation2] sm:$0xff] %v3438_v35  ;;  %v3442_v43 = vadd.f32 %v4003_v13, %v3391_v52 }
 0x72e   :  { %v3433_v19 = vpop.f32.mrb[18].mxu1  ;;  %v3432_v38 = vadd.f32 %v3431_v51, %v3336_v18  ;;  %3447 = vst [vmem:[#allocation2 + $0x8] sm:$0xff] %v3439_v20  ;;  %v3443_v48 = vadd.f32 %v4004_v47, %v3393_v15 }
 0x72f   :  { %v3440_v16 = vadd.f32 %v4005_v17, %v3430_v39  ;;  %v3435_v56 = vpop.f32.mrb[19].mxu1  ;;  %v3434_v61 = vadd.f32 %v3433_v19, %v3341_v32  ;;  %3450 = vst [vmem:[#allocation2 + $0x20] sm:$0xff] %v3442_v43 }
 0x730   :  { %v3441_v63 = vadd.f32 %v4006_v5, %v3432_v38  ;;  %v3436_v37 = vadd.f32 %v3435_v56, %v3341_v32  ;;  %3451 = vst [vmem:[#allocation2 + $0x28] sm:$0xff] %v3443_v48 }
 0x731   :  { %3448 = vst [vmem:[#allocation2 + $0x10] sm:$0xff] %v3440_v16  ;;  %v3444_v28 = vadd.f32 %v4007_v46, %v3434_v61 }
 0x732   :  { %3449 = vst [vmem:[#allocation2 + $0x18] sm:$0xff] %v3441_v63  ;;  %v3445_v12 = vadd.f32 %v4008_v22, %v3436_v37 }
 0x733   :  { %3452 = vst [vmem:[#allocation2 + $0x30] sm:$0xff] %v3444_v28 }
 0x734   :  { %3453 = vst [vmem:[#allocation2 + $0x38] sm:$0xff] %v3445_v12 }
 0x735   :  { %4020 = shalt.err (!%p4017_p4)
}
 0x736   :  { %s4021_s28 = scalar_lea.hbm %s8674_s10, 1024 }
 0x737   :  { %p4022_p5 = scmp.ne.s32.totalorder %s8674_s10, %s4021_s28  ;;  %p4025_p6 = scmp.lt.u32.totalorder %s4021_s28, %s8674_s10 }
 0x739   :  { %p4027_p7 = pnand %p4025_p6, %p4022_p5 }
 0x73b   :  { %4030 = shalt.err (!%p4027_p7)
}
 0x73c   :  { %s4051_s18 = smov 512   ;;  %s4052_s1 = smov 32  }
 0x73d   :  { %3465 = dma.vmem_to_hbm [thread:$0]  %s3460_s25, 1024, %s8674_s10, [#allocation3], %s4051_s18, %s4051_s18, %s4052_s1  }
 0x73e   :  { %4031 = dma.done.wait [#allocation3], 1024  }
 0x73f   :  { %4032 = vsyncadd [#allocation3], 4294966272 }
 0x740   :  { %3469 = vsyncpa [#allocation3], 1 }

</bundles_post_ra>
